<compile_context>
chip_gen: v7x
topology: tpu7x:2x2x1
jax: 0.10.0
libtpu: 0.0.40
codegen_flags: <defaults>
</compile_context>

<pallas_src>
import jax
import jax.numpy as jnp
from jax.experimental import pallas as pl
from jax.experimental.pallas import tpu as pltpu

_BN_EPS = 1e-5


def _align8(v):
    return ((v + 7) // 8) * 8


def _round_up(v, m):
    return ((v + m - 1) // m) * m


# ---------------------------------------------------------------------------
# in-kernel helpers
# ---------------------------------------------------------------------------
def _affine_prelu(y, aff):
    """y: (..., C) f32; aff: (3, C) f32 with rows = (scale, shift, alpha)."""
    s, b, a = aff[0:1, :], aff[1:2, :], aff[2:3, :]
    z = y * s + b
    return jnp.where(z >= 0, z, a * z)


def _row_conv(h, flat_ref, col_ref, H, W, ph, k, d, w_ref):
    """(k,1) 'same' conv along H: flat row-padded scratch + im2col + ONE matmul.

    h:        (H*W, Cc) f32
    flat_ref: VMEM f32 ((H + 2*ph) * W, Cc)   -- taps are pure sublane slices (no relayout)
    col_ref:  VMEM bf16 (H*W, k*Cc)
    w_ref:    (k*Cc, Cout) bf16  (tap-major row blocks)
    """
    Cc = h.shape[-1]
    M = H * W
    pr = ph * W
    if ph > 0:                                   # zero only the top/bottom halo rows
        flat_ref[0:pr, :] = jnp.zeros((pr, Cc), jnp.float32)
        flat_ref[pr + M:pr + M + pr, :] = jnp.zeros((pr, Cc), jnp.float32)
    flat_ref[pr:pr + M, :] = h
    for a in range(k):
        off = a * d * W
        col_ref[:, a * Cc:(a + 1) * Cc] = flat_ref[off:off + M, :].astype(jnp.bfloat16)
    return jnp.dot(col_ref[...], w_ref[...], preferred_element_type=jnp.float32)


def _plane_conv(h, pad_ref, col_ref, H, W, ph, pw, taps, d, w_ref):
    """General 'same' conv: zero-padded plane scratch -> im2col -> ONE matmul.

    h:       (H*W, Cc) f32
    pad_ref: VMEM f32 (H + 2*ph, W + 2*align8(pw), Cc); interior stored at the
             sublane-aligned column offset align8(pw), tap reads are shifted windows.
    col_ref: VMEM bf16 (H*W, T*Cc)
    taps:    sequence of (a, b) kernel tap coordinates
    w_ref:   (T*Cc, Cout) bf16 (tap-major row blocks, same order as `taps`)
    """
    Cc = h.shape[-1]
    M = H * W
    woff = _align8(pw)
    Wp = W + 2 * woff
    # Zero ONLY the halo strips that taps can read; done every grid step so the kernel
    # stays correct under "parallel" grid sharding (no reliance on program_id == 0).
    if ph > 0:
        pad_ref[0:ph, :, :] = jnp.zeros((ph, Wp, Cc), jnp.float32)
        pad_ref[ph + H:ph + H + ph, :, :] = jnp.zeros((ph, Wp, Cc), jnp.float32)
    if pw > 0:
        pad_ref[ph:ph + H, woff - pw:woff, :] = jnp.zeros((H, pw, Cc), jnp.float32)
        pad_ref[ph:ph + H, woff + W:woff + W + pw, :] = jnp.zeros((H, pw, Cc), jnp.float32)
    pad_ref[ph:ph + H, woff:woff + W, :] = h.reshape(H, W, Cc)
    for t, (a, b) in enumerate(taps):
        ws = woff - pw + b * d
        col_ref[:, t * Cc:(t + 1) * Cc] = (
            pad_ref[a * d:a * d + H, ws:ws + W, :].reshape(M, Cc).astype(jnp.bfloat16))
    return jnp.dot(col_ref[...], w_ref[...], preferred_element_type=jnp.float32)


# ---------------------------------------------------------------------------
# fused REGULAR bottleneck (regular kxk or asymmetric (k,1)+(1,k) conv)
# ---------------------------------------------------------------------------
def _make_regular_call(N, H, W, C, k, d, asym):
    Ch = C // 2
    M = H * W
    pad = d * (k - 1) // 2
    taps_col = tuple((0, b) for b in range(k))                  # (1,k) conv taps
    taps_full = tuple((a, b) for a in range(k) for b in range(k))  # kxk conv taps

    def kernel(*args):
        if asym:
            (x_ref, wp_ref, wc1_ref, wc2_ref, we_ref,
             a1_ref, a2_ref, a3_ref, o_ref, flat_sc, pad_sc, col_sc) = args
        else:
            (x_ref, wp_ref, wc_ref, we_ref,
             a1_ref, a2_ref, a3_ref, o_ref, pad_sc, col_sc) = args
        x2d = x_ref[0].reshape(M, C)                            # bf16 input block
        # 1x1 projection (bias=False) + BN1 + PReLU1
        h = jnp.dot(x2d, wp_ref[...], preferred_element_type=jnp.float32)
        h = _affine_prelu(h, a1_ref[...])
        # main conv ('same' padding, dilation d) + BN2(+bias) + PReLU2
        if asym:
            h = _row_conv(h, flat_sc, col_sc, H, W, pad, k, d, wc1_ref)      # (k,1)
            h = _plane_conv(h, pad_sc, col_sc, H, W, 0, pad, taps_col, d, wc2_ref)  # (1,k)
        else:
            h = _plane_conv(h, pad_sc, col_sc, H, W, pad, pad, taps_full, d, wc_ref)
        h = _affine_prelu(h, a2_ref[...])
        # 1x1 expansion (bias=False) + BN3 + PReLU3 (FeatureAlphaDropout = identity)
        h = jnp.dot(h.astype(jnp.bfloat16), we_ref[...],
                    preferred_element_type=jnp.float32)
        h = _affine_prelu(h, a3_ref[...])
        o_ref[0] = h.reshape(H, W, C).astype(o_ref.dtype)

    in_specs = [
        pl.BlockSpec((1, H, W, C), lambda n: (n, 0, 0, 0)),          # x (per batch elem)
        pl.BlockSpec((C, Ch), lambda n: (0, 0)),                     # projection weight
    ]
    if asym:
        in_specs += [pl.BlockSpec((k * Ch, Ch), lambda n: (0, 0)),   # (k,1) weight
                     pl.BlockSpec((k * Ch, Ch), lambda n: (0, 0))]   # (1,k) weight
        scratch = [pltpu.VMEM(((H + 2 * pad) * W, Ch), jnp.float32),
                   pltpu.VMEM((H, W + 2 * _align8(pad), Ch), jnp.float32),
                   pltpu.VMEM((M, k * Ch), jnp.bfloat16)]            # shared im2col buf
    else:
        in_specs += [pl.BlockSpec((k * k * Ch, Ch), lambda n: (0, 0))]
        scratch = [pltpu.VMEM((H + 2 * pad, W + 2 * _align8(pad), Ch), jnp.float32),
                   pltpu.VMEM((M, k * k * Ch), jnp.bfloat16)]
    in_specs += [
        pl.BlockSpec((Ch, C), lambda n: (0, 0)),                     # expansion weight
        pl.BlockSpec((3, Ch), lambda n: (0, 0)),                     # BN1/PReLU1
        pl.BlockSpec((3, Ch), lambda n: (0, 0)),                     # BN2/PReLU2
        pl.BlockSpec((3, C), lambda n: (0, 0)),                      # BN3/PReLU3
    ]
    return pl.pallas_call(
        kernel,
        out_shape=jax.ShapeDtypeStruct((N, H, W, C), jnp.bfloat16),
        grid=(N,),
        in_specs=in_specs,
        out_specs=pl.BlockSpec((1, H, W, C), lambda n: (n, 0, 0, 0)),
        scratch_shapes=scratch,
        compiler_params=pltpu.CompilerParams(dimension_semantics=("parallel",)),
    )


# ---------------------------------------------------------------------------
# fused DOWNSAMPLING bottleneck (2x2/s2 proj + 3x3 conv + expand + maxpool + tail)
# ---------------------------------------------------------------------------
def _make_downsample_call(N, H, W, Cin, Cout, Chp):
    Cof = Cout - Cin
    Ho, Wo = H // 2, W // 2
    M = Ho * Wo
    taps = tuple((a, b) for a in range(3) for b in range(3))

    def kernel(xp_ref, wp_ref, wc_ref, we_ref, a1_ref, a2_ref, a3_ref,
               o_ref, idx_ref, pad_sc, col_sc):
        xp3 = xp_ref[0]                        # (Ho, Wo, 4*Cin) bf16: 2x2 window on lanes
        # --- convolutional branch -------------------------------------------------
        h = jnp.dot(xp3.reshape(M, 4 * Cin), wp_ref[...],
                    preferred_element_type=jnp.float32)           # 2x2/s2 projection
        h = _affine_prelu(h, a1_ref[...])                          # BN1 + PReLU1
        h = _plane_conv(h, pad_sc, col_sc, Ho, Wo, 1, 1, taps, 1, wc_ref)  # 3x3 'same'
        h = _affine_prelu(h, a2_ref[...])                          # BN2(+bias) + PReLU2
        out3 = jnp.dot(h.astype(jnp.bfloat16), we_ref[...],
                       preferred_element_type=jnp.float32)         # 1x1 expansion
        aff3 = a3_ref[...]
        out3 = _affine_prelu(out3, aff3[:, :Cof])                  # BN3/PReLU3 (ch 0:Cof)
        # --- 2x2/s2 max-pool branch (values + torch flat h*W+w indices) ------------
        hoi = jax.lax.broadcasted_iota(jnp.int32, (Ho, Wo, Cin), 0)
        woi = jax.lax.broadcasted_iota(jnp.int32, (Ho, Wo, Cin), 1)
        base = hoi * (2 * W) + woi * 2
        offs = (0, 1, W, W + 1)                # window scan order (0,0),(0,1),(1,0),(1,1)
        v = xp3[:, :, 0:Cin]
        idx = base
        for t in range(1, 4):
            xt = xp3[:, :, t * Cin:(t + 1) * Cin]
            take = xt > v                      # strict '>' -> first max wins on ties
            v = jnp.where(take, xt, v)
            idx = jnp.where(take, base + offs[t], idx)
        out4 = _affine_prelu(v.astype(jnp.float32), aff3[:, Cof:])  # BN3/PReLU3 (ch Cof:)
        # --- concatenated-channel writeback via direct sliced stores ---------------
        # (ConstantPad3d: zero indices for the first Cof channels)
        o_ref[0, :, :, :Cof] = out3.reshape(Ho, Wo, Cof).astype(o_ref.dtype)
        o_ref[0, :, :, Cof:] = out4.astype(o_ref.dtype)
        idx_ref[0, :, :, :Cof] = jnp.zeros((Ho, Wo, Cof), jnp.int32)
        idx_ref[0, :, :, Cof:] = idx

    return pl.pallas_call(
        kernel,
        out_shape=(jax.ShapeDtypeStruct((N, Ho, Wo, Cout), jnp.bfloat16),
                   jax.ShapeDtypeStruct((N, Ho, Wo, Cout), jnp.int32)),
        grid=(N,),
        in_specs=[
            pl.BlockSpec((1, Ho, Wo, 4 * Cin), lambda n: (n, 0, 0, 0)),  # packed input
            pl.BlockSpec((4 * Cin, Chp), lambda n: (0, 0)),              # 2x2 proj weight
            pl.BlockSpec((9 * Chp, Chp), lambda n: (0, 0)),              # 3x3 conv weight
            pl.BlockSpec((Chp, Cof), lambda n: (0, 0)),                  # expansion weight
            pl.BlockSpec((3, Chp), lambda n: (0, 0)),                    # BN1/PReLU1
            pl.BlockSpec((3, Chp), lambda n: (0, 0)),                    # BN2/PReLU2
            pl.BlockSpec((3, Cout), lambda n: (0, 0)),                   # BN3/PReLU3
        ],
        out_specs=(pl.BlockSpec((1, Ho, Wo, Cout), lambda n: (n, 0, 0, 0)),
                   pl.BlockSpec((1, Ho, Wo, Cout), lambda n: (n, 0, 0, 0))),
        scratch_shapes=[pltpu.VMEM((Ho + 2, Wo + 2 * _align8(1), Chp), jnp.float32),
                        pltpu.VMEM((M, 9 * Chp), jnp.bfloat16)],
        compiler_params=pltpu.CompilerParams(dimension_semantics=("parallel",)),
    )


# ---------------------------------------------------------------------------
# NHWC-native forward functions (use these to chain layers without transposes)
# ---------------------------------------------------------------------------
def regular_bottleneck_forward_nhwc(x_nhwc, params):
    N, H, W, C = x_nhwc.shape
    call = _make_regular_call(N, H, W, C, params['kernel_size'],
                              params['dilation'], params['asym'])
    x = x_nhwc.astype(jnp.bfloat16)
    if params['asym']:
        return call(x, params['wp'], params['wc1'], params['wc2'], params['we'],
                    params['aff1'], params['aff2'], params['aff3'])
    return call(x, params['wp'], params['wc'], params['we'],
                params['aff1'], params['aff2'], params['aff3'])


def downsample_bottleneck_forward_nhwc(x_nhwc, params):
    N, H, W, Cin = x_nhwc.shape
    assert H % 2 == 0 and W % 2 == 0
    Ho, Wo = H // 2, W // 2
    Cout = params['aff3'].shape[-1]
    # Pack each 2x2/stride-2 window onto the lane axis (one cheap bf16 XLA op); this is
    # the natural input of the fused kernel (feeds BOTH the 2x2/s2 conv and the maxpool).
    xp = (x_nhwc.astype(jnp.bfloat16)
          .reshape(N, Ho, 2, Wo, 2, Cin)
          .transpose(0, 1, 3, 2, 4, 5)
          .reshape(N, Ho, Wo, 4 * Cin))
    call = _make_downsample_call(N, H, W, Cin, Cout, params['chp'])
    return call(xp, params['wp'], params['wc'], params['we'],
                params['aff1'], params['aff2'], params['aff3'])


# ---------------------------------------------------------------------------
# NCHW module-boundary wrappers (transpose only at the boundary)
# ---------------------------------------------------------------------------
def regular_bottleneck_forward(x_nchw, params, indices=None):
    """Bottleneck(REGULAR, REGULAR/ASYMMETRIC conv).forward -> (out, indices)."""
    out = regular_bottleneck_forward_nhwc(jnp.transpose(x_nchw, (0, 2, 3, 1)), params)
    return jnp.transpose(out, (0, 3, 1, 2)).astype(jnp.float32), indices


def downsample_bottleneck_forward(x_nchw, params):
    """Bottleneck(DOWNSAMPLING, REGULAR 3x3 conv).forward -> (out, pool_indices)."""
    out, idx = downsample_bottleneck_forward_nhwc(
        jnp.transpose(x_nchw, (0, 2, 3, 1)), params)
    return (jnp.transpose(out, (0, 3, 1, 2)).astype(jnp.float32),
            jnp.transpose(idx, (0, 3, 1, 2)))


# ---------------------------------------------------------------------------
# deterministic synthetic parameters (eval-mode BN folded with conv bias + PReLU)
# ---------------------------------------------------------------------------
def _keygen(key):
    def nxt():
        nonlocal key
        key, sub = jax.random.split(key)
        return sub
    return nxt


def _conv_w(nk, kh, kw, cin, cout):
    return 0.1 * jax.random.normal(nk(), (kh, kw, cin, cout), jnp.float32)


def _bn(nk, c):
    gamma = 1.0 + 0.1 * jax.random.normal(nk(), (c,), jnp.float32)
    beta = 0.1 * jax.random.normal(nk(), (c,), jnp.float32)
    mean = 0.05 * jax.random.normal(nk(), (c,), jnp.float32)
    var = 1.0 + 0.1 * jnp.abs(jax.random.normal(nk(), (c,), jnp.float32))
    return gamma, beta, mean, var


def _prelu(nk, c):
    return 0.25 + 0.05 * jax.random.normal(nk(), (c,), jnp.float32)


def _fold(bn, bias, alpha):
    """Fold eval-mode BN (+ optional conv bias) and PReLU alpha into (3, C) f32."""
    gamma, beta, mean, var = bn
    scale = gamma / jnp.sqrt(var + _BN_EPS)
    b = bias if bias is not None else jnp.zeros_like(gamma)
    shift = beta + scale * (b - mean)
    return jnp.stack([scale, shift, alpha], axis=0)


def _pad_aff(aff, cp):
    """Pad (3, C) affine to (3, cp) with identity-zero channels (scale=1, shift=alpha=0)."""
    c = aff.shape[1]
    if cp == c:
        return aff
    pad = jnp.zeros((3, cp - c), jnp.float32).at[0].set(1.0)
    return jnp.concatenate([aff, pad], axis=1)


def make_regular_params(key, C, *, kernel_size=3, dilation=1, asym=False):
    nk = _keygen(key)
    Ch = C // 2
    k = kernel_size
    p = {'asym': asym, 'dilation': dilation, 'kernel_size': k}
    p['wp'] = _conv_w(nk, 1, 1, C, Ch).reshape(C, Ch).astype(jnp.bfloat16)
    p['aff1'] = _fold(_bn(nk, Ch), None, _prelu(nk, Ch))
    if asym:
        # nn.Sequential(Conv2d((k,1), bias=False), Conv2d((1,k), bias=False))
        p['wc1'] = _conv_w(nk, k, 1, Ch, Ch).reshape(k * Ch, Ch).astype(jnp.bfloat16)
        p['wc2'] = _conv_w(nk, 1, k, Ch, Ch).reshape(k * Ch, Ch).astype(jnp.bfloat16)
        conv_bias = None
    else:
        # nn.Conv2d(kxk, padding='same', dilation) -- default bias=True
        p['wc'] = _conv_w(nk, k, k, Ch, Ch).reshape(k * k * Ch, Ch).astype(jnp.bfloat16)
        conv_bias = 0.1 * jax.random.normal(nk(), (Ch,), jnp.float32)
    p['aff2'] = _fold(_bn(nk, Ch), conv_bias, _prelu(nk, Ch))
    p['we'] = _conv_w(nk, 1, 1, Ch, C).reshape(Ch, C).astype(jnp.bfloat16)
    p['aff3'] = _fold(_bn(nk, C), None, _prelu(nk, C))
    return p


def make_downsample_params(key, Cin, Cout):
    nk = _keygen(key)
    Cof = Cout - Cin
    Ch = Cof // 2
    Chp = _round_up(Ch, 32)          # lane / MXU-friendly internal width (zero-padded)
    p = {'chp': Chp}
    wp = _conv_w(nk, 2, 2, Cin, Ch).reshape(4 * Cin, Ch)
    p['wp'] = jnp.zeros((4 * Cin, Chp), jnp.float32).at[:, :Ch].set(wp).astype(jnp.bfloat16)
    p['aff1'] = _pad_aff(_fold(_bn(nk, Ch), None, _prelu(nk, Ch)), Chp)
    wc = _conv_w(nk, 3, 3, Ch, Ch)
    wc_p = jnp.zeros((3, 3, Chp, Chp), jnp.float32).at[:, :, :Ch, :Ch].set(wc)
    p['wc'] = wc_p.reshape(9 * Chp, Chp).astype(jnp.bfloat16)
    conv_bias = 0.1 * jax.random.normal(nk(), (Ch,), jnp.float32)   # conv bias=True
    p['aff2'] = _pad_aff(_fold(_bn(nk, Ch), conv_bias, _prelu(nk, Ch)), Chp)
    we = _conv_w(nk, 1, 1, Ch, Cof).reshape(Ch, Cof)
    p['we'] = jnp.zeros((Chp, Cof), jnp.float32).at[:Ch].set(we).astype(jnp.bfloat16)
    p['aff3'] = _fold(_bn(nk, Cout), None, _prelu(nk, Cout))
    return p


# ---------------------------------------------------------------------------
if __name__ == "__main__":
    root = jax.random.PRNGKey(0)
    kx1, kx2, kx3, kp1, kp2, kp3 = jax.random.split(root, 6)

    # REGULAR bottleneck, regular 3x3 conv, dilation=1, 64 channels, 16x16 spatial.
    x_reg = jax.random.normal(kx1, (2, 64, 16, 16), jnp.float32)
    p_reg = make_regular_params(kp1, 64, kernel_size=3, dilation=1, asym=False)
    y_reg, _ = jax.jit(lambda x: regular_bottleneck_forward(x, p_reg))(x_reg)

    # REGULAR bottleneck, ASYMMETRIC (5,1)+(1,5) conv, dilation=2, 128 channels
    # (full-lane output), 16x16 spatial.
    x_asym = jax.random.normal(kx2, (2, 128, 16, 16), jnp.float32)
    p_asym = make_regular_params(kp2, 128, kernel_size=5, dilation=2, asym=True)
    y_asym, _ = jax.jit(lambda x: regular_bottleneck_forward(x, p_asym))(x_asym)

    # DOWNSAMPLING bottleneck, 16 -> 64 channels, 16x16 -> 8x8, with pool indices.
    x_dn = jax.random.normal(kx3, (2, 16, 16, 16), jnp.float32)
    p_dn = make_downsample_params(kp3, 16, 64)
    y_dn, idx_dn = jax.jit(lambda x: downsample_bottleneck_forward(x, p_dn))(x_dn)

    # NHWC-native chain (downsample -> regular) with NO per-layer transposes.
    def chain(x_nhwc):
        h, idx = downsample_bottleneck_forward_nhwc(x_nhwc, p_dn)
        h = regular_bottleneck_forward_nhwc(h, p_reg)     # 64 ch @ 8x8
        return h, idx
    y_chain, idx_chain = jax.jit(chain)(jnp.transpose(x_dn, (0, 2, 3, 1)))

    jax.block_until_ready((y_reg, y_asym, y_dn, idx_dn, y_chain, idx_chain))

    assert y_reg.shape == (2, 64, 16, 16), y_reg.shape
    assert y_asym.shape == (2, 128, 16, 16), y_asym.shape
    assert y_dn.shape == (2, 64, 8, 8), y_dn.shape
    assert idx_dn.shape == (2, 64, 8, 8), idx_dn.shape
    assert y_chain.shape == (2, 8, 8, 64), y_chain.shape
    assert bool(jnp.isfinite(y_reg).all() & jnp.isfinite(y_asym).all()
                & jnp.isfinite(y_dn).all() & jnp.isfinite(y_chain.astype(jnp.float32)).all())
    # indices: first (Cout - Cin) = 48 channels are the ConstantPad3d zeros,
    # the remaining 16 channels hold valid flattened h*W + w positions.
    assert bool((idx_dn[:, :48] == 0).all())
    assert bool(((idx_dn[:, 48:] >= 0) & (idx_dn[:, 48:] < 16 * 16)).all())
    print("KERNEL_OK")
</pallas_src>

<mosaic_0001>
module attributes {stable_mosaic.version = 11 : i64} {
  func.func @kernel(%arg0: i32, %arg1: memref<1x16x16x64xbf16, #tpu.memory_space<vmem>>, %arg2: memref<64x32xbf16, #tpu.memory_space<vmem>>, %arg3: memref<288x32xbf16, #tpu.memory_space<vmem>>, %arg4: memref<32x64xbf16, #tpu.memory_space<vmem>>, %arg5: memref<3x32xf32, #tpu.memory_space<vmem>>, %arg6: memref<3x32xf32, #tpu.memory_space<vmem>>, %arg7: memref<3x64xf32, #tpu.memory_space<vmem>>, %arg8: memref<1x16x16x64xbf16, #tpu.memory_space<vmem>>, %arg9: memref<18x32x32xf32, #tpu.memory_space<vmem>>, %arg10: memref<256x288xbf16, #tpu.memory_space<vmem>>) attributes {dimension_semantics = [#tpu.dimension_semantics<parallel>], iteration_bounds = array<i64: 2>, scalar_prefetch = 0 : i64, scratch_operands = 2 : i64, tpu.core_type = #tpu.core_type<tc>, window_params = [{transform_indices = @transform_0, window_bounds = array<i64: 1, 16, 16, 64>}, {pipeline_mode = #tpu.pipeline_mode<synchronous>, transform_indices = @transform_1, window_bounds = array<i64: 64, 32>}, {pipeline_mode = #tpu.pipeline_mode<synchronous>, transform_indices = @transform_2, window_bounds = array<i64: 288, 32>}, {pipeline_mode = #tpu.pipeline_mode<synchronous>, transform_indices = @transform_3, window_bounds = array<i64: 32, 64>}, {pipeline_mode = #tpu.pipeline_mode<synchronous>, transform_indices = @transform_4, window_bounds = array<i64: 3, 32>}, {pipeline_mode = #tpu.pipeline_mode<synchronous>, transform_indices = @transform_5, window_bounds = array<i64: 3, 32>}, {pipeline_mode = #tpu.pipeline_mode<synchronous>, transform_indices = @transform_6, window_bounds = array<i64: 3, 64>}, {transform_indices = @transform_7, window_bounds = array<i64: 1, 16, 16, 64>}]} {
    %c0 = arith.constant 0 : index
    %c0_0 = arith.constant 0 : index
    %c0_1 = arith.constant 0 : index
    %c0_2 = arith.constant 0 : index
    %0 = vector.load %arg1[%c0, %c0_0, %c0_1, %c0_2] : memref<1x16x16x64xbf16, #tpu.memory_space<vmem>>, vector<1x16x16x64xbf16>
    %1 = vector.shape_cast %0 : vector<1x16x16x64xbf16> to vector<16x16x64xbf16>
    %2 = vector.shape_cast %1 : vector<16x16x64xbf16> to vector<256x64xbf16>
    %c0_3 = arith.constant 0 : index
    %c0_4 = arith.constant 0 : index
    %3 = vector.load %arg2[%c0_3, %c0_4] : memref<64x32xbf16, #tpu.memory_space<vmem>>, vector<64x32xbf16>
    %cst = arith.constant dense<0.000000e+00> : vector<256x32xf32>
    %4 = tpu.matmul %2, %3, %cst {dimension_numbers = #tpu.dot_dimension_numbers<[1], [0], [0], [1], [0, 0, 1, 1], [], []>} : vector<256x64xbf16>, vector<64x32xbf16>, vector<256x32xf32> -> vector<256x32xf32>
    %c0_5 = arith.constant 0 : index
    %c0_6 = arith.constant 0 : index
    %5 = vector.load %arg5[%c0_5, %c0_6] : memref<3x32xf32, #tpu.memory_space<vmem>>, vector<3x32xf32>
    %6 = vector.extract_strided_slice %5 {offsets = [0, 0], sizes = [1, 32], strides = [1, 1]} : vector<3x32xf32> to vector<1x32xf32>
    %7 = vector.extract_strided_slice %5 {offsets = [1, 0], sizes = [1, 32], strides = [1, 1]} : vector<3x32xf32> to vector<1x32xf32>
    %8 = vector.extract_strided_slice %5 {offsets = [2, 0], sizes = [1, 32], strides = [1, 1]} : vector<3x32xf32> to vector<1x32xf32>
    %9 = vector.broadcast %6 : vector<1x32xf32> to vector<256x32xf32>
    %10 = arith.mulf %4, %9 : vector<256x32xf32>
    %11 = vector.broadcast %7 : vector<1x32xf32> to vector<256x32xf32>
    %12 = arith.addf %10, %11 : vector<256x32xf32>
    %cst_7 = arith.constant 0.000000e+00 : f32
    %13 = vector.broadcast %cst_7 : f32 to vector<256x32xf32>
    %14 = arith.cmpf oge, %12, %13 : vector<256x32xf32>
    %15 = vector.broadcast %8 : vector<1x32xf32> to vector<256x32xf32>
    %16 = arith.mulf %15, %12 : vector<256x32xf32>
    %17 = arith.select %14, %12, %16 : vector<256x32xi1>, vector<256x32xf32>
    %cst_8 = arith.constant 0.000000e+00 : f32
    %18 = vector.broadcast %cst_8 : f32 to vector<1x32x32xf32>
    %c0_9 = arith.constant 0 : index
    %c0_10 = arith.constant 0 : index
    %c0_11 = arith.constant 0 : index
    %19 = vector.load %arg9[%c0_9, %c0_10, %c0_11] : memref<18x32x32xf32, #tpu.memory_space<vmem>>, vector<1x32x32xf32>
    tpu.vector_store %arg9[%c0_9, %c0_10, %c0_11], %18 {strides = array<i32>} : memref<18x32x32xf32, #tpu.memory_space<vmem>>, vector<1x32x32xf32>,
    %cst_12 = arith.constant 0.000000e+00 : f32
    %20 = vector.broadcast %cst_12 : f32 to vector<1x32x32xf32>
    %c17 = arith.constant 17 : index
    %c0_13 = arith.constant 0 : index
    %c0_14 = arith.constant 0 : index
    %21 = vector.load %arg9[%c17, %c0_13, %c0_14] : memref<18x32x32xf32, #tpu.memory_space<vmem>>, vector<1x32x32xf32>
    tpu.vector_store %arg9[%c17, %c0_13, %c0_14], %20 {strides = array<i32>} : memref<18x32x32xf32, #tpu.memory_space<vmem>>, vector<1x32x32xf32>,
    %cst_15 = arith.constant 0.000000e+00 : f32
    %22 = vector.broadcast %cst_15 : f32 to vector<16x1x32xf32>
    %c1 = arith.constant 1 : index
    %c7 = arith.constant 7 : index
    %c0_16 = arith.constant 0 : index
    %23 = vector.load %arg9[%c1, %c7, %c0_16] : memref<18x32x32xf32, #tpu.memory_space<vmem>>, vector<16x1x32xf32>
    tpu.vector_store %arg9[%c1, %c7, %c0_16], %22 {strides = array<i32>} : memref<18x32x32xf32, #tpu.memory_space<vmem>>, vector<16x1x32xf32>,
    %cst_17 = arith.constant 0.000000e+00 : f32
    %24 = vector.broadcast %cst_17 : f32 to vector<16x1x32xf32>
    %c1_18 = arith.constant 1 : index
    %c24 = arith.constant 24 : index
    %c0_19 = arith.constant 0 : index
    %25 = vector.load %arg9[%c1_18, %c24, %c0_19] : memref<18x32x32xf32, #tpu.memory_space<vmem>>, vector<16x1x32xf32>
    tpu.vector_store %arg9[%c1_18, %c24, %c0_19], %24 {strides = array<i32>} : memref<18x32x32xf32, #tpu.memory_space<vmem>>, vector<16x1x32xf32>,
    %26 = vector.shape_cast %17 : vector<256x32xf32> to vector<16x16x32xf32>
    %c1_20 = arith.constant 1 : index
    %c8 = arith.constant 8 : index
    %c0_21 = arith.constant 0 : index
    %27 = vector.load %arg9[%c1_20, %c8, %c0_21] : memref<18x32x32xf32, #tpu.memory_space<vmem>>, vector<16x16x32xf32>
    tpu.vector_store %arg9[%c1_20, %c8, %c0_21], %26 {strides = array<i32>} : memref<18x32x32xf32, #tpu.memory_space<vmem>>, vector<16x16x32xf32>,
    %c0_22 = arith.constant 0 : index
    %c7_23 = arith.constant 7 : index
    %c0_24 = arith.constant 0 : index
    %28 = vector.load %arg9[%c0_22, %c7_23, %c0_24] : memref<18x32x32xf32, #tpu.memory_space<vmem>>, vector<16x16x32xf32>
    %29 = vector.shape_cast %28 : vector<16x16x32xf32> to vector<256x32xf32>
    %30 = arith.truncf %29 : vector<256x32xf32> to vector<256x32xbf16>
    %c0_25 = arith.constant 0 : index
    %c0_26 = arith.constant 0 : index
    %31 = vector.load %arg10[%c0_25, %c0_26] : memref<256x288xbf16, #tpu.memory_space<vmem>>, vector<256x32xbf16>
    tpu.vector_store %arg10[%c0_25, %c0_26], %30 {strides = array<i32>} : memref<256x288xbf16, #tpu.memory_space<vmem>>, vector<256x32xbf16>,
    %c0_27 = arith.constant 0 : index
    %c8_28 = arith.constant 8 : index
    %c0_29 = arith.constant 0 : index
    %32 = vector.load %arg9[%c0_27, %c8_28, %c0_29] : memref<18x32x32xf32, #tpu.memory_space<vmem>>, vector<16x16x32xf32>
    %33 = vector.shape_cast %32 : vector<16x16x32xf32> to vector<256x32xf32>
    %34 = arith.truncf %33 : vector<256x32xf32> to vector<256x32xbf16>
    %c0_30 = arith.constant 0 : index
    %c32 = arith.constant 32 : index
    %35 = vector.load %arg10[%c0_30, %c32] : memref<256x288xbf16, #tpu.memory_space<vmem>>, vector<256x32xbf16>
    tpu.vector_store %arg10[%c0_30, %c32], %34 {strides = array<i32>} : memref<256x288xbf16, #tpu.memory_space<vmem>>, vector<256x32xbf16>,
    %c0_31 = arith.constant 0 : index
    %c9 = arith.constant 9 : index
    %c0_32 = arith.constant 0 : index
    %36 = vector.load %arg9[%c0_31, %c9, %c0_32] : memref<18x32x32xf32, #tpu.memory_space<vmem>>, vector<16x16x32xf32>
    %37 = vector.shape_cast %36 : vector<16x16x32xf32> to vector<256x32xf32>
    %38 = arith.truncf %37 : vector<256x32xf32> to vector<256x32xbf16>
    %c0_33 = arith.constant 0 : index
    %c64 = arith.constant 64 : index
    %39 = vector.load %arg10[%c0_33, %c64] : memref<256x288xbf16, #tpu.memory_space<vmem>>, vector<256x32xbf16>
    tpu.vector_store %arg10[%c0_33, %c64], %38 {strides = array<i32>} : memref<256x288xbf16, #tpu.memory_space<vmem>>, vector<256x32xbf16>,
    %c1_34 = arith.constant 1 : index
    %c7_35 = arith.constant 7 : index
    %c0_36 = arith.constant 0 : index
    %40 = vector.load %arg9[%c1_34, %c7_35, %c0_36] : memref<18x32x32xf32, #tpu.memory_space<vmem>>, vector<16x16x32xf32>
    %41 = vector.shape_cast %40 : vector<16x16x32xf32> to vector<256x32xf32>
    %42 = arith.truncf %41 : vector<256x32xf32> to vector<256x32xbf16>
    %c0_37 = arith.constant 0 : index
    %c96 = arith.constant 96 : index
    %43 = vector.load %arg10[%c0_37, %c96] : memref<256x288xbf16, #tpu.memory_space<vmem>>, vector<256x32xbf16>
    tpu.vector_store %arg10[%c0_37, %c96], %42 {strides = array<i32>} : memref<256x288xbf16, #tpu.memory_space<vmem>>, vector<256x32xbf16>,
    %c1_38 = arith.constant 1 : index
    %c8_39 = arith.constant 8 : index
    %c0_40 = arith.constant 0 : index
    %44 = vector.load %arg9[%c1_38, %c8_39, %c0_40] : memref<18x32x32xf32, #tpu.memory_space<vmem>>, vector<16x16x32xf32>
    %45 = vector.shape_cast %44 : vector<16x16x32xf32> to vector<256x32xf32>
    %46 = arith.truncf %45 : vector<256x32xf32> to vector<256x32xbf16>
    %c0_41 = arith.constant 0 : index
    %c128 = arith.constant 128 : index
    %47 = vector.load %arg10[%c0_41, %c128] : memref<256x288xbf16, #tpu.memory_space<vmem>>, vector<256x32xbf16>
    tpu.vector_store %arg10[%c0_41, %c128], %46 {strides = array<i32>} : memref<256x288xbf16, #tpu.memory_space<vmem>>, vector<256x32xbf16>,
    %c1_42 = arith.constant 1 : index
    %c9_43 = arith.constant 9 : index
    %c0_44 = arith.constant 0 : index
    %48 = vector.load %arg9[%c1_42, %c9_43, %c0_44] : memref<18x32x32xf32, #tpu.memory_space<vmem>>, vector<16x16x32xf32>
    %49 = vector.shape_cast %48 : vector<16x16x32xf32> to vector<256x32xf32>
    %50 = arith.truncf %49 : vector<256x32xf32> to vector<256x32xbf16>
    %c0_45 = arith.constant 0 : index
    %c160 = arith.constant 160 : index
    %51 = vector.load %arg10[%c0_45, %c160] : memref<256x288xbf16, #tpu.memory_space<vmem>>, vector<256x32xbf16>
    tpu.vector_store %arg10[%c0_45, %c160], %50 {strides = array<i32>} : memref<256x288xbf16, #tpu.memory_space<vmem>>, vector<256x32xbf16>,
    %c2 = arith.constant 2 : index
    %c7_46 = arith.constant 7 : index
    %c0_47 = arith.constant 0 : index
    %52 = vector.load %arg9[%c2, %c7_46, %c0_47] : memref<18x32x32xf32, #tpu.memory_space<vmem>>, vector<16x16x32xf32>
    %53 = vector.shape_cast %52 : vector<16x16x32xf32> to vector<256x32xf32>
    %54 = arith.truncf %53 : vector<256x32xf32> to vector<256x32xbf16>
    %c0_48 = arith.constant 0 : index
    %c192 = arith.constant 192 : index
    %55 = vector.load %arg10[%c0_48, %c192] : memref<256x288xbf16, #tpu.memory_space<vmem>>, vector<256x32xbf16>
    tpu.vector_store %arg10[%c0_48, %c192], %54 {strides = array<i32>} : memref<256x288xbf16, #tpu.memory_space<vmem>>, vector<256x32xbf16>,
    %c2_49 = arith.constant 2 : index
    %c8_50 = arith.constant 8 : index
    %c0_51 = arith.constant 0 : index
    %56 = vector.load %arg9[%c2_49, %c8_50, %c0_51] : memref<18x32x32xf32, #tpu.memory_space<vmem>>, vector<16x16x32xf32>
    %57 = vector.shape_cast %56 : vector<16x16x32xf32> to vector<256x32xf32>
    %58 = arith.truncf %57 : vector<256x32xf32> to vector<256x32xbf16>
    %c0_52 = arith.constant 0 : index
    %c224 = arith.constant 224 : index
    %59 = vector.load %arg10[%c0_52, %c224] : memref<256x288xbf16, #tpu.memory_space<vmem>>, vector<256x32xbf16>
    tpu.vector_store %arg10[%c0_52, %c224], %58 {strides = array<i32>} : memref<256x288xbf16, #tpu.memory_space<vmem>>, vector<256x32xbf16>,
    %c2_53 = arith.constant 2 : index
    %c9_54 = arith.constant 9 : index
    %c0_55 = arith.constant 0 : index
    %60 = vector.load %arg9[%c2_53, %c9_54, %c0_55] : memref<18x32x32xf32, #tpu.memory_space<vmem>>, vector<16x16x32xf32>
    %61 = vector.shape_cast %60 : vector<16x16x32xf32> to vector<256x32xf32>
    %62 = arith.truncf %61 : vector<256x32xf32> to vector<256x32xbf16>
    %c0_56 = arith.constant 0 : index
    %c256 = arith.constant 256 : index
    %63 = vector.load %arg10[%c0_56, %c256] : memref<256x288xbf16, #tpu.memory_space<vmem>>, vector<256x32xbf16>
    tpu.vector_store %arg10[%c0_56, %c256], %62 {strides = array<i32>} : memref<256x288xbf16, #tpu.memory_space<vmem>>, vector<256x32xbf16>,
    %c0_57 = arith.constant 0 : index
    %c0_58 = arith.constant 0 : index
    %64 = vector.load %arg10[%c0_57, %c0_58] : memref<256x288xbf16, #tpu.memory_space<vmem>>, vector<256x288xbf16>
    %c0_59 = arith.constant 0 : index
    %c0_60 = arith.constant 0 : index
    %65 = vector.load %arg3[%c0_59, %c0_60] : memref<288x32xbf16, #tpu.memory_space<vmem>>, vector<288x32xbf16>
    %cst_61 = arith.constant dense<0.000000e+00> : vector<256x32xf32>
    %66 = tpu.matmul %64, %65, %cst_61 {dimension_numbers = #tpu.dot_dimension_numbers<[1], [0], [0], [1], [0, 0, 1, 1], [], []>} : vector<256x288xbf16>, vector<288x32xbf16>, vector<256x32xf32> -> vector<256x32xf32>
    %c0_62 = arith.constant 0 : index
    %c0_63 = arith.constant 0 : index
    %67 = vector.load %arg6[%c0_62, %c0_63] : memref<3x32xf32, #tpu.memory_space<vmem>>, vector<3x32xf32>
    %68 = vector.extract_strided_slice %67 {offsets = [0, 0], sizes = [1, 32], strides = [1, 1]} : vector<3x32xf32> to vector<1x32xf32>
    %69 = vector.extract_strided_slice %67 {offsets = [1, 0], sizes = [1, 32], strides = [1, 1]} : vector<3x32xf32> to vector<1x32xf32>
    %70 = vector.extract_strided_slice %67 {offsets = [2, 0], sizes = [1, 32], strides = [1, 1]} : vector<3x32xf32> to vector<1x32xf32>
    %71 = vector.broadcast %68 : vector<1x32xf32> to vector<256x32xf32>
    %72 = arith.mulf %66, %71 : vector<256x32xf32>
    %73 = vector.broadcast %69 : vector<1x32xf32> to vector<256x32xf32>
    %74 = arith.addf %72, %73 : vector<256x32xf32>
    %cst_64 = arith.constant 0.000000e+00 : f32
    %75 = vector.broadcast %cst_64 : f32 to vector<256x32xf32>
    %76 = arith.cmpf oge, %74, %75 : vector<256x32xf32>
    %77 = vector.broadcast %70 : vector<1x32xf32> to vector<256x32xf32>
    %78 = arith.mulf %77, %74 : vector<256x32xf32>
    %79 = arith.select %76, %74, %78 : vector<256x32xi1>, vector<256x32xf32>
    %80 = arith.truncf %79 : vector<256x32xf32> to vector<256x32xbf16>
    %c0_65 = arith.constant 0 : index
    %c0_66 = arith.constant 0 : index
    %81 = vector.load %arg4[%c0_65, %c0_66] : memref<32x64xbf16, #tpu.memory_space<vmem>>, vector<32x64xbf16>
    %cst_67 = arith.constant dense<0.000000e+00> : vector<256x64xf32>
    %82 = tpu.matmul %80, %81, %cst_67 {dimension_numbers = #tpu.dot_dimension_numbers<[1], [0], [0], [1], [0, 0, 1, 1], [], []>} : vector<256x32xbf16>, vector<32x64xbf16>, vector<256x64xf32> -> vector<256x64xf32>
    %c0_68 = arith.constant 0 : index
    %c0_69 = arith.constant 0 : index
    %83 = vector.load %arg7[%c0_68, %c0_69] : memref<3x64xf32, #tpu.memory_space<vmem>>, vector<3x64xf32>
    %84 = vector.extract_strided_slice %83 {offsets = [0, 0], sizes = [1, 64], strides = [1, 1]} : vector<3x64xf32> to vector<1x64xf32>
    %85 = vector.extract_strided_slice %83 {offsets = [1, 0], sizes = [1, 64], strides = [1, 1]} : vector<3x64xf32> to vector<1x64xf32>
    %86 = vector.extract_strided_slice %83 {offsets = [2, 0], sizes = [1, 64], strides = [1, 1]} : vector<3x64xf32> to vector<1x64xf32>
    %87 = vector.broadcast %84 : vector<1x64xf32> to vector<256x64xf32>
    %88 = arith.mulf %82, %87 : vector<256x64xf32>
    %89 = vector.broadcast %85 : vector<1x64xf32> to vector<256x64xf32>
    %90 = arith.addf %88, %89 : vector<256x64xf32>
    %cst_70 = arith.constant 0.000000e+00 : f32
    %91 = vector.broadcast %cst_70 : f32 to vector<256x64xf32>
    %92 = arith.cmpf oge, %90, %91 : vector<256x64xf32>
    %93 = vector.broadcast %86 : vector<1x64xf32> to vector<256x64xf32>
    %94 = arith.mulf %93, %90 : vector<256x64xf32>
    %95 = arith.select %92, %90, %94 : vector<256x64xi1>, vector<256x64xf32>
    %96 = vector.shape_cast %95 : vector<256x64xf32> to vector<16x16x64xf32>
    %97 = arith.truncf %96 : vector<16x16x64xf32> to vector<16x16x64xbf16>
    %c0_71 = arith.constant 0 : index
    %c0_72 = arith.constant 0 : index
    %c0_73 = arith.constant 0 : index
    %c0_74 = arith.constant 0 : index
    %98 = vector.load %arg8[%c0_71, %c0_72, %c0_73, %c0_74] : memref<1x16x16x64xbf16, #tpu.memory_space<vmem>>, vector<1x16x16x64xbf16>
    %99 = vector.shape_cast %98 : vector<1x16x16x64xbf16> to vector<16x16x64xbf16>
    %100 = vector.shape_cast %97 : vector<16x16x64xbf16> to vector<1x16x16x64xbf16>
    tpu.vector_store %arg8[%c0_71, %c0_72, %c0_73, %c0_74], %100 {strides = array<i32>} : memref<1x16x16x64xbf16, #tpu.memory_space<vmem>>, vector<1x16x16x64xbf16>,
    return
  }
  func.func @transform_0(%arg0: i32) -> (i32, i32, i32, i32) {
    %c0_i32 = arith.constant 0 : i32
    %c0_i32_0 = arith.constant 0 : i32
    %c0_i32_1 = arith.constant 0 : i32
    %c0_i32_2 = arith.constant 0 : i32
    return %arg0, %c0_i32, %c0_i32_0, %c0_i32_1 : i32, i32, i32, i32
  }
  func.func @transform_1(%arg0: i32) -> (i32, i32) {
    %c0_i32 = arith.constant 0 : i32
    %c0_i32_0 = arith.constant 0 : i32
    %c0_i32_1 = arith.constant 0 : i32
    return %c0_i32, %c0_i32_0 : i32, i32
  }
  func.func @transform_2(%arg0: i32) -> (i32, i32) {
    %c0_i32 = arith.constant 0 : i32
    %c0_i32_0 = arith.constant 0 : i32
    %c0_i32_1 = arith.constant 0 : i32
    return %c0_i32, %c0_i32_0 : i32, i32
  }
  func.func @transform_3(%arg0: i32) -> (i32, i32) {
    %c0_i32 = arith.constant 0 : i32
    %c0_i32_0 = arith.constant 0 : i32
    %c0_i32_1 = arith.constant 0 : i32
    return %c0_i32, %c0_i32_0 : i32, i32
  }
  func.func @transform_4(%arg0: i32) -> (i32, i32) {
    %c0_i32 = arith.constant 0 : i32
    %c0_i32_0 = arith.constant 0 : i32
    %c0_i32_1 = arith.constant 0 : i32
    return %c0_i32, %c0_i32_0 : i32, i32
  }
  func.func @transform_5(%arg0: i32) -> (i32, i32) {
    %c0_i32 = arith.constant 0 : i32
    %c0_i32_0 = arith.constant 0 : i32
    %c0_i32_1 = arith.constant 0 : i32
    return %c0_i32, %c0_i32_0 : i32, i32
  }
  func.func @transform_6(%arg0: i32) -> (i32, i32) {
    %c0_i32 = arith.constant 0 : i32
    %c0_i32_0 = arith.constant 0 : i32
    %c0_i32_1 = arith.constant 0 : i32
    return %c0_i32, %c0_i32_0 : i32, i32
  }
  func.func @transform_7(%arg0: i32) -> (i32, i32, i32, i32) {
    %c0_i32 = arith.constant 0 : i32
    %c0_i32_0 = arith.constant 0 : i32
    %c0_i32_1 = arith.constant 0 : i32
    %c0_i32_2 = arith.constant 0 : i32
    return %arg0, %c0_i32, %c0_i32_0, %c0_i32_1 : i32, i32, i32, i32
  }
}

</mosaic_0001>

<bundles_post_ra>
// kernel: _lambda_.1
= control target key start
LH: loop header
LB: loop body
LE: loop exit
PB: predicated region body
PF: predicated region fallthrough
CT: control target
= control target key end

     0   :  { %s3769_s24 = smov 0   ;;  %s4995_s0 = inlined_call_operand.vmem [shape: bf16[2,16,16,64], index: 0, kind: input, shape index: {}]   ;;  %s4996_s1 = inlined_call_operand.vmem [shape: bf16[64,32], index: 1, kind: input, shape index: {}]   ;;  %s4997_s2 = inlined_call_operand.vmem [shape: bf16[288,32], index: 2, kind: input, shape index: {}]   ;;  %s4998_s3 = inlined_call_operand.vmem [shape: bf16[32,64], index: 3, kind: input, shape index: {}]   ;;  %s4999_s4 = inlined_call_operand.vmem [shape: f32[3,32], index: 4, kind: input, shape index: {}]   ;;  %s5000_s5 = inlined_call_operand.vmem [shape: f32[3,32], index: 5, kind: input, shape index: {}]   ;;  %s5001_s6 = inlined_call_operand.vmem [shape: f32[3,64], index: 6, kind: input, shape index: {}]   ;;  %s5002_s7 = inlined_call_operand.vmem [shape: bf16[2,16,16,64], index: 7, kind: output, shape index: {}]  }
   0x1 LB: > { %s3212_s25 = sadd.s32 4294967295, %s3723_s24   ;;  %p3216_p0 = scmp.ge.s32.totalorder %s3723_s24, 1  ;;  %s3723_s24 = sphi %s3769_s24, %s17_s24  }
   0x2   : > { %p237_p1 = scmp.lt.s32.totalorder %s3723_s24, 3 }
   0x4   : > { %p238_p2 = pnand %p3216_p0, %p237_p1 }
   0x5   : > { %v3677_v0 = vld [vmem:[%s4996_s1] sm:$0xff] (!%p238_p2)   ;;  %p269_p3 = scmp.lt.s32.totalorder (!%p238_p2), %s3212_s25, 1  ;;  %v3678_v1 = vld [vmem:[%s4996_s1 + $0x8] sm:$0xff] (!%p238_p2)   ;;  %v3679_v2 = vld [vmem:[%s4996_s1 + $0x10] sm:$0xff] (!%p238_p2)   ;;  %vm424_vm0 = vcmask (!%p238_p2), 523264   ;;  %vm807_vm1 = vcmask (!%p238_p2), 261120   ;;  %v635_v29 = vlaneseq (!%p238_p2) }
   0x6   : > { %241 = sbr.rel (%p238_p2) target bundleno = 1016 (0x3f8), region = 48  ;;  %3545 = vmatprep.subr.bf16.mxu0 (!%p238_p2), %v3677_v0  ;;  %3657 = vmatprep.subr.bf16.mxu1 (!%p238_p2), %v3677_v0  ;;  %v3680_v4 = vld [vmem:[%s4996_s1 + $0x18] sm:$0xff] (!%p238_p2)   ;;  %v3725_v20 = vmov (!%p238_p2), 0.0   ;;  %vm818_vm2 = vcmask (!%p238_p2), 253952   ;;  %s3726_s15 = smov (!%p238_p2), 64   ;;  %v3697_v27 = vld [vmem:[%s4997_s2 + $0x80] sm:$0xff] (!%p238_p2)  }
   0x7   : > { %3546 = vmatpush3.bf16.msra.mxu0 (!%p238_p2), %v3677_v0  ;;  %3661 = vmatpush3.bf16.msra.mxu1 (!%p238_p2), %v3677_v0  ;;  %808 = vst.msk [vmem:[#allocation2] sm:$0xff] (!%p238_p2), %vm807_vm1, %v3725_v20  ;;  %809 = vst.msk [vmem:[#allocation2 + $0x8] sm:$0xff] (!%p238_p2), %vm807_vm1, %v3725_v20  ;;  %s3727_s16 = smov (!%p238_p2), 32   ;;  %v3698_v28 = vld [vmem:[%s4997_s2 + $0x88] sm:$0xff] (!%p238_p2)   ;;  %v636_v30 = vshrl.u32 (!%p238_p2), %v635_v29, 7  ;;  %vm1059_vm3 = vcmask (!%p238_p2), 523520  }
   0x8   : > { %3547 = vmatprep.subr.bf16.mxu0 (!%p238_p2), %v3678_v1  ;;  %3658 = vmatprep.subr.bf16.mxu1 (!%p238_p2), %v3678_v1  ;;  %810 = vst.msk [vmem:[#allocation2 + $0x10] sm:$0xff] (!%p238_p2), %vm807_vm1, %v3725_v20  ;;  %811 = vst.msk [vmem:[#allocation2 + $0x18] sm:$0xff] (!%p238_p2), %vm807_vm1, %v3725_v20  ;;  %v634_v32 = vld [vmem:[%s4999_s4] sm:$0x7] (!%p238_p2)  ;;  %v3702_v29 = vld [vmem:[%s4997_s2 + $0x8] sm:$0xff] (!%p238_p2)   ;;  %s3728_s13 = smov (!%p238_p2), 96  }
   0x9   : > { %813 = vst.msk [vmem:[#allocation2 + $0x220] sm:$0xff] (!%p238_p2), %vm807_vm1, %v3725_v20  ;;  %814 = vst.msk [vmem:[#allocation2 + $0x228] sm:$0xff] (!%p238_p2), %vm807_vm1, %v3725_v20  ;;  %v3879_v31 = vsub.s32 (!%p238_p2), 0, %v636_v30  ;;  %v3884_v33 = vsub.s32 (!%p238_p2), 1, %v636_v30  ;;  %v3889_v35 = vsub.s32 (!%p238_p2), 2, %v636_v30  ;;  %v3699_v0 = vld [vmem:[%s4997_s2 + $0x40] sm:$0xff] (!%p238_p2)  }
   0xa   : > { %815 = vst.msk [vmem:[#allocation2 + $0x230] sm:$0xff] (!%p238_p2), %vm807_vm1, %v3725_v20  ;;  %816 = vst.msk [vmem:[#allocation2 + $0x238] sm:$0xff] (!%p238_p2), %vm807_vm1, %v3725_v20 }
   0xb   : > { %3548 = vmatpush3.bf16.msra.mxu0 (!%p238_p2), %v3678_v1  ;;  %3662 = vmatpush3.bf16.msra.mxu1 (!%p238_p2), %v3678_v1  ;;  %837 = vst.msk [vmem:[#allocation2 + $0x78] sm:$0x1] (!%p238_p2), %vm818_vm2, %v3725_v20  ;;  %819 = vst.msk [vmem:[#allocation2 + $0x27] sm:$0x1] (!%p238_p2), %vm818_vm2, %v3725_v20  ;;  %v3887_v34 = vrot.slane (!%p238_p2), %v634_v32, %v3879_v31  ;;  %v3892_v36 = vrot.slane (!%p238_p2), %v634_v32, %v3884_v33 }
   0xc   : > { %3549 = vmatprep.subr.bf16.mxu0 (!%p238_p2), %v3679_v2  ;;  %3659 = vmatprep.subr.bf16.mxu1 (!%p238_p2), %v3679_v2  ;;  %820 = vst.msk [vmem:[#allocation2 + $0x47] sm:$0x1] (!%p238_p2), %vm818_vm2, %v3725_v20  ;;  %821 = vst.msk [vmem:[#allocation2 + $0x67] sm:$0x1] (!%p238_p2), %vm818_vm2, %v3725_v20  ;;  %v3896_v40 = vrot.slane (!%p238_p2), %v634_v32, %v3889_v35 }
   0xd   : > { %s5004_s25 = smov (!%p269_p3, %s3212_s25), 1  ;;  %822 = vst.msk [vmem:[#allocation2 + $0x87] sm:$0x1] %vm818_vm2, %v3725_v20  ;;  %823 = vst.msk [vmem:[#allocation2 + $0xa7] sm:$0x1] %vm818_vm2, %v3725_v20 }
   0xe   : > { %s3343_s9 = sshll.u32 %s5004_s25, 7  ;;  %824 = vst.msk [vmem:[#allocation2 + $0xc7] sm:$0x1] %vm818_vm2, %v3725_v20  ;;  %825 = vst.msk [vmem:[#allocation2 + $0xe7] sm:$0x1] %vm818_vm2, %v3725_v20  ;;  %v947_v23 = vld [vmem:[#allocation2 + $0x8] sm:$0xff] }
   0xf   : > { %s3794_s12 = scalar_lea.vmem %s4995_s0, %s3343_s9  ;;  %3550 = vmatpush3.bf16.msra.mxu0 %v3679_v2  ;;  %3663 = vmatpush3.bf16.msra.mxu1 %v3679_v2  ;;  %826 = vst.msk [vmem:[#allocation2 + $0x107] sm:$0x1] %vm818_vm2, %v3725_v20  ;;  %827 = vst.msk [vmem:[#allocation2 + $0x127] sm:$0x1] %vm818_vm2, %v3725_v20  ;;  %v1076_v21 = vld [vmem:[#allocation2 + $0x9] sm:$0xff]  ;;  %v1077_v22 = vld [vmem:[#allocation2 + $0x11] sm:$0xff]  ;;  %s4840_s30 = scalar_lea.vmem %s5002_s7, %s3343_s9 }
  0x10   : > { %v3681_v3 = vld [vmem:[%s3794_s12] sm:$0xff]   ;;  %3551 = vmatprep.subr.bf16.mxu0 %v3680_v4  ;;  %3660 = vmatprep.subr.bf16.mxu1 %v3680_v4  ;;  %v3682_v6 = vld [vmem:[%s3794_s12 + $0x8] sm:$0xff]   ;;  %v3685_v8 = vld [vmem:[%s3794_s12 + $0x10] sm:$0xff]   ;;  %828 = vst.msk [vmem:[#allocation2 + $0x147] sm:$0x1] %vm818_vm2, %v3725_v20  ;;  %v1108_v24 = vpack.c.bf16 %v1077_v22, %v1076_v21 }
  0x11   : > { %v3683_v5 = vld [vmem:[%s3794_s12 + $0x40] sm:$0xff]   ;;  %3553 = vmatprep.mubr.msk.bf16.mxu0 %vm424_vm0, %v3681_v3  ;;  %v3684_v7 = vld [vmem:[%s3794_s12 + $0x48] sm:$0xff]   ;;  %v3691_v9 = vld [vmem:[%s3794_s12 + $0x50] sm:$0xff]   ;;  %829 = vst.msk [vmem:[#allocation2 + $0x167] sm:$0x1] %vm818_vm2, %v3725_v20 }
  0x12   : > { %3569 = vmatprep.mubr.msk.bf16.mxu1 %vm424_vm0, %v3683_v5  ;;  %v3686_v10 = vld [vmem:[%s3794_s12 + $0x18] sm:$0xff]   ;;  %v3687_v12 = vld [vmem:[%s3794_s12 + $0x20] sm:$0xff]   ;;  %v3688_v14 = vld [vmem:[%s3794_s12 + $0x28] sm:$0xff]   ;;  %830 = vst.msk [vmem:[#allocation2 + $0x187] sm:$0x1] %vm818_vm2, %v3725_v20  ;;  %1140 = vrot.lane.b32.xlu1 %v1108_v24, %s3726_s15 }
  0x13   : > { %3552 = vmatpush3.bf16.msra.mxu0 %v3680_v4  ;;  %3664 = vmatpush3.bf16.msra.mxu1 %v3680_v4  ;;  %v3692_v11 = vld [vmem:[%s3794_s12 + $0x58] sm:$0xff]   ;;  %v3693_v13 = vld [vmem:[%s3794_s12 + $0x60] sm:$0xff]   ;;  %v3694_v15 = vld [vmem:[%s3794_s12 + $0x68] sm:$0xff]   ;;  %831 = vst.msk [vmem:[#allocation2 + $0x1a7] sm:$0x1] %vm818_vm2, %v3725_v20 }
  0x14   : > { %v3689_v16 = vld [vmem:[%s3794_s12 + $0x30] sm:$0xff]   ;;  %v3690_v18 = vld [vmem:[%s3794_s12 + $0x38] sm:$0xff]   ;;  %832 = vst.msk [vmem:[#allocation2 + $0x1c7] sm:$0x1] %vm818_vm2, %v3725_v20  ;;  %833 = vst.msk [vmem:[#allocation2 + $0x1e7] sm:$0x1] %vm818_vm2, %v3725_v20  ;;  %3585 = vmatprep.subr.bf16.mxu0 %v3697_v27  ;;  %3397 = vmatprep.subr.bf16.mxu1 %v3699_v0 }
  0x15   : > { %v3695_v17 = vld [vmem:[%s3794_s12 + $0x70] sm:$0xff]   ;;  %v3696_v19 = vld [vmem:[%s3794_s12 + $0x78] sm:$0xff]   ;;  %834 = vst.msk [vmem:[#allocation2 + $0x207] sm:$0x1] %vm818_vm2, %v3725_v20  ;;  %835 = vst.msk [vmem:[#allocation2 + $0x38] sm:$0x1] %vm818_vm2, %v3725_v20 }
  0x16   : > { %3554 = vmatmul.mubr.msk.bf16.vlgmr.msra.gmra.mrb[0].mxu0 %vm424_vm0, %v3682_v6  ;;  %3570 = vmatmul.mubr.msk.bf16.vlgmr.msra.gmra.mrb[0].mxu1 %vm424_vm0, %v3684_v7  ;;  %836 = vst.msk [vmem:[#allocation2 + $0x58] sm:$0x1] %vm818_vm2, %v3725_v20  ;;  %838 = vst.msk [vmem:[#allocation2 + $0x98] sm:$0x1] %vm818_vm2, %v3725_v20  ;;  %v948_v25 = vld [vmem:[#allocation2 + $0x10] sm:$0xff]  ;;  %v883_v44 = vld [vmem:[#allocation2 + $0x7] sm:$0xff] }
  0x17   : > { %3557 = vmatprep.mubr.msk.bf16.mxu0 %vm424_vm0, %v3685_v8  ;;  %3573 = vmatprep.mubr.msk.bf16.mxu1 %vm424_vm0, %v3691_v9  ;;  %839 = vst.msk [vmem:[#allocation2 + $0xb8] sm:$0x1] %vm818_vm2, %v3725_v20  ;;  %840 = vst.msk [vmem:[#allocation2 + $0xd8] sm:$0x1] %vm818_vm2, %v3725_v20  ;;  %v979_v26 = vpack.c.bf16 %v948_v25, %v947_v23  ;;  %v884_v45 = vld [vmem:[#allocation2 + $0xf] sm:$0xff]  ;;  %v3700_v6 = vld [vmem:[%s4997_s2] sm:$0xff]  }
  0x18   : > { %841 = vst.msk [vmem:[#allocation2 + $0xf8] sm:$0x1] %vm818_vm2, %v3725_v20  ;;  %842 = vst.msk [vmem:[#allocation2 + $0x118] sm:$0x1] %vm818_vm2, %v3725_v20  ;;  %3586 = vmatpush3.bf16.msra.mxu0 %v3697_v27  ;;  %v915_v50 = vpack.c.bf16 %v884_v45, %v883_v44  ;;  %3398 = vmatpush3.bf16.msra.mxu1 %v3700_v6 }
  0x19   : > { %843 = vst.msk [vmem:[#allocation2 + $0x138] sm:$0x1] %vm818_vm2, %v3725_v20  ;;  %844 = vst.msk [vmem:[#allocation2 + $0x158] sm:$0x1] %vm818_vm2, %v3725_v20  ;;  %1011 = vrot.lane.b32.xlu0 %v979_v26, %s3727_s16  ;;  %3587 = vmatprep.subr.bf16.mxu0 %v3698_v28 }
  0x1a   : > { %845 = vst.msk [vmem:[#allocation2 + $0x178] sm:$0x1] %vm818_vm2, %v3725_v20  ;;  %846 = vst.msk [vmem:[#allocation2 + $0x198] sm:$0x1] %vm818_vm2, %v3725_v20 }
  0x1b   : > { %847 = vst.msk [vmem:[#allocation2 + $0x1b8] sm:$0x1] %vm818_vm2, %v3725_v20  ;;  %848 = vst.msk [vmem:[#allocation2 + $0x1d8] sm:$0x1] %vm818_vm2, %v3725_v20 }
  0x1c   : > { %849 = vst.msk [vmem:[#allocation2 + $0x1f8] sm:$0x1] %vm818_vm2, %v3725_v20  ;;  %850 = vst.msk [vmem:[#allocation2 + $0x218] sm:$0x1] %vm818_vm2, %v3725_v20  ;;  %3588 = vmatpush3.bf16.msra.mxu0 %v3698_v28 }
  0x1d   : > { %931 = vst.msk [vmem:[#allocation3] sm:$0xff] %vm807_vm1, %v915_v50 }
  0x1e   : > { %3558 = vmatmul.mubr.msk.bf16.gmra.mrb[4].mxu0 %vm424_vm0, %v3686_v10  ;;  %3574 = vmatmul.mubr.msk.bf16.gmra.mrb[4].mxu1 %vm424_vm0, %v3692_v11 }
  0x1f   : > { %3561 = vmatprep.mubr.msk.bf16.mxu0 %vm424_vm0, %v3687_v12  ;;  %3577 = vmatprep.mubr.msk.bf16.mxu1 %vm424_vm0, %v3693_v13 }
  0x26   : > { %3562 = vmatmul.mubr.msk.bf16.gmra.mrb[8].mxu0 %vm424_vm0, %v3688_v14  ;;  %3578 = vmatmul.mubr.msk.bf16.gmra.mrb[8].mxu1 %vm424_vm0, %v3694_v15 }
  0x27   : > { %3565 = vmatprep.mubr.msk.bf16.mxu0 %vm424_vm0, %v3689_v16  ;;  %3581 = vmatprep.mubr.msk.bf16.mxu1 %vm424_vm0, %v3695_v17 }
  0x2e   : > { %3566 = vmatmul.mubr.msk.bf16.gmra.mrb[12].mxu0 %vm424_vm0, %v3690_v18  ;;  %3582 = vmatmul.mubr.msk.bf16.gmra.mrb[12].mxu1 %vm424_vm0, %v3696_v19  ;;  %v3701_v18 = vld [vmem:[%s4997_s2 + $0x48] sm:$0xff]  }
  0x2f   : > { %3399 = vmatprep.subr.bf16.mxu1 %v3701_v18 }
  0x30   : > { %3400 = vmatpush3.bf16.msra.mxu1 %v3702_v29 }
  0x8b   : > { %v1012_v63 = vpop.permute.xlu0 %1011 }
  0x8c   : > { %1060 = vst.msk [vmem:[#allocation3] sm:$0xff] %vm1059_vm3, %v1012_v63 }
  0xe9   : > { %v3555_v37 = vpop.f32.mrb[0].mxu0  ;;  %v3571_v38 = vpop.f32.mrb[0].mxu1 }
  0xea   : > { %v641_v39 = vmul.f32 %v3555_v37, %v3887_v34  ;;  %v507_v41 = vpop.f32.mrb[1].mxu0  ;;  %v657_v42 = vmul.f32 %v3571_v38, %v3887_v34  ;;  %v571_v43 = vpop.f32.mrb[1].mxu1 }
  0xeb   : > { %v639_v46 = vmul.f32 %v3887_v34, %v507_v41  ;;  %v3556_v47 = vpop.f32.mrb[2].mxu0  ;;  %v655_v48 = vmul.f32 %v3887_v34, %v571_v43  ;;  %v3572_v49 = vpop.f32.mrb[2].mxu1  ;;  %v3703_v43 = vld [vmem:[%s4997_s2 + $0x50] sm:$0xff]  }
  0xec   : > { %v677_v51 = vadd.f32 %v3892_v36, %v641_v39  ;;  %v642_v52 = vmul.f32 %v3556_v47, %v3887_v34  ;;  %v510_v53 = vpop.f32.mrb[3].mxu0  ;;  %v693_v54 = vadd.f32 %v3892_v36, %v657_v42  ;;  %v658_v55 = vmul.f32 %v3572_v49, %v3887_v34  ;;  %v574_v56 = vpop.f32.mrb[3].mxu1  ;;  %3401 = vmatprep.subr.bf16.mxu1 %v3703_v43 }
  0xed   : > { %v675_v57 = vadd.f32 %v3892_v36, %v639_v46  ;;  %v640_v58 = vmul.f32 %v3887_v34, %v510_v53  ;;  %v691_v59 = vadd.f32 %v3892_v36, %v655_v48  ;;  %v656_v60 = vmul.f32 %v3887_v34, %v574_v56 }
  0xee   : > { %vm709_vm4 = vcmp.ge.f32.partialorder %v677_v51, 0.0  ;;  %v745_v61 = vmul.f32 %v3896_v40, %v677_v51  ;;  %v678_v62 = vadd.f32 %v3892_v36, %v642_v52  ;;  %vm725_vm5 = vcmp.ge.f32.partialorder %v693_v54, 0.0 }
  0xef   : > { %vm707_vm6 = vcmp.ge.f32.partialorder %v675_v57, 0.0  ;;  %v743_v1 = vmul.f32 %v3896_v40, %v675_v57  ;;  %v676_v2 = vadd.f32 %v3892_v36, %v640_v58  ;;  %v761_v3 = vmul.f32 %v3896_v40, %v693_v54 }
  0xf0   : > { %v777_v4 = vsel %vm709_vm4, %v677_v51, %v745_v61  ;;  %vm710_vm7 = vcmp.ge.f32.partialorder %v678_v62, 0.0  ;;  %v746_v5 = vmul.f32 %v3896_v40, %v678_v62  ;;  %vm723_vm8 = vcmp.ge.f32.partialorder %v691_v59, 0.0 }
  0xf1   : > { %853 = vst.msk [vmem:[#allocation2 + $0x48] sm:$0xff] %vm807_vm1, %v777_v4  ;;  %v775_v7 = vsel %vm707_vm6, %v675_v57, %v743_v1  ;;  %vm708_vm9 = vcmp.ge.f32.partialorder %v676_v2, 0.0  ;;  %v744_v8 = vmul.f32 %v3896_v40, %v676_v2  ;;  %v793_v9 = vsel %vm725_vm5, %v693_v54, %v761_v3  ;;  %v3559_v10 = vpop.f32.mrb[4].mxu0  ;;  %v3575_v11 = vpop.f32.mrb[4].mxu1 }
  0xf2   : > { %851 = vst.msk [vmem:[#allocation2 + $0x28] sm:$0xff] %vm807_vm1, %v775_v7  ;;  %v778_v12 = vsel %vm710_vm7, %v678_v62, %v746_v5  ;;  %869 = vst.msk [vmem:[#allocation2 + $0x148] sm:$0xff] %vm807_vm1, %v793_v9  ;;  %v759_v13 = vmul.f32 %v3896_v40, %v691_v59  ;;  %v694_v14 = vadd.f32 %v3892_v36, %v658_v55  ;;  %v523_v16 = vpop.f32.mrb[5].mxu0  ;;  %v587_v17 = vpop.f32.mrb[5].mxu1 }
  0xf3   : > { %v692_v15 = vadd.f32 %v3892_v36, %v656_v60  ;;  %854 = vst.msk [vmem:[#allocation2 + $0x50] sm:$0xff] %vm807_vm1, %v778_v12  ;;  %v776_v19 = vsel %vm708_vm9, %v676_v2, %v744_v8  ;;  %v645_v20 = vmul.f32 %v3559_v10, %v3887_v34  ;;  %v643_v21 = vmul.f32 %v3887_v34, %v523_v16  ;;  %v3560_v22 = vpop.f32.mrb[6].mxu0  ;;  %v3939_v24 = vpop.f32.mrb[6].mxu1 }
  0xf4   : > { %v661_v23 = vmul.f32 %v3575_v11, %v3887_v34  ;;  %852 = vst.msk [vmem:[#allocation2 + $0x30] sm:$0xff] %vm807_vm1, %v776_v19  ;;  %v791_v25 = vsel %vm723_vm8, %v691_v59, %v759_v13  ;;  %vm726_vm10 = vcmp.ge.f32.partialorder %v694_v14, 0.0  ;;  %v762_v26 = vmul.f32 %v3896_v40, %v694_v14  ;;  %v526_v27 = vpop.f32.mrb[7].mxu0  ;;  %v3944_v28 = vpop.f32.mrb[7].mxu1 }
  0xf5   : > { %vm724_vm11 = vcmp.ge.f32.partialorder %v692_v15, 0.0  ;;  %867 = vst.msk [vmem:[#allocation2 + $0x128] sm:$0xff] %vm807_vm1, %v791_v25  ;;  %v760_v30 = vmul.f32 %v3896_v40, %v692_v15  ;;  %v681_v32 = vadd.f32 %v3892_v36, %v645_v20  ;;  %v679_v37 = vadd.f32 %v3892_v36, %v643_v21  ;;  %v3704_v20 = vld [vmem:[%s4997_s2 + $0x10] sm:$0xff]  }
  0xf6   : > { %v646_v38 = vmul.f32 %v3560_v22, %v3887_v34  ;;  %v794_v39 = vsel %vm726_vm10, %v694_v14, %v762_v26  ;;  %v644_v41 = vmul.f32 %v3887_v34, %v526_v27  ;;  %v3956_v42 = vadd.f32 %v3892_v36, %v661_v23  ;;  %3402 = vmatpush3.bf16.msra.mxu1 %v3704_v20 }
  0xf7   : > { %870 = vst.msk [vmem:[#allocation2 + $0x150] sm:$0xff] %vm807_vm1, %v794_v39  ;;  %v792_v44 = vsel %vm724_vm11, %v692_v15, %v760_v30  ;;  %vm713_vm12 = vcmp.ge.f32.partialorder %v681_v32, 0.0  ;;  %v749_v45 = vmul.f32 %v3896_v40, %v681_v32  ;;  %vm711_vm13 = vcmp.ge.f32.partialorder %v679_v37, 0.0 }
  0xf8   : > { %868 = vst.msk [vmem:[#allocation2 + $0x130] sm:$0xff] %vm807_vm1, %v792_v44  ;;  %v747_v46 = vmul.f32 %v3896_v40, %v679_v37  ;;  %v682_v47 = vadd.f32 %v3892_v36, %v646_v38  ;;  %v680_v48 = vadd.f32 %v3892_v36, %v644_v41  ;;  %v1655_v51 = vld [vmem:[#allocation2 + $0x48] sm:$0xff]  ;;  %vm729_vm14 = vcmp.ge.f32.partialorder %v3956_v42, 0.0 }
  0xf9   : > { %v781_v49 = vsel %vm713_vm12, %v681_v32, %v749_v45  ;;  %v3563_v50 = vpop.f32.mrb[8].mxu0  ;;  %v3971_v52 = vmul.f32 %v3896_v40, %v3956_v42  ;;  %v659_v53 = vmul.f32 %v3887_v34, %v587_v17  ;;  %v3974_v54 = vpop.f32.mrb[8].mxu1  ;;  %v1527_v2 = vld [vmem:[#allocation2 + $0x47] sm:$0xff] }
  0xfa   : > { %857 = vst.msk [vmem:[#allocation2 + $0x88] sm:$0xff] %vm807_vm1, %v781_v49  ;;  %v779_v55 = vsel %vm711_vm13, %v679_v37, %v747_v46  ;;  %vm714_vm15 = vcmp.ge.f32.partialorder %v682_v47, 0.0  ;;  %v750_v56 = vmul.f32 %v3896_v40, %v682_v47  ;;  %vm712_vm0 = vcmp.ge.f32.partialorder %v680_v48, 0.0  ;;  %v539_v57 = vpop.f32.mrb[9].mxu0  ;;  %v1656_v58 = vld [vmem:[#allocation2 + $0x50] sm:$0xff]  ;;  %v3984_v5 = vpop.f32.mrb[9].mxu1 }
  0xfb   : > { %v1528_v59 = vld [vmem:[#allocation2 + $0x4f] sm:$0xff]  ;;  %855 = vst.msk [vmem:[#allocation2 + $0x68] sm:$0xff] %vm807_vm1, %v779_v55  ;;  %v748_v61 = vmul.f32 %v3896_v40, %v680_v48  ;;  %v649_v62 = vmul.f32 %v3563_v50, %v3887_v34  ;;  %v647_v63 = vmul.f32 %v3887_v34, %v539_v57  ;;  %v3564_v0 = vpop.f32.mrb[10].mxu0  ;;  %v3982_v1 = vpack.c.bf16 %v1656_v58, %v1655_v51  ;;  %v3990_v12 = vpop.f32.mrb[10].mxu1  ;;  %v1205_v17 = vld [vmem:[#allocation2 + $0x27] sm:$0xff] }
  0xfc   : > { %v1400_v60 = vld [vmem:[#allocation2 + $0x49] sm:$0xff]  ;;  %v1401_v3 = vld [vmem:[#allocation2 + $0x51] sm:$0xff]  ;;  %v782_v6 = vsel %vm714_vm15, %v682_v47, %v750_v56  ;;  %v650_v7 = vmul.f32 %v3564_v0, %v3887_v34  ;;  %v542_v8 = vpop.f32.mrb[11].mxu0  ;;  %v1559_v9 = vpack.c.bf16 %v1528_v59, %v1527_v2  ;;  %v3999_v19 = vpop.f32.mrb[11].mxu1  ;;  %v4016_v29 = vadd.f32 %v3892_v36, %v659_v53 }
  0xfd   : > { %v1206_v4 = vld [vmem:[#allocation2 + $0x2f] sm:$0xff]  ;;  %v3988_v10 = vpack.c.bf16 %v1401_v3, %v1400_v60  ;;  %858 = vst.msk [vmem:[#allocation2 + $0x90] sm:$0xff] %vm807_vm1, %v782_v6  ;;  %v780_v13 = vsel %vm712_vm0, %v680_v48, %v748_v61  ;;  %v685_v14 = vadd.f32 %v3892_v36, %v649_v62  ;;  %v683_v15 = vadd.f32 %v3892_v36, %v647_v63  ;;  %v1543_v37 = vld [vmem:[#allocation2 + $0x147] sm:$0xff]  ;;  %v3705_v47 = vld [vmem:[%s4997_s2 + $0x58] sm:$0xff]  }
  0xfe   : > { %v950_v11 = vld [vmem:[#allocation2 + $0x30] sm:$0xff]  ;;  %v648_v16 = vmul.f32 %v3887_v34, %v542_v8  ;;  %1719 = vrot.lane.b32.xlu0 %v3982_v1, %s3728_s13  ;;  %v949_v18 = vld [vmem:[#allocation2 + $0x28] sm:$0xff]  ;;  %1383 = vst.msk [vmem:[#allocation3 + $0x20] sm:$0xff] %vm807_vm1, %v3982_v1  ;;  %856 = vst.msk [vmem:[#allocation2 + $0x70] sm:$0xff] %vm807_vm1, %v780_v13  ;;  %v686_v21 = vadd.f32 %v3892_v36, %v650_v7  ;;  %1591 = vrot.lane.b32.xlu1 %v1559_v9, %s3726_s15  ;;  %vm727_vm7 = vcmp.ge.f32.partialorder %v4016_v29, 0.0 }
  0xff   : > { %1831 = vst.msk [vmem:[#allocation3 + $0x10] sm:$0xff] %vm807_vm1, %v3988_v10  ;;  %v1671_v22 = vld [vmem:[#allocation2 + $0x148] sm:$0xff]  ;;  %v1672_v23 = vld [vmem:[#allocation2 + $0x150] sm:$0xff]  ;;  %v4011_v26 = vpack.c.bf16 %v1206_v4, %v1205_v17  ;;  %v4013_v27 = vpack.c.bf16 %v950_v11, %v949_v18  ;;  %933 = vst.msk [vmem:[#allocation3 + $0x30] sm:$0xff] %vm807_vm1, %v1559_v9  ;;  %vm717_vm2 = vcmp.ge.f32.partialorder %v685_v14, 0.0  ;;  %v753_v30 = vmul.f32 %v3896_v40, %v685_v14 }
 0x100   : > { %v1416_v25 = vld [vmem:[#allocation2 + $0x149] sm:$0xff]  ;;  %vm715_vm4 = vcmp.ge.f32.partialorder %v683_v15, 0.0  ;;  %v751_v32 = vmul.f32 %v3896_v40, %v683_v15  ;;  %v1417_v38 = vld [vmem:[#allocation2 + $0x151] sm:$0xff]  ;;  %vm718_vm5 = vcmp.ge.f32.partialorder %v686_v21, 0.0  ;;  %v754_v41 = vmul.f32 %v3896_v40, %v686_v21  ;;  %3403 = vmatprep.subr.bf16.mxu1 %v3705_v47  ;;  %v3707_v61 = vld [vmem:[%s4997_s2 + $0x60] sm:$0xff]  }
 0x101   : > { %v1669_v39 = vld [vmem:[#allocation2 + $0x128] sm:$0xff]  ;;  %v684_v43 = vadd.f32 %v3892_v36, %v648_v16  ;;  %v1670_v45 = vld [vmem:[#allocation2 + $0x130] sm:$0xff]  ;;  %v4025_v46 = vmul.f32 %v3939_v24, %v3887_v34  ;;  %1382 = vst.msk [vmem:[#allocation3 + $0x8] sm:$0xff] %vm807_vm1, %v4013_v27  ;;  %932 = vst.msk [vmem:[#allocation3 + $0x18] sm:$0xff] %vm807_vm1, %v4011_v26  ;;  %v785_v48 = vsel %vm717_vm2, %v685_v14, %v753_v30  ;;  %v3567_v50 = vpop.f32.mrb[12].mxu0  ;;  %v4045_v55 = vpop.f32.mrb[12].mxu1 }
 0x102   : > { %v1544_v44 = vld [vmem:[#allocation2 + $0x14f] sm:$0xff]  ;;  %v783_v49 = vsel %vm715_vm4, %v683_v15, %v751_v32  ;;  %1464 = vrot.lane.b32.xlu0 %v3988_v10, %s3727_s16  ;;  %v4038_v24 = vpack.c.bf16 %v1672_v23, %v1671_v22  ;;  %v4040_v51 = vpack.c.bf16 %v1417_v38, %v1416_v25  ;;  %v3706_v53 = vld [vmem:[%s4997_s2 + $0x18] sm:$0xff]   ;;  %861 = vst.msk [vmem:[#allocation2 + $0xc8] sm:$0xff] %vm807_vm1, %v785_v48  ;;  %v555_v59 = vpop.f32.mrb[13].mxu0  ;;  %v4053_v60 = vpop.f32.mrb[13].mxu1  ;;  %v3708_v8 = vld [vmem:[%s4997_s2 + $0x20] sm:$0xff]  }
 0x103   : > { %859 = vst.msk [vmem:[#allocation2 + $0xa8] sm:$0xff] %vm807_vm1, %v783_v49  ;;  %v786_v56 = vsel %vm718_vm5, %v686_v21, %v754_v41  ;;  %vm716_vm6 = vcmp.ge.f32.partialorder %v684_v43, 0.0  ;;  %v752_v57 = vmul.f32 %v3896_v40, %v684_v43  ;;  %1271 = vrot.lane.b32.xlu1 %v1559_v9, %s3728_s13  ;;  %v653_v58 = vmul.f32 %v3567_v50, %v3887_v34  ;;  %v3568_v63 = vpop.f32.mrb[14].mxu0  ;;  %v1414_v4 = vld [vmem:[#allocation2 + $0x129] sm:$0xff]  ;;  %v1415_v6 = vld [vmem:[#allocation2 + $0x131] sm:$0xff]  ;;  %v4070_v7 = vpop.f32.mrb[14].mxu1 }
 0x104   : > { %862 = vst.msk [vmem:[#allocation2 + $0xd0] sm:$0xff] %vm807_vm1, %v786_v56  ;;  %v651_v62 = vmul.f32 %v3887_v34, %v555_v59  ;;  %v4060_v0 = vpack.c.bf16 %v1544_v44, %v1543_v37  ;;  %v4062_v2 = vpack.c.bf16 %v1670_v45, %v1669_v39  ;;  %v797_v3 = vsel %vm729_vm14, %v3956_v42, %v3971_v52  ;;  %v558_v52 = vpop.f32.mrb[15].mxu0  ;;  %v1787_v13 = vld [vmem:[#allocation2 + $0x89] sm:$0xff]  ;;  %v1788_v14 = vld [vmem:[#allocation2 + $0x91] sm:$0xff]  ;;  %v4082_v15 = vpop.f32.mrb[15].mxu1 }
 0x105   : > { %1839 = vst.msk [vmem:[#allocation3 + $0xd0] sm:$0xff] %vm807_vm1, %v4040_v51  ;;  %3404 = vmatpush3.bf16.msra.mxu1 %v3706_v53  ;;  %1391 = vst.msk [vmem:[#allocation3 + $0xe0] sm:$0xff] %vm807_vm1, %v4038_v24  ;;  %v784_v9 = vsel %vm716_vm6, %v684_v43, %v752_v57  ;;  %v689_v11 = vadd.f32 %v3892_v36, %v653_v58  ;;  %v654_v42 = vmul.f32 %v3568_v63, %v3887_v34  ;;  %v3709_v16 = vld [vmem:[%s4997_s2 + $0x68] sm:$0xff]   ;;  %v1786_v18 = vld [vmem:[#allocation2 + $0x71] sm:$0xff]  ;;  %vm1188_vm14 = vcmask 785920  }
 0x106   : > { %873 = vst.msk [vmem:[#allocation2 + $0x188] sm:$0xff] %vm807_vm1, %v797_v3  ;;  %3405 = vmatprep.subr.bf16.mxu1 %v3707_v61  ;;  %v1785_v17 = vld [vmem:[#allocation2 + $0x69] sm:$0xff]  ;;  %860 = vst.msk [vmem:[#allocation2 + $0xb0] sm:$0xff] %vm807_vm1, %v784_v9  ;;  %v687_v20 = vadd.f32 %v3892_v36, %v651_v62  ;;  %v652_v21 = vmul.f32 %v3887_v34, %v558_v52  ;;  %1607 = vrot.lane.b32.xlu0 %v4060_v0, %s3726_s15 }
 0x107   : > { %v1849_v22 = vld [vmem:[#allocation3 + $0x10] sm:$0xff]  ;;  %v4092_v23 = vpack.c.bf16 %v1788_v14, %v1787_v13  ;;  %v763_v25 = vmul.f32 %v3896_v40, %v4016_v29  ;;  %1390 = vst.msk [vmem:[#allocation3 + $0xc8] sm:$0xff] %vm807_vm1, %v4062_v2  ;;  %v4098_v30 = vpack.c.bf16 %v1786_v18, %v1785_v17  ;;  %vm721_vm8 = vcmp.ge.f32.partialorder %v689_v11, 0.0  ;;  %1015 = vrot.lane.b32.xlu1 %v3982_v1, %s3727_s16  ;;  %v1531_v38 = vld [vmem:[#allocation2 + $0x87] sm:$0xff] }
 0x108   : > { %v757_v32 = vmul.f32 %v3896_v40, %v689_v11  ;;  %v690_v37 = vadd.f32 %v3892_v36, %v654_v42  ;;  %3589 = vmatprep.mubr.msk.bf16.mxu0 %vm807_vm1, %v1849_v22  ;;  %v1659_v39 = vld [vmem:[#allocation2 + $0x88] sm:$0xff]  ;;  %vm719_vm9 = vcmp.ge.f32.partialorder %v687_v20, 0.0  ;;  %v755_v41 = vmul.f32 %v3896_v40, %v687_v20  ;;  %v1660_v47 = vld [vmem:[#allocation2 + $0x90] sm:$0xff] }
 0x109   : > { %v688_v43 = vadd.f32 %v3892_v36, %v652_v21  ;;  %1833 = vst.msk [vmem:[#allocation3 + $0x40] sm:$0xff] %vm807_vm1, %v4092_v23  ;;  %v795_v44 = vsel %vm727_vm7, %v4016_v29, %v763_v25  ;;  %v1532_v45 = vld [vmem:[#allocation2 + $0x8f] sm:$0xff]  ;;  %3406 = vmatpush3.bf16.msra.mxu1 %v3708_v8  ;;  %1832 = vst.msk [vmem:[#allocation3 + $0x28] sm:$0xff] %vm807_vm1, %v4098_v30  ;;  %v4120_v50 = vpack.c.bf16 %v1415_v6, %v1414_v4  ;;  %v1529_v29 = vld [vmem:[#allocation2 + $0x67] sm:$0xff]  ;;  %v1141_v21 = vpop.permute.xlu1 %1140 }
 0x10a   : > { %v3710_v1 = vld [vmem:[%s4997_s2 + $0x28] sm:$0xff]   ;;  %v789_v48 = vsel %vm721_vm8, %v689_v11, %v757_v32  ;;  %vm722_vm10 = vcmp.ge.f32.partialorder %v690_v37, 0.0  ;;  %v758_v49 = vmul.f32 %v3896_v40, %v690_v37  ;;  %871 = vst.msk [vmem:[#allocation2 + $0x168] sm:$0xff] %vm807_vm1, %v795_v44  ;;  %3407 = vmatprep.subr.bf16.mxu1 %v3709_v16  ;;  %v3711_v53 = vld [vmem:[%s4997_s2 + $0x70] sm:$0xff]   ;;  %v787_v56 = vsel %vm719_vm9, %v687_v20, %v755_v41 }
 0x10b   : > { %865 = vst.msk [vmem:[#allocation2 + $0x108] sm:$0xff] %vm807_vm1, %v789_v48  ;;  %vm720_vm11 = vcmp.ge.f32.partialorder %v688_v43, 0.0  ;;  %v756_v57 = vmul.f32 %v3896_v40, %v688_v43  ;;  %1735 = vrot.lane.b32.xlu0 %v4038_v24, %s3728_s13  ;;  %v698_v58 = vadd.f32 %v3892_v36, %v4025_v46  ;;  %v1530_v59 = vld [vmem:[#allocation2 + $0x6f] sm:$0xff]  ;;  %863 = vst.msk [vmem:[#allocation2 + $0xe8] sm:$0xff] %vm807_vm1, %v787_v56  ;;  %1144 = vrot.lane.b32.xlu1 %v3988_v10, %s3726_s15  ;;  %v1541_v25 = vld [vmem:[#allocation2 + $0x127] sm:$0xff]  ;;  %vm1317_vm9 = vcmask 1048320  }
 0x10c   : > { %v1657_v61 = vld [vmem:[#allocation2 + $0x68] sm:$0xff]  ;;  %v1658_v62 = vld [vmem:[#allocation2 + $0x70] sm:$0xff]  ;;  %v790_v63 = vsel %vm722_vm10, %v690_v37, %v758_v49  ;;  %v660_v6 = vmul.f32 %v3887_v34, %v3944_v28  ;;  %v4138_v8 = vpack.c.bf16 %v1532_v45, %v1531_v38  ;;  %v4140_v9 = vpack.c.bf16 %v1660_v47, %v1659_v39  ;;  %1838 = vst.msk [vmem:[#allocation3 + $0xb8] sm:$0xff] %vm807_vm1, %v4120_v50  ;;  %v3713_v45 = vld [vmem:[%s4997_s2 + $0x78] sm:$0xff]  }
 0x10d   : > { %v1791_v3 = vld [vmem:[#allocation2 + $0xc9] sm:$0xff]  ;;  %v1792_v4 = vld [vmem:[#allocation2 + $0xd1] sm:$0xff]  ;;  %866 = vst.msk [vmem:[#allocation2 + $0x110] sm:$0xff] %vm807_vm1, %v790_v63  ;;  %v788_v46 = vsel %vm720_vm11, %v688_v43, %v756_v57  ;;  %vm730_vm12 = vcmp.ge.f32.partialorder %v698_v58, 0.0  ;;  %v766_v10 = vmul.f32 %v3896_v40, %v698_v58  ;;  %3408 = vmatpush3.bf16.msra.mxu1 %v3710_v1  ;;  %v4151_v16 = vpack.c.bf16 %v1530_v59, %v1529_v29 }
 0x10e   : > { %v1398_v11 = vld [vmem:[#allocation2 + $0x29] sm:$0xff]  ;;  %v1399_v42 = vld [vmem:[#allocation2 + $0x31] sm:$0xff]  ;;  %v4146_v52 = vpack.c.bf16 %v1792_v4, %v1791_v3  ;;  %864 = vst.msk [vmem:[#allocation2 + $0xf0] sm:$0xff] %vm807_vm1, %v788_v46  ;;  %v696_v14 = vadd.f32 %v3892_v36, %v660_v6  ;;  %v4153_v17 = vpack.c.bf16 %v1658_v62, %v1657_v61  ;;  %3409 = vmatprep.subr.bf16.mxu1 %v3711_v53  ;;  %1385 = vst.msk [vmem:[#allocation3 + $0x50] sm:$0xff] %vm807_vm1, %v4140_v9 }
 0x10f   : > { %v1789_v28 = vld [vmem:[#allocation2 + $0xa9] sm:$0xff]  ;;  %v1790_v13 = vld [vmem:[#allocation2 + $0xb1] sm:$0xff]  ;;  %935 = vst.msk [vmem:[#allocation3 + $0x60] sm:$0xff] %vm807_vm1, %v4138_v8  ;;  %1480 = vrot.lane.b32.xlu0 %v4040_v51, %s3727_s16  ;;  %v798_v20 = vsel %vm730_vm12, %v698_v58, %v766_v10  ;;  %1269 = vrot.lane.b32.xlu1 %v4011_v26, %s3728_s13  ;;  %v1430_v22 = vpack.c.bf16 %v1399_v42, %v1398_v11  ;;  %934 = vst.msk [vmem:[#allocation3 + $0x48] sm:$0xff] %vm807_vm1, %v4151_v16 }
 0x110   : > { %v4161_v18 = vpack.c.bf16 %v1790_v13, %v1789_v28  ;;  %1835 = vst.msk [vmem:[#allocation3 + $0x70] sm:$0xff] %vm807_vm1, %v4146_v52  ;;  %v1855_v32 = vld [vmem:[#allocation3 + $0x40] sm:$0xff]  ;;  %874 = vst.msk [vmem:[#allocation2 + $0x190] sm:$0xff] %vm807_vm1, %v798_v20  ;;  %vm728_vm13 = vcmp.ge.f32.partialorder %v696_v14, 0.0  ;;  %v764_v37 = vmul.f32 %v3896_v40, %v696_v14  ;;  %v665_v38 = vmul.f32 %v3974_v54, %v3887_v34  ;;  %v3712_v39 = vld [vmem:[%s4997_s2 + $0x30] sm:$0xff]  }
 0x111   : > { %1384 = vst.msk [vmem:[#allocation3 + $0x38] sm:$0xff] %vm807_vm1, %v4153_v17  ;;  %v1852_v26 = vld [vmem:[#allocation3 + $0x28] sm:$0xff]  ;;  %v663_v43 = vmul.f32 %v3887_v34, %v3984_v5  ;;  %v666_v54 = vmul.f32 %v3990_v12, %v3887_v34  ;;  %v664_v44 = vmul.f32 %v3887_v34, %v3999_v19  ;;  %v669_v5 = vmul.f32 %v4045_v55, %v3887_v34  ;;  %v3714_v49 = vld [vmem:[%s4997_s2 + $0x38] sm:$0xff]  }
 0x112   : > { %v1542_v41 = vld [vmem:[#allocation2 + $0x12f] sm:$0xff]  ;;  %1834 = vst.msk [vmem:[#allocation3 + $0x58] sm:$0xff] %vm807_vm1, %v4161_v18  ;;  %3590 = vmatmul.mubr.msk.bf16.vlgmr.msra.gmra.mrb[16].mxu0 %vm807_vm1, %v1852_v26  ;;  %v796_v47 = vsel %vm728_vm13, %v696_v14, %v764_v37  ;;  %v701_v1 = vadd.f32 %v3892_v36, %v665_v38  ;;  %v667_v12 = vmul.f32 %v3887_v34, %v4053_v60  ;;  %v901_v38 = vld [vmem:[#allocation2 + $0x127] sm:$0xff] }
 0x113   : > { %1189 = vst.msk [vmem:[#allocation3] sm:$0xff] %vm1188_vm14, %v1141_v21  ;;  %1462 = vrot.lane.b32.xlu0 %v1430_v22, %s3727_s16  ;;  %3593 = vmatprep.mubr.msk.bf16.mxu0 %vm807_vm1, %v1855_v32  ;;  %v699_v19 = vadd.f32 %v3892_v36, %v663_v43  ;;  %v702_v48 = vadd.f32 %v3892_v36, %v666_v54  ;;  %v1665_v56 = vld [vmem:[#allocation2 + $0xe8] sm:$0xff] }
 0x114   : > { %872 = vst.msk [vmem:[#allocation2 + $0x170] sm:$0xff] %vm807_vm1, %v796_v47  ;;  %1013 = vrot.lane.b32.xlu1 %v4013_v27, %s3727_s16  ;;  %v4206_v55 = vpack.c.bf16 %v1542_v41, %v1541_v25  ;;  %v1795_v60 = vld [vmem:[#allocation2 + $0x109] sm:$0xff]  ;;  %v1796_v29 = vld [vmem:[#allocation2 + $0x111] sm:$0xff]  ;;  %vm733_vm15 = vcmp.ge.f32.partialorder %v701_v1, 0.0  ;;  %v769_v53 = vmul.f32 %v3896_v40, %v701_v1  ;;  %v700_v57 = vadd.f32 %v3892_v36, %v664_v44 }
 0x115   : > { %3410 = vmatpush3.bf16.msra.mxu1 %v3712_v39  ;;  %v1793_v58 = vld [vmem:[#allocation2 + $0xe9] sm:$0xff]  ;;  %v1794_v59 = vld [vmem:[#allocation2 + $0xf1] sm:$0xff]  ;;  %v4210_v61 = vpack.c.bf16 %v1796_v29, %v1795_v60  ;;  %vm731_vm0 = vcmp.ge.f32.partialorder %v699_v19, 0.0  ;;  %v767_v62 = vmul.f32 %v3896_v40, %v699_v19  ;;  %v705_v27 = vadd.f32 %v3892_v36, %v669_v5 }
 0x116   : > { %3411 = vmatprep.subr.bf16.mxu1 %v3713_v45  ;;  %v4214_v63 = vpack.c.bf16 %v1794_v59, %v1793_v58  ;;  %v801_v3 = vsel %vm733_vm15, %v701_v1, %v769_v53  ;;  %v1666_v4 = vld [vmem:[#allocation2 + $0xf0] sm:$0xff]  ;;  %vm734_vm2 = vcmp.ge.f32.partialorder %v702_v48, 0.0  ;;  %v1675_v6 = vld [vmem:[#allocation2 + $0x188] sm:$0xff]  ;;  %v703_v46 = vadd.f32 %v3892_v36, %v667_v12 }
 0x117   : > { %1605 = vrot.lane.b32.xlu0 %v4206_v55, %s3726_s15  ;;  %1837 = vst.msk [vmem:[#allocation3 + $0xa0] sm:$0xff] %vm807_vm1, %v4210_v61  ;;  %v1803_v11 = vld [vmem:[#allocation2 + $0x189] sm:$0xff]  ;;  %v1804_v42 = vld [vmem:[#allocation2 + $0x191] sm:$0xff]  ;;  %877 = vst.msk [vmem:[#allocation2 + $0x1c8] sm:$0xff] %vm807_vm1, %v801_v3  ;;  %v799_v10 = vsel %vm731_vm0, %v699_v19, %v767_v62  ;;  %v4222_v28 = vpack.c.bf16 %v1666_v4, %v1665_v56  ;;  %v770_v13 = vmul.f32 %v3896_v40, %v702_v48 }
 0x118   : > { %v1673_v14 = vld [vmem:[#allocation2 + $0x168] sm:$0xff]  ;;  %1142 = vrot.lane.b32.xlu1 %v1430_v22, %s3726_s15  ;;  %v1861_v21 = vld [vmem:[#allocation3 + $0x70] sm:$0xff]  ;;  %1836 = vst.msk [vmem:[#allocation3 + $0x88] sm:$0xff] %vm807_vm1, %v4214_v63  ;;  %v4228_v25 = vpack.c.bf16 %v1804_v42, %v1803_v11  ;;  %875 = vst.msk [vmem:[#allocation2 + $0x1a8] sm:$0xff] %vm807_vm1, %v799_v10  ;;  %vm732_vm4 = vcmp.ge.f32.partialorder %v700_v57, 0.0  ;;  %v768_v32 = vmul.f32 %v3896_v40, %v700_v57  ;;  %vm737_vm5 = vcmp.ge.f32.partialorder %v705_v27, 0.0 }
 0x119   : > { %v1858_v20 = vld [vmem:[#allocation3 + $0x58] sm:$0xff]  ;;  %v1676_v37 = vld [vmem:[#allocation2 + $0x190] sm:$0xff]  ;;  %3412 = vmatpush3.bf16.msra.mxu1 %v3714_v49  ;;  %v802_v26 = vsel %vm734_vm2, %v702_v48, %v770_v13  ;;  %v773_v22 = vmul.f32 %v3896_v40, %v705_v27  ;;  %v895_v43 = vld [vmem:[#allocation2 + $0xc7] sm:$0xff]  ;;  %1388 = vst.msk [vmem:[#allocation3 + $0x98] sm:$0xff] %vm807_vm1, %v4222_v28  ;;  %vm735_vm6 = vcmp.ge.f32.partialorder %v703_v46, 0.0  ;;  %v771_v5 = vmul.f32 %v3896_v40, %v703_v46 }
 0x11a   : > { %v902_v39 = vld [vmem:[#allocation2 + $0x12f] sm:$0xff]  ;;  %v4233_v41 = vpack.c.bf16 %v1676_v37, %v1675_v6  ;;  %3594 = vmatmul.mubr.msk.bf16.gmra.mrb[20].mxu0 %vm807_vm1, %v1858_v20  ;;  %1841 = vst.msk [vmem:[#allocation3 + $0x100] sm:$0xff] %vm807_vm1, %v4228_v25  ;;  %878 = vst.msk [vmem:[#allocation2 + $0x1d0] sm:$0xff] %vm807_vm1, %v802_v26  ;;  %v800_v1 = vsel %vm732_vm4, %v700_v57, %v768_v32  ;;  %v670_v12 = vmul.f32 %v4070_v7, %v3887_v34  ;;  %v903_v48 = vld [vmem:[#allocation2 + $0x147] sm:$0xff] }
 0x11b   : > { %v896_v54 = vld [vmem:[#allocation2 + $0xcf] sm:$0xff]  ;;  %1733 = vrot.lane.b32.xlu0 %v4062_v2, %s3728_s13  ;;  %3597 = vmatprep.mubr.msk.bf16.mxu0 %vm807_vm1, %v1861_v21  ;;  %876 = vst.msk [vmem:[#allocation2 + $0x1b0] sm:$0xff] %vm807_vm1, %v800_v1  ;;  %v805_v53 = vsel %vm737_vm5, %v705_v27, %v773_v22  ;;  %v893_v56 = vld [vmem:[#allocation2 + $0xa7] sm:$0xff]  ;;  %v803_v58 = vsel %vm735_vm6, %v703_v46, %v771_v5 }
 0x11c   : > { %v1344_v44 = vld [vmem:[#allocation2 + $0xc8] sm:$0xff]  ;;  %v1802_v47 = vld [vmem:[#allocation2 + $0x171] sm:$0xff]  ;;  %1393 = vst.msk [vmem:[#allocation3 + $0x110] sm:$0xff] %vm807_vm1, %v4233_v41  ;;  %1285 = vrot.lane.b32.xlu1 %v4206_v55, %s3728_s13  ;;  %881 = vst.msk [vmem:[#allocation2 + $0x208] sm:$0xff] %vm807_vm1, %v805_v53  ;;  %v706_v59 = vadd.f32 %v3892_v36, %v670_v12  ;;  %v668_v62 = vmul.f32 %v3887_v34, %v4082_v15  ;;  %v924_v55 = vpack.c.bf16 %v902_v39, %v901_v38 }
 0x11d   : > { %v1801_v45 = vld [vmem:[#allocation2 + $0x169] sm:$0xff]  ;;  %879 = vst.msk [vmem:[#allocation2 + $0x1e8] sm:$0xff] %vm807_vm1, %v803_v58  ;;  %v921_v6 = vpack.c.bf16 %v896_v54, %v895_v43 }
 0x11e   : > { %v1345_v19 = vld [vmem:[#allocation2 + $0xd0] sm:$0xff]  ;;  %v4249_v60 = vpack.c.bf16 %v1802_v47, %v1801_v45  ;;  %v1342_v27 = vld [vmem:[#allocation2 + $0xa8] sm:$0xff]  ;;  %vm738_vm7 = vcmp.ge.f32.partialorder %v706_v59, 0.0  ;;  %v774_v20 = vmul.f32 %v3896_v40, %v706_v59  ;;  %v704_v34 = vadd.f32 %v3892_v36, %v668_v62  ;;  %940 = vst.msk [vmem:[#allocation3 + $0xd8] sm:$0xff] %vm807_vm1, %v924_v55 }
 0x11f   : > { %v904_v49 = vld [vmem:[#allocation2 + $0x14f] sm:$0xff]  ;;  %v899_v4 = vld [vmem:[#allocation2 + $0x107] sm:$0xff]  ;;  %v1371_v11 = vpack.c.bf16 %v1345_v19, %v1344_v44  ;;  %1478 = vrot.lane.b32.xlu0 %v4120_v50, %s3727_s16  ;;  %937 = vst.msk [vmem:[#allocation3 + $0x90] sm:$0xff] %vm807_vm1, %v921_v6 }
 0x120   : > { %v1674_v29 = vld [vmem:[#allocation2 + $0x170] sm:$0xff]  ;;  %1840 = vst.msk [vmem:[#allocation3 + $0xe8] sm:$0xff] %vm807_vm1, %v4249_v60  ;;  %v1348_v13 = vld [vmem:[#allocation2 + $0x108] sm:$0xff]  ;;  %v925_v26 = vpack.c.bf16 %v904_v49, %v903_v48  ;;  %1029 = vrot.lane.b32.xlu1 %v4062_v2, %s3727_s16  ;;  %v806_v22 = vsel %vm738_vm7, %v706_v59, %v774_v20  ;;  %vm736_vm8 = vcmp.ge.f32.partialorder %v704_v34, 0.0  ;;  %v772_v43 = vmul.f32 %v3896_v40, %v704_v34 }
 0x121   : > { %v894_v57 = vld [vmem:[#allocation2 + $0xaf] sm:$0xff]  ;;  %v4257_v7 = vpack.c.bf16 %v1674_v29, %v1673_v14  ;;  %v1867_v14 = vld [vmem:[#allocation3 + $0xa0] sm:$0xff]  ;;  %1387 = vst.msk [vmem:[#allocation3 + $0x80] sm:$0xff] %vm807_vm1, %v1371_v11  ;;  %882 = vst.msk [vmem:[#allocation2 + $0x210] sm:$0xff] %vm807_vm1, %v806_v22 }
 0x122   : > { %v1343_v3 = vld [vmem:[#allocation2 + $0xb0] sm:$0xff]  ;;  %v920_v42 = vpack.c.bf16 %v894_v57, %v893_v56  ;;  %v1864_v21 = vld [vmem:[#allocation3 + $0x88] sm:$0xff]  ;;  %941 = vst.msk [vmem:[#allocation3 + $0xf0] sm:$0xff] %vm807_vm1, %v925_v26  ;;  %v804_v40 = vsel %vm736_vm8, %v704_v34, %v772_v43 }
 0x123   : > { %v900_v10 = vld [vmem:[#allocation2 + $0x10f] sm:$0xff]  ;;  %v1370_v15 = vpack.c.bf16 %v1343_v3, %v1342_v27  ;;  %1392 = vst.msk [vmem:[#allocation3 + $0xf8] sm:$0xff] %vm807_vm1, %v4257_v7  ;;  %v1549_v32 = vld [vmem:[#allocation2 + $0x1a7] sm:$0xff]  ;;  %3598 = vmatmul.mubr.msk.bf16.gmra.mrb[24].mxu0 %vm807_vm1, %v1864_v21  ;;  %1595 = vrot.lane.b32.xlu0 %v4138_v8, %s3726_s15  ;;  %880 = vst.msk [vmem:[#allocation2 + $0x1f0] sm:$0xff] %vm807_vm1, %v804_v40 }
 0x124   : > { %v1349_v46 = vld [vmem:[#allocation2 + $0x110] sm:$0xff]  ;;  %v1551_v37 = vld [vmem:[#allocation2 + $0x1c7] sm:$0xff]  ;;  %936 = vst.msk [vmem:[#allocation3 + $0x78] sm:$0xff] %vm807_vm1, %v920_v42  ;;  %v923_v36 = vpack.c.bf16 %v900_v10, %v899_v4  ;;  %3601 = vmatprep.mubr.msk.bf16.mxu0 %vm807_vm1, %v1867_v14  ;;  %1158 = vrot.lane.b32.xlu1 %v4120_v50, %s3726_s15  ;;  %v1870_v14 = vld [vmem:[#allocation3 + $0xb8] sm:$0xff] }
 0x125   : > { %v1679_v38 = vld [vmem:[#allocation2 + $0x1c8] sm:$0xff]  ;;  %v1373_v39 = vpack.c.bf16 %v1349_v46, %v1348_v13  ;;  %1386 = vst.msk [vmem:[#allocation3 + $0x68] sm:$0xff] %vm807_vm1, %v1370_v15  ;;  %v1808_v1 = vld [vmem:[#allocation2 + $0x1d1] sm:$0xff] }
 0x126   : > { %v1677_v54 = vld [vmem:[#allocation2 + $0x1a8] sm:$0xff]  ;;  %939 = vst.msk [vmem:[#allocation3 + $0xc0] sm:$0xff] %vm807_vm1, %v923_v36  ;;  %v1806_v19 = vld [vmem:[#allocation2 + $0x1b1] sm:$0xff] }
 0x127   : > { %v897_v44 = vld [vmem:[#allocation2 + $0xe7] sm:$0xff]  ;;  %v898_v45 = vld [vmem:[#allocation2 + $0xef] sm:$0xff]  ;;  %1389 = vst.msk [vmem:[#allocation3 + $0xb0] sm:$0xff] %vm807_vm1, %v1373_v39  ;;  %1723 = vrot.lane.b32.xlu0 %v4140_v9, %s3728_s13 }
 0x128   : > { %v1807_v47 = vld [vmem:[#allocation2 + $0x1c9] sm:$0xff]  ;;  %v922_v2 = vpack.c.bf16 %v898_v45, %v897_v44  ;;  %1275 = vrot.lane.b32.xlu1 %v4138_v8, %s3728_s13  ;;  %v1812_v13 = vld [vmem:[#allocation2 + $0x211] sm:$0xff] }
 0x129   : > { %v905_v5 = vld [vmem:[#allocation2 + $0x167] sm:$0xff]  ;;  %v1550_v48 = vld [vmem:[#allocation2 + $0x1af] sm:$0xff]  ;;  %v4287_v49 = vpack.c.bf16 %v1808_v1, %v1807_v47 }
 0x12a   : > { %v1805_v12 = vld [vmem:[#allocation2 + $0x1a9] sm:$0xff]  ;;  %v4295_v53 = vpack.c.bf16 %v1550_v48, %v1549_v32  ;;  %938 = vst.msk [vmem:[#allocation3 + $0xa8] sm:$0xff] %vm807_vm1, %v922_v2  ;;  %v1810_v32 = vld [vmem:[#allocation2 + $0x1f1] sm:$0xff] }
 0x12b   : > { %v4293_v29 = vpack.c.bf16 %v1806_v19, %v1805_v12  ;;  %v1678_v56 = vld [vmem:[#allocation2 + $0x1b0] sm:$0xff]  ;;  %1843 = vst.msk [vmem:[#allocation3 + $0x130] sm:$0xff] %vm807_vm1, %v4287_v49  ;;  %v907_v4 = vld [vmem:[#allocation2 + $0x187] sm:$0xff]  ;;  %3602 = vmatmul.mubr.msk.bf16.gmra.mrb[28].mxu0 %vm807_vm1, %v1870_v14  ;;  %1468 = vrot.lane.b32.xlu0 %v4092_v23, %s3727_s16 }
 0x12c   : > { %v1552_v57 = vld [vmem:[#allocation2 + $0x1cf] sm:$0xff]  ;;  %v4302_v59 = vpack.c.bf16 %v1678_v56, %v1677_v54  ;;  %944 = vst.msk [vmem:[#allocation3 + $0x138] sm:$0xff] %vm807_vm1, %v4295_v53  ;;  %v1553_v46 = vld [vmem:[#allocation2 + $0x1e7] sm:$0xff]  ;;  %1019 = vrot.lane.b32.xlu1 %v4140_v9, %s3727_s16 }
 0x12d   : > { %v1680_v58 = vld [vmem:[#allocation2 + $0x1d0] sm:$0xff]  ;;  %v4304_v62 = vpack.c.bf16 %v1552_v57, %v1551_v37  ;;  %1842 = vst.msk [vmem:[#allocation3 + $0x118] sm:$0xff] %vm807_vm1, %v4293_v29  ;;  %v1683_v6 = vld [vmem:[#allocation2 + $0x208] sm:$0xff]  ;;  %v1879_v9 = vld [vmem:[#allocation3 + $0x100] sm:$0xff] }
 0x12e   : > { %v4306_v27 = vpack.c.bf16 %v1680_v58, %v1679_v38  ;;  %v906_v3 = vld [vmem:[#allocation2 + $0x16f] sm:$0xff]  ;;  %1394 = vst.msk [vmem:[#allocation3 + $0x128] sm:$0xff] %vm807_vm1, %v4302_v59  ;;  %v1545_v43 = vld [vmem:[#allocation2 + $0x167] sm:$0xff] }
 0x12f   : > { %v926_v55 = vpack.c.bf16 %v906_v3, %v905_v5  ;;  %v908_v50 = vld [vmem:[#allocation2 + $0x18f] sm:$0xff]  ;;  %945 = vst.msk [vmem:[#allocation3 + $0x150] sm:$0xff] %vm807_vm1, %v4304_v62  ;;  %1593 = vrot.lane.b32.xlu0 %v4151_v16, %s3726_s15  ;;  %v1535_v47 = vld [vmem:[#allocation2 + $0xc7] sm:$0xff] }
 0x130   : > { %1395 = vst.msk [vmem:[#allocation3 + $0x140] sm:$0xff] %vm807_vm1, %v4306_v27  ;;  %v927_v11 = vpack.c.bf16 %v908_v50, %v907_v4  ;;  %v1873_v42 = vld [vmem:[#allocation3 + $0xd0] sm:$0xff]  ;;  %v1681_v15 = vld [vmem:[#allocation2 + $0x1e8] sm:$0xff]  ;;  %1148 = vrot.lane.b32.xlu1 %v4092_v23, %s3726_s15 }
 0x131   : > { %v1811_v10 = vld [vmem:[#allocation2 + $0x209] sm:$0xff]  ;;  %942 = vst.msk [vmem:[#allocation3 + $0x108] sm:$0xff] %vm807_vm1, %v926_v55  ;;  %3605 = vmatprep.mubr.msk.bf16.mxu0 %vm807_vm1, %v1873_v42 }
 0x132   : > { %v4323_v20 = vpack.c.bf16 %v1812_v13, %v1811_v10  ;;  %v1684_v34 = vld [vmem:[#allocation2 + $0x210] sm:$0xff]  ;;  %943 = vst.msk [vmem:[#allocation3 + $0x120] sm:$0xff] %vm807_vm1, %v927_v11  ;;  %v1876_v22 = vld [vmem:[#allocation3 + $0xe8] sm:$0xff] }
 0x133   : > { %v1809_v21 = vld [vmem:[#allocation2 + $0x1e9] sm:$0xff]  ;;  %v4327_v37 = vpack.c.bf16 %v1684_v34, %v1683_v6  ;;  %3606 = vmatmul.mubr.msk.bf16.gmra.mrb[32].mxu0 %vm807_vm1, %v1876_v22  ;;  %1721 = vrot.lane.b32.xlu0 %v4153_v17, %s3728_s13 }
 0x134   : > { %v1554_v8 = vld [vmem:[#allocation2 + $0x1ef] sm:$0xff]  ;;  %v4332_v38 = vpack.c.bf16 %v1810_v32, %v1809_v21  ;;  %1845 = vst.msk [vmem:[#allocation3 + $0x160] sm:$0xff] %vm807_vm1, %v4323_v20  ;;  %3609 = vmatprep.mubr.msk.bf16.mxu0 %vm807_vm1, %v1879_v9  ;;  %1273 = vrot.lane.b32.xlu1 %v4151_v16, %s3728_s13  ;;  %v1882_v44 = vld [vmem:[#allocation3 + $0x118] sm:$0xff]  ;;  %v1533_v19 = vld [vmem:[#allocation2 + $0xa7] sm:$0xff] }
 0x135   : > { %v4336_v36 = vpack.c.bf16 %v1554_v8, %v1553_v46  ;;  %v1682_v39 = vld [vmem:[#allocation2 + $0x1f0] sm:$0xff]  ;;  %1397 = vst.msk [vmem:[#allocation3 + $0x170] sm:$0xff] %vm807_vm1, %v4327_v37  ;;  %v1663_v2 = vld [vmem:[#allocation2 + $0xc8] sm:$0xff] }
 0x136   : > { %v4340_v26 = vpack.c.bf16 %v1682_v39, %v1681_v15  ;;  %1844 = vst.msk [vmem:[#allocation3 + $0x148] sm:$0xff] %vm807_vm1, %v4332_v38  ;;  %v1546_v54 = vld [vmem:[#allocation2 + $0x16f] sm:$0xff]  ;;  %v1539_v3 = vld [vmem:[#allocation2 + $0x107] sm:$0xff] }
 0x137   : > { %946 = vst.msk [vmem:[#allocation3 + $0x168] sm:$0xff] %vm807_vm1, %v4336_v36  ;;  %1466 = vrot.lane.b32.xlu0 %v4098_v30, %s3727_s16  ;;  %v1885_v23 = vld [vmem:[#allocation3 + $0x130] sm:$0xff]  ;;  %v4364_v45 = vpack.c.bf16 %v1546_v54, %v1545_v43  ;;  %v1661_v56 = vld [vmem:[#allocation2 + $0xa8] sm:$0xff] }
 0x138   : > { %1396 = vst.msk [vmem:[#allocation3 + $0x158] sm:$0xff] %vm807_vm1, %v4340_v26  ;;  %1017 = vrot.lane.b32.xlu1 %v4153_v17, %s3727_s16  ;;  %v1536_v1 = vld [vmem:[#allocation2 + $0xcf] sm:$0xff]  ;;  %v1537_v11 = vld [vmem:[#allocation2 + $0xe7] sm:$0xff] }
 0x139   : > { %v1563_v16 = vpack.c.bf16 %v1536_v1, %v1535_v47  ;;  %v1664_v5 = vld [vmem:[#allocation2 + $0xd0] sm:$0xff]  ;;  %v1667_v55 = vld [vmem:[#allocation2 + $0x108] sm:$0xff] }
 0x13a   : > { %v1691_v12 = vpack.c.bf16 %v1664_v5, %v1663_v2  ;;  %v1662_v57 = vld [vmem:[#allocation2 + $0xb0] sm:$0xff] }
 0x13b   : > { %3610 = vmatmul.mubr.msk.bf16.gmra.mrb[36].mxu0 %vm807_vm1, %v1882_v44  ;;  %1609 = vrot.lane.b32.xlu0 %v4364_v45, %s3726_s15  ;;  %v1891_v40 = vld [vmem:[#allocation3 + $0x160] sm:$0xff]  ;;  %v1690_v58 = vpack.c.bf16 %v1662_v57, %v1661_v56  ;;  %v1540_v4 = vld [vmem:[#allocation2 + $0x10f] sm:$0xff] }
 0x13c   : > { %3613 = vmatprep.mubr.msk.bf16.mxu0 %vm807_vm1, %v1885_v23  ;;  %1146 = vrot.lane.b32.xlu1 %v4098_v30, %s3726_s15  ;;  %v1534_v30 = vld [vmem:[#allocation2 + $0xaf] sm:$0xff]  ;;  %v1555_v23 = vld [vmem:[#allocation2 + $0x207] sm:$0xff] }
 0x13d   : > { %v1888_v17 = vld [vmem:[#allocation3 + $0x148] sm:$0xff]  ;;  %v1562_v48 = vpack.c.bf16 %v1534_v30, %v1533_v19  ;;  %v1668_v50 = vld [vmem:[#allocation2 + $0x110] sm:$0xff] }
 0x13e   : > { %v1693_v6 = vpack.c.bf16 %v1668_v50, %v1667_v55  ;;  %v1538_v42 = vld [vmem:[#allocation2 + $0xef] sm:$0xff] }
 0x13f   : > { %1599 = vrot.lane.b32.xlu0 %v1563_v16, %s3726_s15  ;;  %v1548_v13 = vld [vmem:[#allocation2 + $0x18f] sm:$0xff] }
 0x140   : > { %1279 = vrot.lane.b32.xlu1 %v1563_v16, %s3728_s13 }
 0x143   : > { %3614 = vmatmul.mubr.msk.bf16.gmra.mrb[40].mxu0 %vm807_vm1, %v1888_v17  ;;  %1727 = vrot.lane.b32.xlu0 %v1691_v12, %s3728_s13 }
 0x144   : > { %3617 = vmatprep.mubr.msk.bf16.mxu0 %vm807_vm1, %v1891_v40  ;;  %1023 = vrot.lane.b32.xlu1 %v1691_v12, %s3727_s16  ;;  %v1814_v40 = vld [vmem:[#allocation2 + $0x231] sm:$0xff]  ;;  %v1557_v12 = vld [vmem:[#allocation2 + $0x227] sm:$0xff] }
 0x147   : > { %1472 = vrot.lane.b32.xlu0 %v4146_v52, %s3727_s16 }
 0x148   : > { %1152 = vrot.lane.b32.xlu1 %v4146_v52, %s3726_s15  ;;  %v1565_v52 = vpack.c.bf16 %v1540_v4, %v1539_v3  ;;  %v1686_v3 = vld [vmem:[#allocation2 + $0x230] sm:$0xff] }
 0x14b   : > { %1597 = vrot.lane.b32.xlu0 %v1562_v48, %s3726_s15 }
 0x14c   : > { %1277 = vrot.lane.b32.xlu1 %v1562_v48, %s3728_s13 }
 0x14f   : > { %1725 = vrot.lane.b32.xlu0 %v1690_v58, %s3728_s13 }
 0x150   : > { %1021 = vrot.lane.b32.xlu1 %v1690_v58, %s3727_s16 }
 0x153   : > { %1470 = vrot.lane.b32.xlu0 %v4161_v18, %s3727_s16 }
 0x154   : > { %1150 = vrot.lane.b32.xlu1 %v4161_v18, %s3726_s15  ;;  %v1564_v18 = vpack.c.bf16 %v1538_v42, %v1537_v11 }
 0x157   : > { %1603 = vrot.lane.b32.xlu0 %v1565_v52, %s3726_s15 }
 0x158   : > { %1283 = vrot.lane.b32.xlu1 %v1565_v52, %s3728_s13 }
 0x15b   : > { %1731 = vrot.lane.b32.xlu0 %v1693_v6, %s3728_s13 }
 0x15c   : > { %1027 = vrot.lane.b32.xlu1 %v1693_v6, %s3727_s16 }
 0x15f   : > { %1476 = vrot.lane.b32.xlu0 %v4210_v61, %s3727_s16 }
 0x160   : > { %1156 = vrot.lane.b32.xlu1 %v4210_v61, %s3726_s15 }
 0x163   : > { %1601 = vrot.lane.b32.xlu0 %v1564_v18, %s3726_s15 }
 0x164   : > { %1287 = vrot.lane.b32.xlu1 %v4060_v0, %s3728_s13  ;;  %v1547_v0 = vld [vmem:[#allocation2 + $0x187] sm:$0xff] }
 0x165   : > { %v1569_v46 = vpack.c.bf16 %v1548_v13, %v1547_v0 }
 0x167   : > { %1729 = vrot.lane.b32.xlu0 %v4222_v28, %s3728_s13 }
 0x168   : > { %1031 = vrot.lane.b32.xlu1 %v4038_v24, %s3727_s16 }
 0x16b   : > { %1474 = vrot.lane.b32.xlu0 %v4214_v63, %s3727_s16 }
 0x16c   : > { %1281 = vrot.lane.b32.xlu1 %v1564_v18, %s3728_s13 }
 0x16f   : > { %1737 = vrot.lane.b32.xlu0 %v4257_v7, %s3728_s13 }
 0x170   : > { %1025 = vrot.lane.b32.xlu1 %v4222_v28, %s3727_s16  ;;  %v1720_v61 = vpop.permute.xlu0 %1719  ;;  %v1592_v10 = vpop.permute.xlu1 %1591 }
 0x173   : > { %1482 = vrot.lane.b32.xlu0 %v4249_v60, %s3727_s16 }
 0x174   : > { %1154 = vrot.lane.b32.xlu1 %v4214_v63, %s3726_s15  ;;  %v1465_v24 = vpop.permute.xlu0 %1464 }
 0x175   : > { %1511 = vst.msk [vmem:[#allocation3 + $0x20] sm:$0xff] %vm1059_vm3, %v1465_v24  ;;  %v1272_v14 = vpop.permute.xlu1 %1271 }
 0x177   : > { %1611 = vrot.lane.b32.xlu0 %v1569_v46, %s3726_s15 }
 0x178   : > { %1160 = vrot.lane.b32.xlu1 %v4040_v51, %s3726_s15  ;;  %v1608_v28 = vpop.permute.xlu0 %1607 }
 0x179   : > { %v1016_v34 = vpop.permute.xlu1 %1015 }
 0x17a   : > { %1062 = vst.msk [vmem:[#allocation3 + $0x30] sm:$0xff] %vm1059_vm3, %v1016_v34 }
 0x17b   : > { %1739 = vrot.lane.b32.xlu0 %v4233_v41, %s3728_s13 }
 0x17c   : > { %1289 = vrot.lane.b32.xlu1 %v4364_v45, %s3728_s13  ;;  %v1556_v45 = vld [vmem:[#allocation2 + $0x20f] sm:$0xff] }
 0x17d   : > { %v1736_v63 = vpop.permute.xlu0 %1735  ;;  %v1145_v15 = vpop.permute.xlu1 %1144  ;;  %v4472_v1 = vpack.c.bf16 %v1556_v45, %v1555_v23 }
 0x17e   : > { %1191 = vst.msk [vmem:[#allocation3 + $0x30] sm:$0xff] %vm1188_vm14, %v1145_v15 }
 0x17f   : > { %1484 = vrot.lane.b32.xlu0 %v4228_v25, %s3727_s16 }
 0x180   : > { %1033 = vrot.lane.b32.xlu1 %v4257_v7, %s3727_s16 }
 0x181   : > { %v1481_v51 = vpop.permute.xlu0 %1480  ;;  %v1270_v21 = vpop.permute.xlu1 %1269 }
 0x182   : > { %1519 = vst.msk [vmem:[#allocation3 + $0xe0] sm:$0xff] %vm1059_vm3, %v1481_v51 }
 0x183   : > { %1318 = vst.msk [vmem:[#allocation3] sm:$0xff] %vm1317_vm9, %v1270_v21  ;;  %1613 = vrot.lane.b32.xlu0 %v4295_v53, %s3726_s15 }
 0x184   : > { %1162 = vrot.lane.b32.xlu1 %v4249_v60, %s3726_s15 }
 0x185   : > { %v1463_v32 = vpop.permute.xlu0 %1462 }
 0x186   : > { %1510 = vst.msk [vmem:[#allocation3 + $0x8] sm:$0xff] %vm1059_vm3, %v1463_v32  ;;  %v1014_v8 = vpop.permute.xlu1 %1013 }
 0x187   : > { %1639 = vst.msk [vmem:[#allocation3 + $0x8] sm:$0xff] %vm1188_vm14, %v1592_v10  ;;  %1741 = vrot.lane.b32.xlu0 %v4302_v59, %s3728_s13 }
 0x188   : > { %1061 = vst.msk [vmem:[#allocation3 + $0x18] sm:$0xff] %vm1059_vm3, %v1014_v8  ;;  %1291 = vrot.lane.b32.xlu1 %v1569_v46, %s3728_s13 }
 0x189   : > { %1767 = vst.msk [vmem:[#allocation3 + $0x8] sm:$0xff] %vm1317_vm9, %v1720_v61  ;;  %v4443_v7 = vpop.permute.xlu0 %1605 }
 0x18a   : > { %v1143_v39 = vpop.permute.xlu1 %1142  ;;  %v1847_v43 = vld [vmem:[#allocation3] sm:$0xff] }
 0x18b   : > { %1190 = vst.msk [vmem:[#allocation3 + $0x18] sm:$0xff] %vm1188_vm14, %v1143_v39  ;;  %1486 = vrot.lane.b32.xlu0 %v4293_v29, %s3727_s16 }
 0x18c   : > { %1319 = vst.msk [vmem:[#allocation3 + $0x18] sm:$0xff] %vm1317_vm9, %v1272_v14  ;;  %1035 = vrot.lane.b32.xlu1 %v4233_v41, %s3727_s16 }
 0x18d   : > { %v4451_v60 = vpop.permute.xlu0 %1733 }
 0x18e   : > { %v4453_v22 = vpop.permute.xlu1 %1285 }
 0x18f   : > { %1615 = vrot.lane.b32.xlu0 %v4304_v62, %s3726_s15 }
 0x190   : > { %v1848_v9 = vld [vmem:[#allocation3 + $0x8] sm:$0xff]  ;;  %1164 = vrot.lane.b32.xlu1 %v4228_v25, %s3726_s15 }
 0x191   : > { %2119 = vmatprep.mubr.bf16.mxu1 %v1848_v9  ;;  %v1479_v54 = vpop.permute.xlu0 %1478 }
 0x192   : > { %2120 = vmatmul.mubr.bf16.vlgmr.msra.gmra.mrb[16].mxu1 %v1847_v43  ;;  %1518 = vst.msk [vmem:[#allocation3 + $0xc8] sm:$0xff] %vm1059_vm3, %v1479_v54  ;;  %v1030_v44 = vpop.permute.xlu1 %1029 }
 0x193   : > { %1647 = vst.msk [vmem:[#allocation3 + $0xc8] sm:$0xff] %vm1188_vm14, %v1608_v28  ;;  %1743 = vrot.lane.b32.xlu0 %v4306_v27, %s3728_s13  ;;  %v1850_v57 = vld [vmem:[#allocation3 + $0x18] sm:$0xff] }
 0x194   : > { %1069 = vst.msk [vmem:[#allocation3 + $0xd8] sm:$0xff] %vm1059_vm3, %v1030_v44  ;;  %1293 = vrot.lane.b32.xlu1 %v4295_v53, %s3728_s13 }
 0x195   : > { %1775 = vst.msk [vmem:[#allocation3 + $0xc8] sm:$0xff] %vm1317_vm9, %v1736_v63  ;;  %v1596_v25 = vpop.permute.xlu0 %1595 }
 0x196   : > { %v1159_v41 = vpop.permute.xlu1 %1158 }
 0x197   : > { %1198 = vst.msk [vmem:[#allocation3 + $0xd8] sm:$0xff] %vm1188_vm14, %v1159_v41  ;;  %1488 = vrot.lane.b32.xlu0 %v4287_v49, %s3727_s16 }
 0x198   : > { %1037 = vrot.lane.b32.xlu1 %v4302_v59, %s3727_s16 }
 0x199   : > { %v1724_v47 = vpop.permute.xlu0 %1723 }
 0x19a   : > { %v1276_v16 = vpop.permute.xlu1 %1275 }
 0x19b   : > { %1619 = vrot.lane.b32.xlu0 %v4472_v1, %s3726_s15 }
 0x19c   : > { %1166 = vrot.lane.b32.xlu1 %v4293_v29, %s3726_s15 }
 0x19d   : > { %v1469_v53 = vpop.permute.xlu0 %1468 }
 0x19e   : > { %1513 = vst.msk [vmem:[#allocation3 + $0x50] sm:$0xff] %vm1059_vm3, %v1469_v53  ;;  %v1020_v2 = vpop.permute.xlu1 %1019 }
 0x19f   : > { %1064 = vst.msk [vmem:[#allocation3 + $0x60] sm:$0xff] %vm1059_vm3, %v1020_v2  ;;  %1747 = vrot.lane.b32.xlu0 %v4327_v37, %s3728_s13 }
 0x1a0   : > { %1295 = vrot.lane.b32.xlu1 %v4304_v62, %s3728_s13 }
 0x1a1   : > { %v1594_v59 = vpop.permute.xlu0 %1593 }
 0x1a2   : > { %v1149_v5 = vpop.permute.xlu1 %1148  ;;  %1640 = vst.msk [vmem:[#allocation3 + $0x20] sm:$0xff] %vm1188_vm14, %v1594_v59 }
 0x1a3   : > { %1193 = vst.msk [vmem:[#allocation3 + $0x60] sm:$0xff] %vm1188_vm14, %v1149_v5  ;;  %1617 = vrot.lane.b32.xlu0 %v4336_v36, %s3726_s15 }
 0x1a4   : > { %1039 = vrot.lane.b32.xlu1 %v4306_v27, %s3727_s16  ;;  %v1813_v27 = vld [vmem:[#allocation2 + $0x229] sm:$0xff] }
 0x1a5   : > { %v1722_v29 = vpop.permute.xlu0 %1721  ;;  %v1830_v19 = vpack.c.bf16 %v1814_v40, %v1813_v27 }
 0x1a6   : > { %1768 = vst.msk [vmem:[#allocation3 + $0x20] sm:$0xff] %vm1317_vm9, %v1722_v29  ;;  %v1274_v17 = vpop.permute.xlu1 %1273 }
 0x1a7   : > { %1320 = vst.msk [vmem:[#allocation3 + $0x30] sm:$0xff] %vm1317_vm9, %v1274_v17  ;;  %1745 = vrot.lane.b32.xlu0 %v4340_v26, %s3728_s13 }
 0x1a8   : > { %1168 = vrot.lane.b32.xlu1 %v4287_v49, %s3726_s15  ;;  %v1558_v49 = vld [vmem:[#allocation2 + $0x22f] sm:$0xff]  ;;  %1846 = vst.msk [vmem:[#allocation3 + $0x178] sm:$0xff] %vm807_vm1, %v1830_v19 }
 0x1a9   : > { %v1467_v62 = vpop.permute.xlu0 %1466  ;;  %v1574_v58 = vpack.c.bf16 %v1558_v49, %v1557_v12 }
 0x1aa   : > { %1512 = vst.msk [vmem:[#allocation3 + $0x38] sm:$0xff] %vm1059_vm3, %v1467_v62  ;;  %v1018_v37 = vpop.permute.xlu1 %1017 }
 0x1ab   : > { %1641 = vst.msk [vmem:[#allocation3 + $0x38] sm:$0xff] %vm1188_vm14, %v1596_v25  ;;  %1490 = vrot.lane.b32.xlu0 %v4332_v38, %s3727_s16 }
 0x1ac   : > { %1063 = vst.msk [vmem:[#allocation3 + $0x48] sm:$0xff] %vm1059_vm3, %v1018_v37  ;;  %1297 = vrot.lane.b32.xlu1 %v4336_v36, %s3728_s13  ;;  %v1685_v36 = vld [vmem:[#allocation2 + $0x228] sm:$0xff] }
 0x1ad   : > { %1769 = vst.msk [vmem:[#allocation3 + $0x38] sm:$0xff] %vm1317_vm9, %v1724_v47  ;;  %v1610_v30 = vpop.permute.xlu0 %1609  ;;  %v1851_v48 = vld [vmem:[#allocation3 + $0x20] sm:$0xff]  ;;  %v1702_v50 = vpack.c.bf16 %v1686_v3, %v1685_v36 }
 0x1ae   : > { %1648 = vst.msk [vmem:[#allocation3 + $0xe0] sm:$0xff] %vm1188_vm14, %v1610_v30  ;;  %v1147_v56 = vpop.permute.xlu1 %1146  ;;  %2127 = vmatprep.mubr.bf16.mxu1 %v1851_v48  ;;  %v1853_v42 = vld [vmem:[#allocation3 + $0x30] sm:$0xff] }
 0x1af   : > { %1192 = vst.msk [vmem:[#allocation3 + $0x48] sm:$0xff] %vm1188_vm14, %v1147_v56  ;;  %2128 = vmatmul.mubr.bf16.gmra.mrb[20].mxu1 %v1850_v57  ;;  %1492 = vrot.lane.b32.xlu0 %v4323_v20, %s3727_s16  ;;  %v1894_v20 = vld [vmem:[#allocation3 + $0x178] sm:$0xff]  ;;  %v1872_v56 = vld [vmem:[#allocation3 + $0xc8] sm:$0xff] }
 0x1b0   : > { %1321 = vst.msk [vmem:[#allocation3 + $0x48] sm:$0xff] %vm1317_vm9, %v1276_v16  ;;  %1041 = vrot.lane.b32.xlu1 %v4340_v26, %s3727_s16  ;;  %3618 = vmatmul.mubr.msk.bf16.gmra.mrb[44].mxu0 %vm807_vm1, %v1894_v20 }
 0x1b1   : > { %v1600_v4 = vpop.permute.xlu0 %1599 }
 0x1b2   : > { %v1280_v52 = vpop.permute.xlu1 %1279 }
 0x1b3   : > { %1621 = vrot.lane.b32.xlu0 %v1574_v58, %s3726_s15 }
 0x1b4   : > { %v1854_v55 = vld [vmem:[#allocation3 + $0x38] sm:$0xff]  ;;  %1170 = vrot.lane.b32.xlu1 %v4332_v38, %s3726_s15 }
 0x1b5   : > { %2135 = vmatprep.mubr.bf16.mxu1 %v1854_v55  ;;  %v1728_v6 = vpop.permute.xlu0 %1727 }
 0x1b6   : > { %v1024_v11 = vpop.permute.xlu1 %1023 }
 0x1b7   : > { %1066 = vst.msk [vmem:[#allocation3 + $0x90] sm:$0xff] %vm1059_vm3, %v1024_v11  ;;  %2136 = vmatmul.mubr.bf16.gmra.mrb[24].mxu1 %v1853_v42  ;;  %1749 = vrot.lane.b32.xlu0 %v1702_v50, %s3728_s13  ;;  %v1856_v34 = vld [vmem:[#allocation3 + $0x48] sm:$0xff] }
 0x1b8   : > { %1299 = vrot.lane.b32.xlu1 %v4472_v1, %s3728_s13 }
 0x1b9   : > { %v1473_v26 = vpop.permute.xlu0 %1472 }
 0x1ba   : > { %1515 = vst.msk [vmem:[#allocation3 + $0x80] sm:$0xff] %vm1059_vm3, %v1473_v26  ;;  %v1153_v18 = vpop.permute.xlu1 %1152 }
 0x1bb   : > { %1195 = vst.msk [vmem:[#allocation3 + $0x90] sm:$0xff] %vm1188_vm14, %v1153_v18 }
 0x1bd   : > { %v1598_v38 = vpop.permute.xlu0 %1597 }
 0x1be   : > { %1642 = vst.msk [vmem:[#allocation3 + $0x50] sm:$0xff] %vm1188_vm14, %v1598_v38  ;;  %v1278_v61 = vpop.permute.xlu1 %1277 }
 0x1bf   : > { %1322 = vst.msk [vmem:[#allocation3 + $0x60] sm:$0xff] %vm1317_vm9, %v1278_v61 }
 0x1c1   : > { %v1726_v10 = vpop.permute.xlu0 %1725 }
 0x1c2   : > { %1770 = vst.msk [vmem:[#allocation3 + $0x50] sm:$0xff] %vm1317_vm9, %v1726_v10  ;;  %v1022_v0 = vpop.permute.xlu1 %1021 }
 0x1c3   : > { %1065 = vst.msk [vmem:[#allocation3 + $0x78] sm:$0xff] %vm1059_vm3, %v1022_v0 }
 0x1c5   : > { %v1471_v13 = vpop.permute.xlu0 %1470 }
 0x1c6   : > { %1514 = vst.msk [vmem:[#allocation3 + $0x68] sm:$0xff] %vm1059_vm3, %v1471_v13  ;;  %v1151_v24 = vpop.permute.xlu1 %1150  ;;  %v1859_v8 = vld [vmem:[#allocation3 + $0x60] sm:$0xff] }
 0x1c7   : > { %1643 = vst.msk [vmem:[#allocation3 + $0x68] sm:$0xff] %vm1188_vm14, %v1600_v4  ;;  %1194 = vst.msk [vmem:[#allocation3 + $0x78] sm:$0xff] %vm1188_vm14, %v1151_v24 }
 0x1c8   : > { %1771 = vst.msk [vmem:[#allocation3 + $0x68] sm:$0xff] %vm1317_vm9, %v1728_v6  ;;  %1323 = vst.msk [vmem:[#allocation3 + $0x78] sm:$0xff] %vm1317_vm9, %v1280_v52 }
 0x1c9   : > { %v1604_v46 = vpop.permute.xlu0 %1603  ;;  %v1857_v14 = vld [vmem:[#allocation3 + $0x50] sm:$0xff] }
 0x1ca   : > { %v1284_v28 = vpop.permute.xlu1 %1283  ;;  %2143 = vmatprep.mubr.bf16.mxu1 %v1857_v14 }
 0x1cb   : > { %2144 = vmatmul.mubr.bf16.gmra.mrb[28].mxu1 %v1856_v34 }
 0x1cd   : > { %v1732_v63 = vpop.permute.xlu0 %1731 }
 0x1ce   : > { %v1028_v15 = vpop.permute.xlu1 %1027 }
 0x1cf   : > { %1068 = vst.msk [vmem:[#allocation3 + $0xc0] sm:$0xff] %vm1059_vm3, %v1028_v15  ;;  %v1860_v51 = vld [vmem:[#allocation3 + $0x68] sm:$0xff]  ;;  %v1862_v41 = vld [vmem:[#allocation3 + $0x78] sm:$0xff] }
 0x1d0   : > { %2151 = vmatprep.mubr.bf16.mxu1 %v1860_v51 }
 0x1d1   : > { %v1477_v21 = vpop.permute.xlu0 %1476 }
 0x1d2   : > { %1517 = vst.msk [vmem:[#allocation3 + $0xb0] sm:$0xff] %vm1059_vm3, %v1477_v21  ;;  %v1157_v32 = vpop.permute.xlu1 %1156 }
 0x1d3   : > { %1646 = vst.msk [vmem:[#allocation3 + $0xb0] sm:$0xff] %vm1188_vm14, %v4443_v7  ;;  %1197 = vst.msk [vmem:[#allocation3 + $0xc0] sm:$0xff] %vm1188_vm14, %v1157_v32  ;;  %2152 = vmatmul.mubr.bf16.gmra.mrb[32].mxu1 %v1859_v8 }
 0x1d4   : > { %1774 = vst.msk [vmem:[#allocation3 + $0xb0] sm:$0xff] %vm1317_vm9, %v4451_v60  ;;  %1326 = vst.msk [vmem:[#allocation3 + $0xc0] sm:$0xff] %vm1317_vm9, %v4453_v22 }
 0x1d5   : > { %v1602_v39 = vpop.permute.xlu0 %1601 }
 0x1d6   : > { %v1288_v9 = vpop.permute.xlu1 %1287  ;;  %1644 = vst.msk [vmem:[#allocation3 + $0x80] sm:$0xff] %vm1188_vm14, %v1602_v39 }
 0x1d7   : > { %1327 = vst.msk [vmem:[#allocation3 + $0xd8] sm:$0xff] %vm1317_vm9, %v1288_v9 }
 0x1d9   : > { %v1730_v43 = vpop.permute.xlu0 %1729 }
 0x1da   : > { %v1032_v54 = vpop.permute.xlu1 %1031  ;;  %1772 = vst.msk [vmem:[#allocation3 + $0x80] sm:$0xff] %vm1317_vm9, %v1730_v43 }
 0x1db   : > { %1070 = vst.msk [vmem:[#allocation3 + $0xf0] sm:$0xff] %vm1059_vm3, %v1032_v54  ;;  %v1869_v17 = vld [vmem:[#allocation3 + $0xb0] sm:$0xff]  ;;  %v1871_v6 = vld [vmem:[#allocation3 + $0xc0] sm:$0xff] }
 0x1dd   : > { %v1475_v7 = vpop.permute.xlu0 %1474 }
 0x1de   : > { %1516 = vst.msk [vmem:[#allocation3 + $0x98] sm:$0xff] %vm1059_vm3, %v1475_v7  ;;  %v1282_v44 = vpop.permute.xlu1 %1281  ;;  %v1874_v13 = vld [vmem:[#allocation3 + $0xd8] sm:$0xff] }
 0x1df   : > { %1645 = vst.msk [vmem:[#allocation3 + $0x98] sm:$0xff] %vm1188_vm14, %v1604_v46 }
 0x1e0   : > { %1324 = vst.msk [vmem:[#allocation3 + $0x90] sm:$0xff] %vm1317_vm9, %v1282_v44  ;;  %1773 = vst.msk [vmem:[#allocation3 + $0x98] sm:$0xff] %vm1317_vm9, %v1732_v63 }
 0x1e1   : > { %v1738_v60 = vpop.permute.xlu0 %1737  ;;  %v1863_v22 = vld [vmem:[#allocation3 + $0x80] sm:$0xff] }
 0x1e2   : > { %1776 = vst.msk [vmem:[#allocation3 + $0xe0] sm:$0xff] %vm1317_vm9, %v1738_v60  ;;  %v1026_v25 = vpop.permute.xlu1 %1025  ;;  %2159 = vmatprep.mubr.bf16.mxu1 %v1863_v22 }
 0x1e3   : > { %1067 = vst.msk [vmem:[#allocation3 + $0xa8] sm:$0xff] %vm1059_vm3, %v1026_v25  ;;  %2160 = vmatmul.mubr.bf16.gmra.mrb[36].mxu1 %v1862_v41 }
 0x1e5   : > { %v1483_v23 = vpop.permute.xlu0 %1482  ;;  %v4550_v45 = vpop.f32.mrb[16].mxu0 }
 0x1e6   : > { %1520 = vst.msk [vmem:[#allocation3 + $0xf8] sm:$0xff] %vm1059_vm3, %v1483_v23  ;;  %v1155_v47 = vpop.permute.xlu1 %1154  ;;  %v4553_v1 = vpop.f32.mrb[17].mxu0  ;;  %v3715_v23 = vld [vmem:[%s4998_s3] sm:$0xff]  }
 0x1e7   : > { %1196 = vst.msk [vmem:[#allocation3 + $0xa8] sm:$0xff] %vm1188_vm14, %v1155_v47  ;;  %v1866_v16 = vld [vmem:[#allocation3 + $0x98] sm:$0xff]  ;;  %v4556_v53 = vpop.f32.mrb[18].mxu0  ;;  %v1865_v29 = vld [vmem:[#allocation3 + $0x90] sm:$0xff]  ;;  %3621 = vmatprep.subr.bf16.mxu0 %v3715_v23 }
 0x1e8   : > { %1325 = vst.msk [vmem:[#allocation3 + $0xa8] sm:$0xff] %vm1317_vm9, %v1284_v28  ;;  %2167 = vmatprep.mubr.bf16.mxu1 %v1866_v16  ;;  %v4559_v2 = vpop.f32.mrb[19].mxu0  ;;  %3622 = vmatpush3.bf16.msra.mxu0 %v3715_v23 }
 0x1e9   : > { %v1612_v59 = vpop.permute.xlu0 %1611  ;;  %v1875_v20 = vld [vmem:[#allocation3 + $0xe0] sm:$0xff] }
 0x1ea   : > { %1649 = vst.msk [vmem:[#allocation3 + $0xf8] sm:$0xff] %vm1188_vm14, %v1612_v59  ;;  %v1161_v5 = vpop.permute.xlu1 %1160 }
 0x1eb   : > { %1199 = vst.msk [vmem:[#allocation3 + $0xf0] sm:$0xff] %vm1188_vm14, %v1161_v5  ;;  %2168 = vmatmul.mubr.bf16.gmra.mrb[40].mxu1 %v1865_v29 }
 0x1ec   : > { %2175 = vmatprep.mubr.bf16.mxu1 %v1869_v17  ;;  %v3716_v17 = vld [vmem:[%s4998_s3 + $0x8] sm:$0xff]  }
 0x1ed   : > { %v1740_v62 = vpop.permute.xlu0 %1739  ;;  %v4563_v37 = vpop.f32.mrb[20].mxu0  ;;  %3623 = vmatprep.subr.bf16.mxu0 %v3716_v17 }
 0x1ee   : > { %1777 = vst.msk [vmem:[#allocation3 + $0xf8] sm:$0xff] %vm1317_vm9, %v1740_v62  ;;  %v1290_v27 = vpop.permute.xlu1 %1289  ;;  %v4566_v40 = vpop.f32.mrb[21].mxu0  ;;  %3624 = vmatpush3.bf16.msra.mxu0 %v3716_v17 }
 0x1ef   : > { %1328 = vst.msk [vmem:[#allocation3 + $0xf0] sm:$0xff] %vm1317_vm9, %v1290_v27  ;;  %v4569_v12 = vpop.f32.mrb[22].mxu0  ;;  %v1868_v48 = vld [vmem:[#allocation3 + $0xa8] sm:$0xff] }
 0x1f0   : > { %v4571_v49 = vpop.f32.mrb[23].mxu0 }
 0x1f1   : > { %v1485_v19 = vpop.permute.xlu0 %1484 }
 0x1f2   : > { %1521 = vst.msk [vmem:[#allocation3 + $0x110] sm:$0xff] %vm1059_vm3, %v1485_v19  ;;  %v1034_v30 = vpop.permute.xlu1 %1033 }
 0x1f3   : > { %1071 = vst.msk [vmem:[#allocation3 + $0x108] sm:$0xff] %vm1059_vm3, %v1034_v30  ;;  %2176 = vmatmul.mubr.bf16.gmra.mrb[44].mxu1 %v1868_v48 }
 0x1f4   : > { %2183 = vmatprep.mubr.bf16.mxu1 %v1872_v56 }
 0x1f5   : > { %v1614_v57 = vpop.permute.xlu0 %1613  ;;  %v1878_v24 = vld [vmem:[#allocation3 + $0xf8] sm:$0xff] }
 0x1f6   : > { %v4575_v58 = vpop.f32.mrb[24].mxu0  ;;  %1650 = vst.msk [vmem:[#allocation3 + $0x110] sm:$0xff] %vm1188_vm14, %v1614_v57  ;;  %v1163_v36 = vpop.permute.xlu1 %1162  ;;  %v1877_v32 = vld [vmem:[#allocation3 + $0xf0] sm:$0xff] }
 0x1f7   : > { %v4578_v3 = vpop.f32.mrb[25].mxu0  ;;  %1200 = vst.msk [vmem:[#allocation3 + $0x108] sm:$0xff] %vm1188_vm14, %v1163_v36 }
 0x1f8   : > { %v4581_v4 = vpop.f32.mrb[26].mxu0 }
 0x1f9   : > { %v4583_v52 = vpop.f32.mrb[27].mxu0  ;;  %v1742_v55 = vpop.permute.xlu0 %1741 }
 0x1fa   : > { %1778 = vst.msk [vmem:[#allocation3 + $0x110] sm:$0xff] %vm1317_vm9, %v1742_v55  ;;  %v1292_v50 = vpop.permute.xlu1 %1291 }
 0x1fb   : > { %1329 = vst.msk [vmem:[#allocation3 + $0x108] sm:$0xff] %vm1317_vm9, %v1292_v50  ;;  %2184 = vmatmul.mubr.bf16.gmra.mrb[48].mxu1 %v1871_v6 }
 0x1fc   : > { %2191 = vmatprep.mubr.bf16.mxu1 %v1875_v20 }
 0x1fd   : > { %v1487_v42 = vpop.permute.xlu0 %1486 }
 0x1fe   : > { %v4587_v11 = vpop.f32.mrb[28].mxu0  ;;  %1522 = vst.msk [vmem:[#allocation3 + $0x128] sm:$0xff] %vm1059_vm3, %v1487_v42  ;;  %v1036_v18 = vpop.permute.xlu1 %1035 }
 0x1ff   : > { %v4589_v26 = vpop.f32.mrb[29].mxu0  ;;  %1072 = vst.msk [vmem:[#allocation3 + $0x120] sm:$0xff] %vm1059_vm3, %v1036_v18 }
 0x200   : > { %v4592_v38 = vpop.f32.mrb[30].mxu0 }
 0x201   : > { %v4595_v61 = vpop.f32.mrb[31].mxu0  ;;  %v1616_v10 = vpop.permute.xlu0 %1615  ;;  %v1881_v8 = vld [vmem:[#allocation3 + $0x110] sm:$0xff] }
 0x202   : > { %1651 = vst.msk [vmem:[#allocation3 + $0x128] sm:$0xff] %vm1188_vm14, %v1616_v10  ;;  %v1165_v0 = vpop.permute.xlu1 %1164  ;;  %v1880_v25 = vld [vmem:[#allocation3 + $0x108] sm:$0xff] }
 0x203   : > { %1201 = vst.msk [vmem:[#allocation3 + $0x120] sm:$0xff] %vm1188_vm14, %v1165_v0  ;;  %2192 = vmatmul.mubr.bf16.gmra.mrb[52].mxu1 %v1874_v13 }
 0x204   : > { %2199 = vmatprep.mubr.bf16.mxu1 %v1878_v24 }
 0x205   : > { %v1744_v46 = vpop.permute.xlu0 %1743 }
 0x206   : > { %v4599_v14 = vpop.f32.mrb[32].mxu0  ;;  %1779 = vst.msk [vmem:[#allocation3 + $0x128] sm:$0xff] %vm1317_vm9, %v1744_v46  ;;  %v1294_v28 = vpop.permute.xlu1 %1293  ;;  %v2409_v46 = vld [vmem:[%s5000_s5] sm:$0x7] }
 0x207   : > { %v4602_v34 = vpop.f32.mrb[33].mxu0  ;;  %1330 = vst.msk [vmem:[#allocation3 + $0x120] sm:$0xff] %vm1317_vm9, %v1294_v28 }
 0x208   : > { %v4605_v63 = vpop.f32.mrb[34].mxu0 }
 0x209   : > { %v4607_v15 = vpop.f32.mrb[35].mxu0  ;;  %v1489_v51 = vpop.permute.xlu0 %1488 }
 0x20a   : > { %1523 = vst.msk [vmem:[#allocation3 + $0x140] sm:$0xff] %vm1059_vm3, %v1489_v51  ;;  %v1038_v21 = vpop.permute.xlu1 %1037 }
 0x20b   : > { %1073 = vst.msk [vmem:[#allocation3 + $0x138] sm:$0xff] %vm1059_vm3, %v1038_v21  ;;  %2200 = vmatmul.mubr.bf16.gmra.mrb[56].mxu1 %v1877_v32  ;;  %v4653_v32 = vrot.slane %v2409_v46, %v3879_v31 }
 0x20c   : > { %2207 = vmatprep.mubr.bf16.mxu1 %v1881_v8 }
 0x20d   : > { %v1620_v39 = vpop.permute.xlu0 %1619  ;;  %v1884_v41 = vld [vmem:[#allocation3 + $0x128] sm:$0xff] }
 0x20e   : > { %v4611_v9 = vpop.f32.mrb[36].mxu0  ;;  %v1167_v43 = vpop.permute.xlu1 %1166  ;;  %v1883_v30 = vld [vmem:[#allocation3 + $0x120] sm:$0xff] }
 0x20f   : > { %v4613_v54 = vpop.f32.mrb[37].mxu0  ;;  %1202 = vst.msk [vmem:[#allocation3 + $0x138] sm:$0xff] %vm1188_vm14, %v1167_v43 }
 0x210   : > { %v4616_v7 = vpop.f32.mrb[38].mxu0 }
 0x211   : > { %v4618_v44 = vpop.f32.mrb[39].mxu0  ;;  %v1748_v60 = vpop.permute.xlu0 %1747 }
 0x212   : > { %v1296_v22 = vpop.permute.xlu1 %1295 }
 0x213   : > { %1331 = vst.msk [vmem:[#allocation3 + $0x138] sm:$0xff] %vm1317_vm9, %v1296_v22  ;;  %2208 = vmatmul.mubr.bf16.gmra.mrb[60].mxu1 %v1880_v25 }
 0x214   : > { %2215 = vmatprep.mubr.bf16.mxu1 %v1884_v41  ;;  %v4661_v41 = vrot.slane %v2409_v46, %v3889_v35 }
 0x215   : > { %v1618_v47 = vpop.permute.xlu0 %1617 }
 0x216   : > { %v4624_v16 = vpop.f32.mrb[40].mxu0  ;;  %1652 = vst.msk [vmem:[#allocation3 + $0x140] sm:$0xff] %vm1188_vm14, %v1618_v47  ;;  %v1040_v59 = vpop.permute.xlu1 %1039 }
 0x217   : > { %v4627_v5 = vpop.f32.mrb[41].mxu0  ;;  %1074 = vst.msk [vmem:[#allocation3 + $0x150] sm:$0xff] %vm1059_vm3, %v1040_v59 }
 0x218   : > { %v4630_v29 = vpop.f32.mrb[42].mxu0 }
 0x219   : > { %v4635_v62 = vpop.f32.mrb[43].mxu0  ;;  %v1746_v27 = vpop.permute.xlu0 %1745 }
 0x21a   : > { %1780 = vst.msk [vmem:[#allocation3 + $0x140] sm:$0xff] %vm1317_vm9, %v1746_v27  ;;  %v1169_v19 = vpop.permute.xlu1 %1168  ;;  %v1886_v50 = vld [vmem:[#allocation3 + $0x138] sm:$0xff] }
 0x21b   : > { %1203 = vst.msk [vmem:[#allocation3 + $0x150] sm:$0xff] %vm1188_vm14, %v1169_v19  ;;  %2216 = vmatmul.mubr.bf16.gmra.mrb[64].mxu1 %v1883_v30 }
 0x21d   : > { %v1491_v48 = vpop.permute.xlu0 %1490 }
 0x21e   : > { %1524 = vst.msk [vmem:[#allocation3 + $0x158] sm:$0xff] %vm1059_vm3, %v1491_v48  ;;  %v1298_v56 = vpop.permute.xlu1 %1297 }
 0x21f   : > { %1653 = vst.msk [vmem:[#allocation3 + $0x158] sm:$0xff] %vm1188_vm14, %v1620_v39 }
 0x220   : > { %1332 = vst.msk [vmem:[#allocation3 + $0x150] sm:$0xff] %vm1317_vm9, %v1298_v56  ;;  %1781 = vst.msk [vmem:[#allocation3 + $0x158] sm:$0xff] %vm1317_vm9, %v1748_v60  ;;  %v4657_v60 = vrot.slane %v2409_v46, %v3884_v33 }
 0x221   : > { %v1493_v57 = vpop.permute.xlu0 %1492  ;;  %v1887_v36 = vld [vmem:[#allocation3 + $0x140] sm:$0xff] }
 0x222   : > { %1525 = vst.msk [vmem:[#allocation3 + $0x170] sm:$0xff] %vm1059_vm3, %v1493_v57  ;;  %v1042_v55 = vpop.permute.xlu1 %1041  ;;  %2223 = vmatprep.mubr.bf16.mxu1 %v1887_v36 }
 0x223   : > { %1075 = vst.msk [vmem:[#allocation3 + $0x168] sm:$0xff] %vm1059_vm3, %v1042_v55  ;;  %2224 = vmatmul.mubr.bf16.gmra.mrb[68].mxu1 %v1886_v50 }
 0x225   : > { %v1622_v6 = vpop.permute.xlu0 %1621 }
 0x226   : > { %1654 = vst.msk [vmem:[#allocation3 + $0x170] sm:$0xff] %vm1188_vm14, %v1622_v6  ;;  %v1171_v20 = vpop.permute.xlu1 %1170 }
 0x227   : > { %1204 = vst.msk [vmem:[#allocation3 + $0x168] sm:$0xff] %vm1188_vm14, %v1171_v20  ;;  %v1890_v42 = vld [vmem:[#allocation3 + $0x158] sm:$0xff]  ;;  %v1889_v0 = vld [vmem:[#allocation3 + $0x150] sm:$0xff] }
 0x228   : > { %2231 = vmatprep.mubr.bf16.mxu1 %v1890_v42 }
 0x229   : > { %v1750_v18 = vpop.permute.xlu0 %1749 }
 0x22a   : > { %1782 = vst.msk [vmem:[#allocation3 + $0x170] sm:$0xff] %vm1317_vm9, %v1750_v18  ;;  %v1300_v10 = vpop.permute.xlu1 %1299 }
 0x22b   : > { %1333 = vst.msk [vmem:[#allocation3 + $0x168] sm:$0xff] %vm1317_vm9, %v1300_v10  ;;  %2232 = vmatmul.mubr.bf16.gmra.mrb[72].mxu1 %v1889_v0 }
 0x231   : > { %v1893_v13 = vld [vmem:[#allocation3 + $0x170] sm:$0xff] }
 0x232   : > { %2239 = vmatprep.mubr.bf16.mxu1 %v1893_v13  ;;  %v1892_v24 = vld [vmem:[#allocation3 + $0x168] sm:$0xff] }
 0x233   : > { %2240 = vmatmul.mubr.bf16.gmra.mrb[76].mxu1 %v1892_v24 }
 0x265   : > { %v3413_v28 = vpop.f32.mrb[16].mxu1 }
 0x266   : > { %v3414_v51 = vpop.f32.mrb[17].mxu1 }
 0x267   : > { %v3415_v21 = vadd.f32 %v3414_v51, %v3413_v28  ;;  %v3416_v8 = vpop.f32.mrb[18].mxu1 }
 0x268   : > { %v3417_v39 = vpop.f32.mrb[19].mxu1 }
 0x269   : > { %v2283_v43 = vadd.f32 %v3415_v21, %v4553_v1  ;;  %v3418_v22 = vadd.f32 %v3417_v39, %v3416_v8 }
 0x26b   : > { %v2414_v25 = vmul.f32 %v4653_v32, %v2283_v43  ;;  %v2286_v23 = vadd.f32 %v3418_v22, %v4559_v2 }
 0x26d   : > { %v2450_v47 = vadd.f32 %v4657_v60, %v2414_v25  ;;  %v2415_v59 = vmul.f32 %v4653_v32, %v2286_v23 }
 0x26f   : > { %v2518_v17 = vmul.f32 %v4661_v41, %v2450_v47  ;;  %v2451_v27 = vadd.f32 %v4657_v60, %v2415_v59  ;;  %vm2482_vm3 = vcmp.ge.f32.partialorder %v2450_v47, 0.0 }
 0x271   : > { %v2519_v1 = vmul.f32 %v4661_v41, %v2451_v27  ;;  %vm2483_vm10 = vcmp.ge.f32.partialorder %v2451_v27, 0.0  ;;  %v2550_v19 = vsel %vm2482_vm3, %v2450_v47, %v2518_v17 }
 0x273   : > { %v2551_v30 = vsel %vm2483_vm10, %v2451_v27, %v2519_v1 }
 0x274   : > { %v2582_v48 = vpack.c.bf16 %v2551_v30, %v2550_v19 }
 0x276   : > { %3625 = vmatprep.mubr.msk.bf16.mxu0 %vm807_vm1, %v2582_v48 }
 0x282   : > { %v3419_v56 = vpop.f32.mrb[20].mxu1 }
 0x283   : > { %v3420_v57 = vpop.f32.mrb[21].mxu1  ;;  %v4673_v18 = vpop.f32.mrb[44].mxu0 }
 0x284   : > { %v3421_v2 = vadd.f32 %v3420_v57, %v3419_v56  ;;  %v3422_v36 = vpop.f32.mrb[22].mxu1  ;;  %v4677_v24 = vpop.f32.mrb[45].mxu0 }
 0x285   : > { %v3423_v55 = vpop.f32.mrb[23].mxu1  ;;  %v4679_v28 = vpop.f32.mrb[46].mxu0 }
 0x286   : > { %v2291_v50 = vadd.f32 %v4550_v45, %v3421_v2  ;;  %v3424_v6 = vadd.f32 %v3423_v55, %v3422_v36  ;;  %v4683_v39 = vpop.f32.mrb[47].mxu0 }
 0x288   : > { %v2416_v20 = vmul.f32 %v4653_v32, %v2291_v50  ;;  %v2294_v42 = vadd.f32 %v4556_v53, %v3424_v6 }
 0x28a   : > { %v2452_v10 = vadd.f32 %v4657_v60, %v2416_v20  ;;  %v2417_v0 = vmul.f32 %v4653_v32, %v2294_v42  ;;  %v3425_v13 = vpop.f32.mrb[24].mxu1 }
 0x28b   : > { %v3426_v46 = vpop.f32.mrb[25].mxu1 }
 0x28c   : > { %v2520_v51 = vmul.f32 %v4661_v41, %v2452_v10  ;;  %v2453_v45 = vadd.f32 %v4657_v60, %v2417_v0  ;;  %v3427_v21 = vadd.f32 %v3426_v46, %v3425_v13  ;;  %v3428_v8 = vpop.f32.mrb[26].mxu1  ;;  %vm2484_vm11 = vcmp.ge.f32.partialorder %v2452_v10, 0.0 }
 0x28d   : > { %v3429_v53 = vpop.f32.mrb[27].mxu1 }
 0x28e   : > { %vm2485_vm12 = vcmp.ge.f32.partialorder %v2453_v45, 0.0  ;;  %v2521_v43 = vmul.f32 %v4661_v41, %v2453_v45  ;;  %v2299_v22 = vadd.f32 %v3427_v21, %v4566_v40  ;;  %v3430_v25 = vadd.f32 %v3429_v53, %v3428_v8 }
 0x28f   : > { %v2552_v23 = vsel %vm2484_vm11, %v2452_v10, %v2520_v51 }
 0x290   : > { %v2553_v47 = vsel %vm2485_vm12, %v2453_v45, %v2521_v43  ;;  %v2418_v59 = vmul.f32 %v4653_v32, %v2299_v22  ;;  %v2302_v27 = vadd.f32 %v3430_v25, %v4571_v49 }
 0x291   : > { %v2583_v17 = vpack.c.bf16 %v2553_v47, %v2552_v23 }
 0x292   : > { %v2454_v1 = vadd.f32 %v4657_v60, %v2418_v59  ;;  %v2419_v19 = vmul.f32 %v4653_v32, %v2302_v27 }
 0x293   : > { %3626 = vmatmul.mubr.msk.bf16.vlgmr.msra.gmra.mrb[48].mxu0 %vm807_vm1, %v2583_v17 }
 0x294   : > { %v2522_v30 = vmul.f32 %v4661_v41, %v2454_v1  ;;  %v2455_v48 = vadd.f32 %v4657_v60, %v2419_v19  ;;  %vm2486_vm13 = vcmp.ge.f32.partialorder %v2454_v1, 0.0 }
 0x296   : > { %v2523_v40 = vmul.f32 %v4661_v41, %v2455_v48  ;;  %vm2487_vm14 = vcmp.ge.f32.partialorder %v2455_v48, 0.0  ;;  %v2554_v56 = vsel %vm2486_vm13, %v2454_v1, %v2522_v30 }
 0x298   : > { %v2555_v57 = vsel %vm2487_vm14, %v2455_v48, %v2523_v40 }
 0x299   : > { %v2584_v2 = vpack.c.bf16 %v2555_v57, %v2554_v56 }
 0x29b   : > { %3629 = vmatprep.mubr.msk.bf16.mxu0 %vm807_vm1, %v2584_v2 }
 0x29e   : > { %v3431_v49 = vpop.f32.mrb[28].mxu1 }
 0x29f   : > { %v3432_v36 = vpop.f32.mrb[29].mxu1 }
 0x2a0   : > { %v3433_v55 = vadd.f32 %v3432_v36, %v3431_v49  ;;  %v3434_v50 = vpop.f32.mrb[30].mxu1 }
 0x2a1   : > { %v3435_v6 = vpop.f32.mrb[31].mxu1 }
 0x2a2   : > { %v2307_v20 = vadd.f32 %v4563_v37, %v3433_v55  ;;  %v3436_v42 = vadd.f32 %v3435_v6, %v3434_v50 }
 0x2a4   : > { %v2420_v10 = vmul.f32 %v4653_v32, %v2307_v20  ;;  %v2310_v0 = vadd.f32 %v4569_v12, %v3436_v42 }
 0x2a6   : > { %v2456_v13 = vadd.f32 %v4657_v60, %v2420_v10  ;;  %v2421_v46 = vmul.f32 %v4653_v32, %v2310_v0  ;;  %v3437_v51 = vpop.f32.mrb[32].mxu1 }
 0x2a7   : > { %v3438_v45 = vpop.f32.mrb[33].mxu1 }
 0x2a8   : > { %v2524_v21 = vmul.f32 %v4661_v41, %v2456_v13  ;;  %v2457_v8 = vadd.f32 %v4657_v60, %v2421_v46  ;;  %v3439_v53 = vadd.f32 %v3438_v45, %v3437_v51  ;;  %v3440_v43 = vpop.f32.mrb[34].mxu1  ;;  %vm2488_vm15 = vcmp.ge.f32.partialorder %v2456_v13, 0.0 }
 0x2a9   : > { %v3441_v22 = vpop.f32.mrb[35].mxu1 }
 0x2aa   : > { %v2525_v37 = vmul.f32 %v4661_v41, %v2457_v8  ;;  %v2315_v25 = vadd.f32 %v3439_v53, %v4578_v3  ;;  %v3442_v23 = vadd.f32 %v3441_v22, %v3440_v43  ;;  %vm2489_vm0 = vcmp.ge.f32.partialorder %v2457_v8, 0.0 }
 0x2ab   : > { %v2556_v59 = vsel %vm2488_vm15, %v2456_v13, %v2524_v21 }
 0x2ac   : > { %v2422_v12 = vmul.f32 %v4653_v32, %v2315_v25  ;;  %v2318_v47 = vadd.f32 %v3442_v23, %v4583_v52  ;;  %v2557_v17 = vsel %vm2489_vm0, %v2457_v8, %v2525_v37 }
 0x2ad   : > { %v2585_v27 = vpack.c.bf16 %v2557_v17, %v2556_v59 }
 0x2ae   : > { %v2458_v1 = vadd.f32 %v4657_v60, %v2422_v12  ;;  %v2423_v19 = vmul.f32 %v4653_v32, %v2318_v47 }
 0x2af   : > { %3630 = vmatmul.mubr.msk.bf16.gmra.mrb[52].mxu0 %vm807_vm1, %v2585_v27 }
 0x2b0   : > { %v2526_v30 = vmul.f32 %v4661_v41, %v2458_v1  ;;  %v2459_v48 = vadd.f32 %v4657_v60, %v2423_v19  ;;  %vm2490_vm2 = vcmp.ge.f32.partialorder %v2458_v1, 0.0 }
 0x2b2   : > { %v2527_v3 = vmul.f32 %v4661_v41, %v2459_v48  ;;  %vm2491_vm4 = vcmp.ge.f32.partialorder %v2459_v48, 0.0  ;;  %v2558_v40 = vsel %vm2490_vm2, %v2458_v1, %v2526_v30 }
 0x2b4   : > { %v2559_v56 = vsel %vm2491_vm4, %v2459_v48, %v2527_v3 }
 0x2b5   : > { %v2586_v52 = vpack.c.bf16 %v2559_v56, %v2558_v40 }
 0x2b6   : > { %v3443_v57 = vpop.f32.mrb[36].mxu1 }
 0x2b7   : > { %v3444_v2 = vpop.f32.mrb[37].mxu1  ;;  %3633 = vmatprep.mubr.msk.bf16.mxu0 %vm807_vm1, %v2586_v52 }
 0x2b8   : > { %v3445_v49 = vadd.f32 %v3444_v2, %v3443_v57  ;;  %v3446_v36 = vpop.f32.mrb[38].mxu1 }
 0x2b9   : > { %v3447_v55 = vpop.f32.mrb[39].mxu1 }
 0x2ba   : > { %v2323_v50 = vadd.f32 %v4575_v58, %v3445_v49  ;;  %v3448_v6 = vadd.f32 %v3447_v55, %v3446_v36 }
 0x2bc   : > { %v2424_v20 = vmul.f32 %v4653_v32, %v2323_v50  ;;  %v2326_v42 = vadd.f32 %v4581_v4, %v3448_v6 }
 0x2be   : > { %v2460_v10 = vadd.f32 %v4657_v60, %v2424_v20  ;;  %v2425_v0 = vmul.f32 %v4653_v32, %v2326_v42  ;;  %v3449_v13 = vpop.f32.mrb[40].mxu1 }
 0x2bf   : > { %v3450_v46 = vpop.f32.mrb[41].mxu1 }
 0x2c0   : > { %v2528_v51 = vmul.f32 %v4661_v41, %v2460_v10  ;;  %v2461_v45 = vadd.f32 %v4657_v60, %v2425_v0  ;;  %v3451_v21 = vadd.f32 %v3450_v46, %v3449_v13  ;;  %v3452_v8 = vpop.f32.mrb[42].mxu1  ;;  %vm2492_vm5 = vcmp.ge.f32.partialorder %v2460_v10, 0.0 }
 0x2c1   : > { %v3453_v53 = vpop.f32.mrb[43].mxu1 }
 0x2c2   : > { %v2529_v58 = vmul.f32 %v4661_v41, %v2461_v45  ;;  %v2331_v43 = vadd.f32 %v3451_v21, %v4589_v26  ;;  %v3454_v22 = vadd.f32 %v3453_v53, %v3452_v8  ;;  %vm2493_vm6 = vcmp.ge.f32.partialorder %v2461_v45, 0.0 }
 0x2c3   : > { %v2560_v25 = vsel %vm2492_vm5, %v2460_v10, %v2528_v51 }
 0x2c4   : > { %v2426_v4 = vmul.f32 %v4653_v32, %v2331_v43  ;;  %v2334_v37 = vadd.f32 %v3454_v22, %v4595_v61  ;;  %v2561_v23 = vsel %vm2493_vm6, %v2461_v45, %v2529_v58 }
 0x2c5   : > { %v2587_v12 = vpack.c.bf16 %v2561_v23, %v2560_v25 }
 0x2c6   : > { %v2462_v47 = vadd.f32 %v4657_v60, %v2426_v4  ;;  %v2427_v59 = vmul.f32 %v4653_v32, %v2334_v37  ;;  %v3455_v17 = vpop.f32.mrb[44].mxu1 }
 0x2c7   : > { %v3456_v27 = vpop.f32.mrb[45].mxu1  ;;  %3634 = vmatmul.mubr.msk.bf16.gmra.mrb[56].mxu0 %vm807_vm1, %v2587_v12 }
 0x2c8   : > { %v2530_v1 = vmul.f32 %v4661_v41, %v2462_v47  ;;  %v2463_v26 = vadd.f32 %v4657_v60, %v2427_v59  ;;  %v3457_v19 = vadd.f32 %v3456_v27, %v3455_v17  ;;  %v3458_v30 = vpop.f32.mrb[46].mxu1  ;;  %vm2494_vm7 = vcmp.ge.f32.partialorder %v2462_v47, 0.0 }
 0x2c9   : > { %v3459_v48 = vpop.f32.mrb[47].mxu1 }
 0x2ca   : > { %v2531_v61 = vmul.f32 %v4661_v41, %v2463_v26  ;;  %v2339_v3 = vadd.f32 %v4587_v11, %v3457_v19  ;;  %v3460_v40 = vadd.f32 %v3459_v48, %v3458_v30  ;;  %vm2495_vm8 = vcmp.ge.f32.partialorder %v2463_v26, 0.0 }
 0x2cb   : > { %v2562_v57 = vsel %vm2494_vm7, %v2462_v47, %v2530_v1 }
 0x2cc   : > { %v2428_v56 = vmul.f32 %v4653_v32, %v2339_v3  ;;  %v2342_v52 = vadd.f32 %v4592_v38, %v3460_v40  ;;  %v2563_v2 = vsel %vm2495_vm8, %v2463_v26, %v2531_v61 }
 0x2cd   : > { %v2588_v49 = vpack.c.bf16 %v2563_v2, %v2562_v57 }
 0x2ce   : > { %v2464_v36 = vadd.f32 %v4657_v60, %v2428_v56  ;;  %v2429_v55 = vmul.f32 %v4653_v32, %v2342_v52  ;;  %v3461_v50 = vpop.f32.mrb[48].mxu1 }
 0x2cf   : > { %v3462_v6 = vpop.f32.mrb[49].mxu1  ;;  %3637 = vmatprep.mubr.msk.bf16.mxu0 %vm807_vm1, %v2588_v49 }
 0x2d0   : > { %v2532_v20 = vmul.f32 %v4661_v41, %v2464_v36  ;;  %v2465_v11 = vadd.f32 %v4657_v60, %v2429_v55  ;;  %v3463_v42 = vadd.f32 %v3462_v6, %v3461_v50  ;;  %v3464_v10 = vpop.f32.mrb[50].mxu1  ;;  %vm2496_vm9 = vcmp.ge.f32.partialorder %v2464_v36, 0.0 }
 0x2d1   : > { %v3465_v0 = vpop.f32.mrb[51].mxu1 }
 0x2d2   : > { %v2533_v38 = vmul.f32 %v4661_v41, %v2465_v11  ;;  %v2347_v13 = vadd.f32 %v3463_v42, %v4602_v34  ;;  %v3466_v46 = vadd.f32 %v3465_v0, %v3464_v10  ;;  %vm2497_vm3 = vcmp.ge.f32.partialorder %v2465_v11, 0.0 }
 0x2d3   : > { %v2564_v21 = vsel %vm2496_vm9, %v2464_v36, %v2532_v20 }
 0x2d4   : > { %v2430_v51 = vmul.f32 %v4653_v32, %v2347_v13  ;;  %v2350_v45 = vadd.f32 %v3466_v46, %v4607_v15  ;;  %v2565_v8 = vsel %vm2497_vm3, %v2465_v11, %v2533_v38 }
 0x2d5   : > { %v2589_v53 = vpack.c.bf16 %v2565_v8, %v2564_v21 }
 0x2d6   : > { %v2466_v58 = vadd.f32 %v4657_v60, %v2430_v51  ;;  %v2431_v43 = vmul.f32 %v4653_v32, %v2350_v45  ;;  %v3467_v22 = vpop.f32.mrb[52].mxu1 }
 0x2d7   : > { %v3468_v4 = vpop.f32.mrb[53].mxu1  ;;  %3638 = vmatmul.mubr.msk.bf16.gmra.mrb[60].mxu0 %vm807_vm1, %v2589_v53 }
 0x2d8   : > { %v2534_v37 = vmul.f32 %v4661_v41, %v2466_v58  ;;  %v2467_v34 = vadd.f32 %v4657_v60, %v2431_v43  ;;  %v3469_v25 = vadd.f32 %v3468_v4, %v3467_v22  ;;  %v3470_v23 = vpop.f32.mrb[54].mxu1  ;;  %vm2498_vm10 = vcmp.ge.f32.partialorder %v2466_v58, 0.0 }
 0x2d9   : > { %v3471_v12 = vpop.f32.mrb[55].mxu1 }
 0x2da   : > { %v2535_v15 = vmul.f32 %v4661_v41, %v2467_v34  ;;  %v2355_v47 = vadd.f32 %v4599_v14, %v3469_v25  ;;  %v3472_v59 = vadd.f32 %v3471_v12, %v3470_v23  ;;  %vm2499_vm11 = vcmp.ge.f32.partialorder %v2467_v34, 0.0 }
 0x2db   : > { %v2566_v1 = vsel %vm2498_vm10, %v2466_v58, %v2534_v37 }
 0x2dc   : > { %v2432_v17 = vmul.f32 %v4653_v32, %v2355_v47  ;;  %v2358_v27 = vadd.f32 %v4605_v63, %v3472_v59  ;;  %v2567_v26 = vsel %vm2499_vm11, %v2467_v34, %v2535_v15 }
 0x2dd   : > { %v2590_v19 = vpack.c.bf16 %v2567_v26, %v2566_v1 }
 0x2de   : > { %v2468_v30 = vadd.f32 %v4657_v60, %v2432_v17  ;;  %v2433_v48 = vmul.f32 %v4653_v32, %v2358_v27  ;;  %v3473_v61 = vpop.f32.mrb[56].mxu1 }
 0x2df   : > { %v3474_v3 = vpop.f32.mrb[57].mxu1  ;;  %3641 = vmatprep.mubr.msk.bf16.mxu0 %vm807_vm1, %v2590_v19 }
 0x2e0   : > { %v2536_v40 = vmul.f32 %v4661_v41, %v2468_v30  ;;  %v2469_v14 = vadd.f32 %v4657_v60, %v2433_v48  ;;  %v3475_v56 = vadd.f32 %v3474_v3, %v3473_v61  ;;  %v3476_v52 = vpop.f32.mrb[58].mxu1  ;;  %vm2500_vm12 = vcmp.ge.f32.partialorder %v2468_v30, 0.0 }
 0x2e1   : > { %v3477_v57 = vpop.f32.mrb[59].mxu1 }
 0x2e2   : > { %v2537_v63 = vmul.f32 %v4661_v41, %v2469_v14  ;;  %v2363_v2 = vadd.f32 %v3475_v56, %v4613_v54  ;;  %v3478_v49 = vadd.f32 %v3477_v57, %v3476_v52  ;;  %vm2501_vm13 = vcmp.ge.f32.partialorder %v2469_v14, 0.0 }
 0x2e3   : > { %v2568_v50 = vsel %vm2500_vm12, %v2468_v30, %v2536_v40  ;;  %vm3124_vm12 = vcmask 519168  }
 0x2e4   : > { %v2434_v36 = vmul.f32 %v4653_v32, %v2363_v2  ;;  %v2366_v55 = vadd.f32 %v3478_v49, %v4618_v44  ;;  %v2569_v6 = vsel %vm2501_vm13, %v2469_v14, %v2537_v63 }
 0x2e5   : > { %v2591_v20 = vpack.c.bf16 %v2569_v6, %v2568_v50 }
 0x2e6   : > { %v2470_v11 = vadd.f32 %v4657_v60, %v2434_v36  ;;  %v2435_v42 = vmul.f32 %v4653_v32, %v2366_v55  ;;  %v3479_v10 = vpop.f32.mrb[60].mxu1 }
 0x2e7   : > { %v3480_v0 = vpop.f32.mrb[61].mxu1  ;;  %3642 = vmatmul.mubr.msk.bf16.gmra.mrb[64].mxu0 %vm807_vm1, %v2591_v20 }
 0x2e8   : > { %v2538_v38 = vmul.f32 %v4661_v41, %v2470_v11  ;;  %v2471_v54 = vadd.f32 %v4657_v60, %v2435_v42  ;;  %v3481_v13 = vadd.f32 %v3480_v0, %v3479_v10  ;;  %v3482_v46 = vpop.f32.mrb[62].mxu1  ;;  %vm2502_vm14 = vcmp.ge.f32.partialorder %v2470_v11, 0.0 }
 0x2e9   : > { %v3483_v51 = vpop.f32.mrb[63].mxu1 }
 0x2ea   : > { %v2539_v44 = vmul.f32 %v4661_v41, %v2471_v54  ;;  %v2371_v45 = vadd.f32 %v4611_v9, %v3481_v13  ;;  %v3484_v21 = vadd.f32 %v3483_v51, %v3482_v46  ;;  %vm2503_vm15 = vcmp.ge.f32.partialorder %v2471_v54, 0.0 }
 0x2eb   : > { %v2570_v58 = vsel %vm2502_vm14, %v2470_v11, %v2538_v38 }
 0x2ec   : > { %v2436_v8 = vmul.f32 %v4653_v32, %v2371_v45  ;;  %v2374_v53 = vadd.f32 %v4616_v7, %v3484_v21  ;;  %v2571_v43 = vsel %vm2503_vm15, %v2471_v54, %v2539_v44 }
 0x2ed   : > { %v2592_v22 = vpack.c.bf16 %v2571_v43, %v2570_v58 }
 0x2ee   : > { %v2472_v4 = vadd.f32 %v4657_v60, %v2436_v8  ;;  %v2437_v37 = vmul.f32 %v4653_v32, %v2374_v53  ;;  %v3485_v34 = vpop.f32.mrb[64].mxu1 }
 0x2ef   : > { %v3486_v25 = vpop.f32.mrb[65].mxu1  ;;  %3645 = vmatprep.mubr.msk.bf16.mxu0 %vm807_vm1, %v2592_v22 }
 0x2f0   : > { %v2540_v23 = vmul.f32 %v4661_v41, %v2472_v4  ;;  %v2473_v9 = vadd.f32 %v4657_v60, %v2437_v37  ;;  %v3487_v12 = vadd.f32 %v3486_v25, %v3485_v34  ;;  %v3488_v15 = vpop.f32.mrb[66].mxu1  ;;  %vm2504_vm0 = vcmp.ge.f32.partialorder %v2472_v4, 0.0 }
 0x2f1   : > { %v3489_v47 = vpop.f32.mrb[67].mxu1 }
 0x2f2   : > { %v2541_v7 = vmul.f32 %v4661_v41, %v2473_v9  ;;  %v2379_v59 = vadd.f32 %v3487_v12, %v4627_v5  ;;  %v3490_v17 = vadd.f32 %v3489_v47, %v3488_v15  ;;  %vm2505_vm2 = vcmp.ge.f32.partialorder %v2473_v9, 0.0 }
 0x2f3   : > { %v2572_v26 = vsel %vm2504_vm0, %v2472_v4, %v2540_v23 }
 0x2f4   : > { %v2438_v27 = vmul.f32 %v4653_v32, %v2379_v59  ;;  %v2382_v1 = vadd.f32 %v3490_v17, %v4635_v62  ;;  %v2573_v19 = vsel %vm2505_vm2, %v2473_v9, %v2541_v7 }
 0x2f5   : > { %v2593_v30 = vpack.c.bf16 %v2573_v19, %v2572_v26 }
 0x2f6   : > { %v2474_v48 = vadd.f32 %v4657_v60, %v2438_v27  ;;  %v2439_v61 = vmul.f32 %v4653_v32, %v2382_v1  ;;  %v3491_v3 = vpop.f32.mrb[68].mxu1 }
 0x2f7   : > { %v3492_v40 = vpop.f32.mrb[69].mxu1  ;;  %3646 = vmatmul.mubr.msk.bf16.gmra.mrb[68].mxu0 %vm807_vm1, %v2593_v30 }
 0x2f8   : > { %v2542_v14 = vmul.f32 %v4661_v41, %v2474_v48  ;;  %v2475_v5 = vadd.f32 %v4657_v60, %v2439_v61  ;;  %v3493_v56 = vadd.f32 %v3492_v40, %v3491_v3  ;;  %v3494_v52 = vpop.f32.mrb[70].mxu1  ;;  %vm2506_vm4 = vcmp.ge.f32.partialorder %v2474_v48, 0.0  ;;  %v2823_v61 = vld [vmem:[%s5001_s6] sm:$0x7] }
 0x2f9   : > { %v3495_v57 = vpop.f32.mrb[71].mxu1  ;;  %v4820_v3 = vrot.slane %v2823_v61, %v3884_v33 }
 0x2fa   : > { %v2543_v62 = vmul.f32 %v4661_v41, %v2475_v5  ;;  %v2387_v63 = vadd.f32 %v4624_v16, %v3493_v56  ;;  %v3496_v2 = vadd.f32 %v3495_v57, %v3494_v52  ;;  %vm2507_vm5 = vcmp.ge.f32.partialorder %v2475_v5, 0.0 }
 0x2fb   : > { %v2574_v55 = vsel %vm2506_vm4, %v2474_v48, %v2542_v14 }
 0x2fc   : > { %v2440_v49 = vmul.f32 %v4653_v32, %v2387_v63  ;;  %v2390_v36 = vadd.f32 %v4630_v29, %v3496_v2  ;;  %v2575_v50 = vsel %vm2507_vm5, %v2475_v5, %v2543_v62 }
 0x2fd   : > { %v2594_v6 = vpack.c.bf16 %v2575_v50, %v2574_v55 }
 0x2fe   : > { %v2476_v20 = vadd.f32 %v4657_v60, %v2440_v49  ;;  %v2441_v11 = vmul.f32 %v4653_v32, %v2390_v36  ;;  %v3497_v42 = vpop.f32.mrb[72].mxu1 }
 0x2ff   : > { %v3498_v10 = vpop.f32.mrb[73].mxu1  ;;  %3649 = vmatprep.mubr.msk.bf16.mxu0 %vm807_vm1, %v2594_v6 }
 0x300   : > { %v2544_v0 = vmul.f32 %v4661_v41, %v2476_v20  ;;  %v2477_v16 = vadd.f32 %v4657_v60, %v2441_v11  ;;  %v3499_v38 = vadd.f32 %v3498_v10, %v3497_v42  ;;  %v3500_v54 = vpop.f32.mrb[74].mxu1  ;;  %vm2508_vm6 = vcmp.ge.f32.partialorder %v2476_v20, 0.0 }
 0x301   : > { %v3501_v13 = vpop.f32.mrb[75].mxu1 }
 0x302   : > { %v2545_v29 = vmul.f32 %v4661_v41, %v2477_v16  ;;  %v3502_v46 = vadd.f32 %v3501_v13, %v3500_v54  ;;  %v2395_v51 = vadd.f32 %v3499_v38, %v4677_v24  ;;  %vm2509_vm7 = vcmp.ge.f32.partialorder %v2477_v16, 0.0 }
 0x303   : > { %v2576_v21 = vsel %vm2508_vm6, %v2476_v20, %v2544_v0 }
 0x304   : > { %v2442_v44 = vmul.f32 %v4653_v32, %v2395_v51  ;;  %v2398_v45 = vadd.f32 %v3502_v46, %v4683_v39  ;;  %v2577_v8 = vsel %vm2509_vm7, %v2477_v16, %v2545_v29 }
 0x305   : > { %v2595_v53 = vpack.c.bf16 %v2577_v8, %v2576_v21 }
 0x306   : > { %v2478_v58 = vadd.f32 %v4657_v60, %v2442_v44  ;;  %v2443_v43 = vmul.f32 %v4653_v32, %v2398_v45  ;;  %v3503_v22 = vpop.f32.mrb[76].mxu1 }
 0x307   : > { %v3504_v4 = vpop.f32.mrb[77].mxu1  ;;  %3650 = vmatmul.mubr.msk.bf16.gmra.mrb[72].mxu0 %vm807_vm1, %v2595_v53 }
 0x308   : > { %v2546_v37 = vmul.f32 %v4661_v41, %v2478_v58  ;;  %v2479_v24 = vadd.f32 %v4657_v60, %v2443_v43  ;;  %v3505_v34 = vadd.f32 %v3504_v4, %v3503_v22  ;;  %v3506_v25 = vpop.f32.mrb[78].mxu1  ;;  %vm2510_vm8 = vcmp.ge.f32.partialorder %v2478_v58, 0.0 }
 0x309   : > { %v3507_v23 = vpop.f32.mrb[79].mxu1 }
 0x30a   : > { %vm2511_vm9 = vcmp.ge.f32.partialorder %v2479_v24, 0.0  ;;  %v2547_v39 = vmul.f32 %v4661_v41, %v2479_v24  ;;  %v2403_v9 = vadd.f32 %v4673_v18, %v3505_v34  ;;  %v3508_v12 = vadd.f32 %v3507_v23, %v3506_v25 }
 0x30b   : > { %v2578_v7 = vsel %vm2510_vm8, %v2478_v58, %v2546_v37 }
 0x30c   : > { %v2444_v15 = vmul.f32 %v4653_v32, %v2403_v9  ;;  %v2406_v47 = vadd.f32 %v4679_v28, %v3508_v12  ;;  %v2579_v59 = vsel %vm2511_vm9, %v2479_v24, %v2547_v39 }
 0x30d   : > { %v2596_v17 = vpack.c.bf16 %v2579_v59, %v2578_v7 }
 0x30e   : > { %v2480_v27 = vadd.f32 %v4657_v60, %v2444_v15  ;;  %v2445_v1 = vmul.f32 %v4653_v32, %v2406_v47  ;;  %v4817_v32 = vrot.slane %v2823_v61, %v3879_v31 }
 0x30f   : > { %3653 = vmatprep.mubr.msk.bf16.mxu0 %vm807_vm1, %v2596_v17 }
 0x310   : > { %v2548_v26 = vmul.f32 %v4661_v41, %v2480_v27  ;;  %v2481_v19 = vadd.f32 %v4657_v60, %v2445_v1  ;;  %vm2512_vm3 = vcmp.ge.f32.partialorder %v2480_v27, 0.0 }
 0x312   : > { %v2549_v18 = vmul.f32 %v4661_v41, %v2481_v19  ;;  %vm2513_vm10 = vcmp.ge.f32.partialorder %v2481_v19, 0.0  ;;  %v2580_v30 = vsel %vm2512_vm3, %v2480_v27, %v2548_v26  ;;  %v4824_v41 = vrot.slane %v2823_v61, %v3889_v35 }
 0x314   : > { %v2581_v48 = vsel %vm2513_vm10, %v2481_v19, %v2549_v18 }
 0x315   : > { %v2597_v28 = vpack.c.bf16 %v2581_v48, %v2580_v30 }
 0x317   : > { %3654 = vmatmul.mubr.msk.bf16.gmra.mrb[76].mxu0 %vm807_vm1, %v2597_v28 }
 0x366   : > { %v3627_v60 = vpop.f32.mrb[48].mxu0 }
 0x367   : > { %v2830_v40 = vmul.f32 %v3627_v60, %v4817_v32  ;;  %v2696_v14 = vpop.f32.mrb[49].mxu0 }
 0x368   : > { %v2828_v5 = vmul.f32 %v4817_v32, %v2696_v14  ;;  %v3628_v56 = vpop.f32.mrb[50].mxu0 }
 0x369   : > { %v2866_v52 = vadd.f32 %v4820_v3, %v2830_v40  ;;  %v2831_v57 = vmul.f32 %v3628_v56, %v4817_v32  ;;  %v2699_v31 = vpop.f32.mrb[51].mxu0 }
 0x36a   : > { %v2864_v62 = vadd.f32 %v4820_v3, %v2828_v5  ;;  %v2829_v33 = vmul.f32 %v4817_v32, %v2699_v31 }
 0x36b   : > { %vm2898_vm1 = vcmp.ge.f32.partialorder %v2866_v52, 0.0  ;;  %v2934_v63 = vmul.f32 %v4824_v41, %v2866_v52  ;;  %v2867_v2 = vadd.f32 %v4820_v3, %v2831_v57 }
 0x36c   : > { %vm2896_vm11 = vcmp.ge.f32.partialorder %v2864_v62, 0.0  ;;  %v2932_v35 = vmul.f32 %v4824_v41, %v2864_v62  ;;  %v2865_v49 = vadd.f32 %v4820_v3, %v2829_v33 }
 0x36d   : > { %v2966_v36 = vsel %vm2898_vm1, %v2866_v52, %v2934_v63  ;;  %vm2899_vm13 = vcmp.ge.f32.partialorder %v2867_v2, 0.0  ;;  %v2935_v55 = vmul.f32 %v4824_v41, %v2867_v2 }
 0x36e   : > { %v3347_v50 = vpack.c.bf16 %v2966_v36, %v2966_v36  ;;  %v2964_v6 = vsel %vm2896_vm11, %v2864_v62, %v2932_v35  ;;  %vm2897_vm14 = vcmp.ge.f32.partialorder %v2865_v49, 0.0  ;;  %v2933_v20 = vmul.f32 %v4824_v41, %v2865_v49 }
 0x36f   : > { %v3345_v11 = vpack.c.bf16 %v2964_v6, %v2964_v6  ;;  %v2967_v42 = vsel %vm2899_vm13, %v2867_v2, %v2935_v55 }
 0x370   : > { %3127 = vst.msk [vmem:[%s4840_s30 + $0x8] sm:$0xf] %vm3124_vm12, %v3347_v50  ;;  %v3348_v10 = vpack.c.bf16 %v2967_v42, %v2967_v42  ;;  %v2965_v0 = vsel %vm2897_vm14, %v2865_v49, %v2933_v20 }
 0x371   : > { %3125 = vst.msk [vmem:[%s4840_s30] sm:$0xf] %vm3124_vm12, %v3345_v11  ;;  %v3346_v16 = vpack.c.bf16 %v2965_v0, %v2965_v0 }
 0x372   : > { %3128 = vst.msk [vmem:[%s4840_s30 + $0xc] sm:$0xf] %vm3124_vm12, %v3348_v10 }
 0x373   : > { %3126 = vst.msk [vmem:[%s4840_s30 + $0x4] sm:$0xf] %vm3124_vm12, %v3346_v16 }
 0x382   : > { %v3631_v38 = vpop.f32.mrb[52].mxu0 }
 0x383   : > { %v2834_v54 = vmul.f32 %v3631_v38, %v4817_v32  ;;  %v2712_v13 = vpop.f32.mrb[53].mxu0 }
 0x384   : > { %v2832_v29 = vmul.f32 %v4817_v32, %v2712_v13  ;;  %v3632_v46 = vpop.f32.mrb[54].mxu0 }
 0x385   : > { %v2870_v51 = vadd.f32 %v4820_v3, %v2834_v54  ;;  %v2835_v44 = vmul.f32 %v3632_v46, %v4817_v32  ;;  %v2715_v45 = vpop.f32.mrb[55].mxu0 }
 0x386   : > { %v2868_v21 = vadd.f32 %v4820_v3, %v2832_v29  ;;  %v2833_v8 = vmul.f32 %v4817_v32, %v2715_v45 }
 0x387   : > { %vm2902_vm15 = vcmp.ge.f32.partialorder %v2870_v51, 0.0  ;;  %v2938_v53 = vmul.f32 %v4824_v41, %v2870_v51  ;;  %v2871_v58 = vadd.f32 %v4820_v3, %v2835_v44 }
 0x388   : > { %vm2900_vm0 = vcmp.ge.f32.partialorder %v2868_v21, 0.0  ;;  %v2936_v43 = vmul.f32 %v4824_v41, %v2868_v21  ;;  %v2869_v22 = vadd.f32 %v4820_v3, %v2833_v8 }
 0x389   : > { %v2970_v4 = vsel %vm2902_vm15, %v2870_v51, %v2938_v53  ;;  %vm2903_vm2 = vcmp.ge.f32.partialorder %v2871_v58, 0.0  ;;  %v2939_v37 = vmul.f32 %v4824_v41, %v2871_v58 }
 0x38a   : > { %v3351_v24 = vpack.c.bf16 %v2970_v4, %v2970_v4  ;;  %v2968_v34 = vsel %vm2900_vm0, %v2868_v21, %v2936_v43  ;;  %vm2901_vm4 = vcmp.ge.f32.partialorder %v2869_v22, 0.0  ;;  %v2937_v25 = vmul.f32 %v4824_v41, %v2869_v22 }
 0x38b   : > { %v3349_v23 = vpack.c.bf16 %v2968_v34, %v2968_v34  ;;  %v2971_v39 = vsel %vm2903_vm2, %v2871_v58, %v2939_v37 }
 0x38c   : > { %3131 = vst.msk [vmem:[%s4840_s30 + $0x18] sm:$0xf] %vm3124_vm12, %v3351_v24  ;;  %v3352_v9 = vpack.c.bf16 %v2971_v39, %v2971_v39  ;;  %v2969_v12 = vsel %vm2901_vm4, %v2869_v22, %v2937_v25 }
 0x38d   : > { %3129 = vst.msk [vmem:[%s4840_s30 + $0x10] sm:$0xf] %vm3124_vm12, %v3349_v23  ;;  %v3350_v15 = vpack.c.bf16 %v2969_v12, %v2969_v12 }
 0x38e   : > { %3132 = vst.msk [vmem:[%s4840_s30 + $0x1c] sm:$0xf] %vm3124_vm12, %v3352_v9 }
 0x38f   : > { %3130 = vst.msk [vmem:[%s4840_s30 + $0x14] sm:$0xf] %vm3124_vm12, %v3350_v15 }
 0x39a   : > { %v3635_v47 = vpop.f32.mrb[56].mxu0 }
 0x39b   : > { %v2838_v7 = vmul.f32 %v3635_v47, %v4817_v32  ;;  %v2728_v59 = vpop.f32.mrb[57].mxu0 }
 0x39c   : > { %v2836_v17 = vmul.f32 %v4817_v32, %v2728_v59  ;;  %v3636_v27 = vpop.f32.mrb[58].mxu0 }
 0x39d   : > { %v2874_v1 = vadd.f32 %v4820_v3, %v2838_v7  ;;  %v2839_v26 = vmul.f32 %v3636_v27, %v4817_v32  ;;  %v2731_v19 = vpop.f32.mrb[59].mxu0 }
 0x39e   : > { %v2872_v18 = vadd.f32 %v4820_v3, %v2836_v17  ;;  %v2837_v30 = vmul.f32 %v4817_v32, %v2731_v19 }
 0x39f   : > { %vm2906_vm5 = vcmp.ge.f32.partialorder %v2874_v1, 0.0  ;;  %v2942_v48 = vmul.f32 %v4824_v41, %v2874_v1  ;;  %v2875_v28 = vadd.f32 %v4820_v3, %v2839_v26 }
 0x3a0   : > { %vm2904_vm6 = vcmp.ge.f32.partialorder %v2872_v18, 0.0  ;;  %v2940_v61 = vmul.f32 %v4824_v41, %v2872_v18  ;;  %v2873_v60 = vadd.f32 %v4820_v3, %v2837_v30 }
 0x3a1   : > { %v2974_v40 = vsel %vm2906_vm5, %v2874_v1, %v2942_v48  ;;  %vm2907_vm7 = vcmp.ge.f32.partialorder %v2875_v28, 0.0  ;;  %v2943_v14 = vmul.f32 %v4824_v41, %v2875_v28 }
 0x3a2   : > { %v3355_v5 = vpack.c.bf16 %v2974_v40, %v2974_v40  ;;  %v2972_v56 = vsel %vm2904_vm6, %v2872_v18, %v2940_v61  ;;  %vm2905_vm8 = vcmp.ge.f32.partialorder %v2873_v60, 0.0  ;;  %v2941_v52 = vmul.f32 %v4824_v41, %v2873_v60 }
 0x3a3   : > { %v3353_v57 = vpack.c.bf16 %v2972_v56, %v2972_v56  ;;  %v2975_v31 = vsel %vm2907_vm7, %v2875_v28, %v2943_v14 }
 0x3a4   : > { %3135 = vst.msk [vmem:[%s4840_s30 + $0x28] sm:$0xf] %vm3124_vm12, %v3355_v5  ;;  %v3356_v62 = vpack.c.bf16 %v2975_v31, %v2975_v31  ;;  %v2973_v33 = vsel %vm2905_vm8, %v2873_v60, %v2941_v52 }
 0x3a5   : > { %3133 = vst.msk [vmem:[%s4840_s30 + $0x20] sm:$0xf] %vm3124_vm12, %v3353_v57  ;;  %v3354_v63 = vpack.c.bf16 %v2973_v33, %v2973_v33 }
 0x3a6   : > { %3136 = vst.msk [vmem:[%s4840_s30 + $0x2c] sm:$0xf] %vm3124_vm12, %v3356_v62 }
 0x3a7   : > { %3134 = vst.msk [vmem:[%s4840_s30 + $0x24] sm:$0xf] %vm3124_vm12, %v3354_v63 }
 0x3aa   : > { %v3639_v2 = vpop.f32.mrb[60].mxu0 }
 0x3ab   : > { %v2842_v35 = vmul.f32 %v3639_v2, %v4817_v32  ;;  %v2744_v49 = vpop.f32.mrb[61].mxu0 }
 0x3ac   : > { %v2840_v36 = vmul.f32 %v4817_v32, %v2744_v49  ;;  %v3640_v55 = vpop.f32.mrb[62].mxu0 }
 0x3ad   : > { %v2878_v50 = vadd.f32 %v4820_v3, %v2842_v35  ;;  %v2843_v6 = vmul.f32 %v3640_v55, %v4817_v32  ;;  %v2747_v20 = vpop.f32.mrb[63].mxu0 }
 0x3ae   : > { %v2876_v11 = vadd.f32 %v4820_v3, %v2840_v36  ;;  %v2841_v42 = vmul.f32 %v4817_v32, %v2747_v20 }
 0x3af   : > { %vm2910_vm9 = vcmp.ge.f32.partialorder %v2878_v50, 0.0  ;;  %v2946_v10 = vmul.f32 %v4824_v41, %v2878_v50  ;;  %v2879_v0 = vadd.f32 %v4820_v3, %v2843_v6 }
 0x3b0   : > { %vm2908_vm3 = vcmp.ge.f32.partialorder %v2876_v11, 0.0  ;;  %v2944_v16 = vmul.f32 %v4824_v41, %v2876_v11  ;;  %v2877_v38 = vadd.f32 %v4820_v3, %v2841_v42 }
 0x3b1   : > { %v2978_v54 = vsel %vm2910_vm9, %v2878_v50, %v2946_v10  ;;  %vm2911_vm10 = vcmp.ge.f32.partialorder %v2879_v0, 0.0  ;;  %v2947_v13 = vmul.f32 %v4824_v41, %v2879_v0 }
 0x3b2   : > { %v3359_v29 = vpack.c.bf16 %v2978_v54, %v2978_v54  ;;  %v2976_v46 = vsel %vm2908_vm3, %v2876_v11, %v2944_v16  ;;  %vm2909_vm1 = vcmp.ge.f32.partialorder %v2877_v38, 0.0  ;;  %v2945_v51 = vmul.f32 %v4824_v41, %v2877_v38 }
 0x3b3   : > { %v3357_v44 = vpack.c.bf16 %v2976_v46, %v2976_v46  ;;  %v2979_v45 = vsel %vm2911_vm10, %v2879_v0, %v2947_v13 }
 0x3b4   : > { %3139 = vst.msk [vmem:[%s4840_s30 + $0x38] sm:$0xf] %vm3124_vm12, %v3359_v29  ;;  %v3360_v21 = vpack.c.bf16 %v2979_v45, %v2979_v45  ;;  %v2977_v8 = vsel %vm2909_vm1, %v2877_v38, %v2945_v51 }
 0x3b5   : > { %3137 = vst.msk [vmem:[%s4840_s30 + $0x30] sm:$0xf] %vm3124_vm12, %v3357_v44  ;;  %v3358_v53 = vpack.c.bf16 %v2977_v8, %v2977_v8 }
 0x3b6   : > { %3140 = vst.msk [vmem:[%s4840_s30 + $0x3c] sm:$0xf] %vm3124_vm12, %v3360_v21 }
 0x3b7   : > { %3138 = vst.msk [vmem:[%s4840_s30 + $0x34] sm:$0xf] %vm3124_vm12, %v3358_v53 }
 0x3ba   : > { %v3643_v58 = vpop.f32.mrb[64].mxu0 }
 0x3bb   : > { %v2846_v43 = vmul.f32 %v3643_v58, %v4817_v32  ;;  %v2760_v22 = vpop.f32.mrb[65].mxu0 }
 0x3bc   : > { %v2844_v4 = vmul.f32 %v4817_v32, %v2760_v22  ;;  %v3644_v37 = vpop.f32.mrb[66].mxu0 }
 0x3bd   : > { %v2882_v24 = vadd.f32 %v4820_v3, %v2846_v43  ;;  %v2847_v34 = vmul.f32 %v3644_v37, %v4817_v32  ;;  %v2763_v25 = vpop.f32.mrb[67].mxu0 }
 0x3be   : > { %v2880_v23 = vadd.f32 %v4820_v3, %v2844_v4  ;;  %v2845_v39 = vmul.f32 %v4817_v32, %v2763_v25 }
 0x3bf   : > { %vm2914_vm11 = vcmp.ge.f32.partialorder %v2882_v24, 0.0  ;;  %v2950_v9 = vmul.f32 %v4824_v41, %v2882_v24  ;;  %v2883_v12 = vadd.f32 %v4820_v3, %v2847_v34 }
 0x3c0   : > { %vm2912_vm13 = vcmp.ge.f32.partialorder %v2880_v23, 0.0  ;;  %v2948_v15 = vmul.f32 %v4824_v41, %v2880_v23  ;;  %v2881_v47 = vadd.f32 %v4820_v3, %v2845_v39 }
 0x3c1   : > { %v2982_v7 = vsel %vm2914_vm11, %v2882_v24, %v2950_v9  ;;  %vm2915_vm14 = vcmp.ge.f32.partialorder %v2883_v12, 0.0  ;;  %v2951_v59 = vmul.f32 %v4824_v41, %v2883_v12 }
 0x3c2   : > { %v3363_v17 = vpack.c.bf16 %v2982_v7, %v2982_v7  ;;  %v2980_v27 = vsel %vm2912_vm13, %v2880_v23, %v2948_v15  ;;  %vm2913_vm15 = vcmp.ge.f32.partialorder %v2881_v47, 0.0  ;;  %v2949_v1 = vmul.f32 %v4824_v41, %v2881_v47 }
 0x3c3   : > { %v3361_v26 = vpack.c.bf16 %v2980_v27, %v2980_v27  ;;  %v2983_v19 = vsel %vm2915_vm14, %v2883_v12, %v2951_v59 }
 0x3c4   : > { %3143 = vst.msk [vmem:[%s4840_s30 + $0x48] sm:$0xf] %vm3124_vm12, %v3363_v17  ;;  %v3364_v18 = vpack.c.bf16 %v2983_v19, %v2983_v19  ;;  %v2981_v30 = vsel %vm2913_vm15, %v2881_v47, %v2949_v1 }
 0x3c5   : > { %3141 = vst.msk [vmem:[%s4840_s30 + $0x40] sm:$0xf] %vm3124_vm12, %v3361_v26  ;;  %v3362_v48 = vpack.c.bf16 %v2981_v30, %v2981_v30 }
 0x3c6   : > { %3144 = vst.msk [vmem:[%s4840_s30 + $0x4c] sm:$0xf] %vm3124_vm12, %v3364_v18 }
 0x3c7   : > { %3142 = vst.msk [vmem:[%s4840_s30 + $0x44] sm:$0xf] %vm3124_vm12, %v3362_v48 }
 0x3ca   : > { %v3647_v28 = vpop.f32.mrb[68].mxu0 }
 0x3cb   : > { %v2850_v61 = vmul.f32 %v3647_v28, %v4817_v32  ;;  %v2776_v60 = vpop.f32.mrb[69].mxu0 }
 0x3cc   : > { %v2848_v40 = vmul.f32 %v4817_v32, %v2776_v60  ;;  %v3648_v14 = vpop.f32.mrb[70].mxu0 }
 0x3cd   : > { %v2886_v5 = vadd.f32 %v4820_v3, %v2850_v61  ;;  %v2851_v56 = vmul.f32 %v3648_v14, %v4817_v32  ;;  %v2779_v52 = vpop.f32.mrb[71].mxu0 }
 0x3ce   : > { %v2884_v57 = vadd.f32 %v4820_v3, %v2848_v40  ;;  %v2849_v31 = vmul.f32 %v4817_v32, %v2779_v52 }
 0x3cf   : > { %vm2918_vm0 = vcmp.ge.f32.partialorder %v2886_v5, 0.0  ;;  %v2954_v62 = vmul.f32 %v4824_v41, %v2886_v5  ;;  %v2887_v33 = vadd.f32 %v4820_v3, %v2851_v56 }
 0x3d0   : > { %vm2916_vm2 = vcmp.ge.f32.partialorder %v2884_v57, 0.0  ;;  %v2952_v63 = vmul.f32 %v4824_v41, %v2884_v57  ;;  %v2885_v2 = vadd.f32 %v4820_v3, %v2849_v31 }
 0x3d1   : > { %v2986_v35 = vsel %vm2918_vm0, %v2886_v5, %v2954_v62  ;;  %vm2919_vm4 = vcmp.ge.f32.partialorder %v2887_v33, 0.0  ;;  %v2955_v49 = vmul.f32 %v4824_v41, %v2887_v33 }
 0x3d2   : > { %v3367_v36 = vpack.c.bf16 %v2986_v35, %v2986_v35  ;;  %v2984_v55 = vsel %vm2916_vm2, %v2884_v57, %v2952_v63  ;;  %vm2917_vm5 = vcmp.ge.f32.partialorder %v2885_v2, 0.0  ;;  %v2953_v50 = vmul.f32 %v4824_v41, %v2885_v2 }
 0x3d3   : > { %v3365_v6 = vpack.c.bf16 %v2984_v55, %v2984_v55  ;;  %v2987_v20 = vsel %vm2919_vm4, %v2887_v33, %v2955_v49 }
 0x3d4   : > { %3147 = vst.msk [vmem:[%s4840_s30 + $0x58] sm:$0xf] %vm3124_vm12, %v3367_v36  ;;  %v3368_v11 = vpack.c.bf16 %v2987_v20, %v2987_v20  ;;  %v2985_v42 = vsel %vm2917_vm5, %v2885_v2, %v2953_v50 }
 0x3d5   : > { %3145 = vst.msk [vmem:[%s4840_s30 + $0x50] sm:$0xf] %vm3124_vm12, %v3365_v6  ;;  %v3366_v10 = vpack.c.bf16 %v2985_v42, %v2985_v42 }
 0x3d6   : > { %3148 = vst.msk [vmem:[%s4840_s30 + $0x5c] sm:$0xf] %vm3124_vm12, %v3368_v11 }
 0x3d7   : > { %3146 = vst.msk [vmem:[%s4840_s30 + $0x54] sm:$0xf] %vm3124_vm12, %v3366_v10 }
 0x3da   : > { %v3651_v0 = vpop.f32.mrb[72].mxu0 }
 0x3db   : > { %v2854_v16 = vmul.f32 %v3651_v0, %v4817_v32  ;;  %v2792_v38 = vpop.f32.mrb[73].mxu0 }
 0x3dc   : > { %v2852_v54 = vmul.f32 %v4817_v32, %v2792_v38  ;;  %v3652_v13 = vpop.f32.mrb[74].mxu0 }
 0x3dd   : > { %v2890_v29 = vadd.f32 %v4820_v3, %v2854_v16  ;;  %v2855_v46 = vmul.f32 %v3652_v13, %v4817_v32  ;;  %v2795_v51 = vpop.f32.mrb[75].mxu0 }
 0x3de   : > { %v2888_v44 = vadd.f32 %v4820_v3, %v2852_v54  ;;  %v2853_v45 = vmul.f32 %v4817_v32, %v2795_v51 }
 0x3df   : > { %vm2922_vm6 = vcmp.ge.f32.partialorder %v2890_v29, 0.0  ;;  %v2958_v21 = vmul.f32 %v4824_v41, %v2890_v29  ;;  %v2891_v8 = vadd.f32 %v4820_v3, %v2855_v46 }
 0x3e0   : > { %vm2920_vm7 = vcmp.ge.f32.partialorder %v2888_v44, 0.0  ;;  %v2956_v53 = vmul.f32 %v4824_v41, %v2888_v44  ;;  %v2889_v58 = vadd.f32 %v4820_v3, %v2853_v45 }
 0x3e1   : > { %v2990_v43 = vsel %vm2922_vm6, %v2890_v29, %v2958_v21  ;;  %vm2923_vm8 = vcmp.ge.f32.partialorder %v2891_v8, 0.0  ;;  %v2959_v22 = vmul.f32 %v4824_v41, %v2891_v8 }
 0x3e2   : > { %v3371_v4 = vpack.c.bf16 %v2990_v43, %v2990_v43  ;;  %v2988_v37 = vsel %vm2920_vm7, %v2888_v44, %v2956_v53  ;;  %vm2921_vm9 = vcmp.ge.f32.partialorder %v2889_v58, 0.0  ;;  %v2957_v24 = vmul.f32 %v4824_v41, %v2889_v58 }
 0x3e3   : > { %v3369_v34 = vpack.c.bf16 %v2988_v37, %v2988_v37  ;;  %v2991_v25 = vsel %vm2923_vm8, %v2891_v8, %v2959_v22 }
 0x3e4   : > { %3151 = vst.msk [vmem:[%s4840_s30 + $0x68] sm:$0xf] %vm3124_vm12, %v3371_v4  ;;  %v3372_v23 = vpack.c.bf16 %v2991_v25, %v2991_v25  ;;  %v2989_v39 = vsel %vm2921_vm9, %v2889_v58, %v2957_v24 }
 0x3e5   : > { %3149 = vst.msk [vmem:[%s4840_s30 + $0x60] sm:$0xf] %vm3124_vm12, %v3369_v34  ;;  %v3370_v9 = vpack.c.bf16 %v2989_v39, %v2989_v39 }
 0x3e6   : > { %3152 = vst.msk [vmem:[%s4840_s30 + $0x6c] sm:$0xf] %vm3124_vm12, %v3372_v23 }
 0x3e7   : > { %3150 = vst.msk [vmem:[%s4840_s30 + $0x64] sm:$0xf] %vm3124_vm12, %v3370_v9 }
 0x3ea   : > { %v3655_v12 = vpop.f32.mrb[76].mxu0 }
 0x3eb   : > { %v2858_v15 = vmul.f32 %v3655_v12, %v4817_v32  ;;  %v2808_v47 = vpop.f32.mrb[77].mxu0 }
 0x3ec   : > { %v2856_v7 = vmul.f32 %v4817_v32, %v2808_v47  ;;  %v3656_v59 = vpop.f32.mrb[78].mxu0 }
 0x3ed   : > { %v2894_v17 = vadd.f32 %v4820_v3, %v2858_v15  ;;  %v2859_v27 = vmul.f32 %v3656_v59, %v4817_v32  ;;  %v2811_v1 = vpop.f32.mrb[79].mxu0 }
 0x3ee   : > { %v2892_v26 = vadd.f32 %v4820_v3, %v2856_v7  ;;  %v2857_v19 = vmul.f32 %v4817_v32, %v2811_v1 }
 0x3ef   : > { %vm2926_vm3 = vcmp.ge.f32.partialorder %v2894_v17, 0.0  ;;  %v2962_v18 = vmul.f32 %v4824_v41, %v2894_v17  ;;  %v2895_v30 = vadd.f32 %v4820_v3, %v2859_v27 }
 0x3f0   : > { %vm2924_vm10 = vcmp.ge.f32.partialorder %v2892_v26, 0.0  ;;  %v2960_v48 = vmul.f32 %v4824_v41, %v2892_v26  ;;  %v2893_v28 = vadd.f32 %v4820_v3, %v2857_v19 }
 0x3f1   : > { %v2994_v61 = vsel %vm2926_vm3, %v2894_v17, %v2962_v18  ;;  %vm2927_vm1 = vcmp.ge.f32.partialorder %v2895_v30, 0.0  ;;  %v2963_v60 = vmul.f32 %v4824_v41, %v2895_v30 }
 0x3f2   : > { %v3375_v40 = vpack.c.bf16 %v2994_v61, %v2994_v61  ;;  %v2992_v32 = vsel %vm2924_vm10, %v2892_v26, %v2960_v48  ;;  %vm2925_vm11 = vcmp.ge.f32.partialorder %v2893_v28, 0.0  ;;  %v2961_v14 = vmul.f32 %v4824_v41, %v2893_v28 }
 0x3f3   : > { %v3373_v5 = vpack.c.bf16 %v2992_v32, %v2992_v32  ;;  %v2995_v56 = vsel %vm2927_vm1, %v2895_v30, %v2963_v60 }
 0x3f4   : > { %3155 = vst.msk [vmem:[%s4840_s30 + $0x78] sm:$0xf] %vm3124_vm12, %v3375_v40  ;;  %v3376_v52 = vpack.c.bf16 %v2995_v56, %v2995_v56  ;;  %v2993_v57 = vsel %vm2925_vm11, %v2893_v28, %v2961_v14 }
 0x3f5   : > { %3153 = vst.msk [vmem:[%s4840_s30 + $0x70] sm:$0xf] %vm3124_vm12, %v3373_v5  ;;  %v3374_v31 = vpack.c.bf16 %v2993_v57, %v2993_v57 }
 0x3f6   : > { %3156 = vst.msk [vmem:[%s4840_s30 + $0x7c] sm:$0xf] %vm3124_vm12, %v3376_v52 }
 0x3f7   : > { %3154 = vst.msk [vmem:[%s4840_s30 + $0x74] sm:$0xf] %vm3124_vm12, %v3374_v31 }
 0x3f8 PF: > { %s17_s24 = sadd.s32 1, %s3723_s24  }
 0x3f9   : > { %p14_p4 = scmp.ge.s32.totalorder %s17_s24, 4  }
 0x3fb   :  { %16 = sbr.rel (!%p14_p4) target bundleno = 1 (0x1), region = 81 }

</bundles_post_ra>
